<compile_context>
chip_gen: v6e
topology: v6e:2x2x1
jax: 0.10.0
libtpu: 0.0.40
codegen_flags: <defaults>
</compile_context>

<pallas_src>
import functools
import math

import numpy as np

import jax
import jax.numpy as jnp
from jax.experimental import pallas as pl
from jax.experimental.pallas import tpu as pltpu


# ----------------------------------------------------------------------------
# Constant layout helpers (numpy, built at trace time from static shapes)
# ----------------------------------------------------------------------------
def _tap_masks(H, W):
    """(9, M) 0/1 masks: tap k=(dy+1)*3+(dx+1) is valid where (h+dy, w+dx) is
    inside the image (the conv zero-padding)."""
    M = H * W
    r = np.arange(M)
    h, w = r // W, r % W
    masks = np.zeros((9, M), np.float32)
    for k in range(9):
        dy, dx = k // 3 - 1, k % 3 - 1
        valid = (h + dy >= 0) & (h + dy < H) & (w + dx >= 0) & (w + dx < W)
        masks[k][valid] = 1.0
    return masks


def _tap_shift_matrices(H, W):
    """(9, M, M) 0/1 matrices: (X @ T_k)[c, r] = X[c, (h+dy, w+dx)] or 0 if OOB."""
    M = H * W
    r = np.arange(M)
    h, w = r // W, r % W
    mats = np.zeros((9, M, M), np.float32)
    for k in range(9):
        dy, dx = k // 3 - 1, k % 3 - 1
        hv, wv = h + dy, w + dx
        valid = (hv >= 0) & (hv < H) & (wv >= 0) & (wv < W)
        mats[k][(hv * W + wv)[valid], r[valid]] = 1.0
    return mats


def _pool_select(H, W):
    """(M, M/4) selection matrix: picks the (even h, even w) pixels."""
    M = H * W
    H2, W2 = H // 2, W // 2
    Mo = H2 * W2
    S = np.zeros((M, Mo), np.float32)
    j = np.arange(Mo)
    src = (2 * (j // W2)) * W + 2 * (j % W2)
    S[src, j] = 1.0
    return S


def _upsample_scatter(H, W):
    """(4, M, 4M) scatter matrices for ConvTranspose2d(kernel=2, stride=2)."""
    Mi = H * W
    Wo = 2 * W
    Mo = 4 * Mi
    i = np.arange(Mi)
    h, w = i // W, i % W
    mats = []
    for kh in range(2):
        for kw in range(2):
            P = np.zeros((Mi, Mo), np.float32)
            P[i, (2 * h + kh) * Wo + (2 * w + kw)] = 1.0
            mats.append(P)
    return np.stack(mats)


# ----------------------------------------------------------------------------
# The fused Pallas kernel (whole forward pass, one image per grid step)
# ----------------------------------------------------------------------------
def _denoise_kernel(
    x_ref, step_ref,
    e1w1, e1b1, e1w2, e1b2,
    e2w1, e2b1, e2w2, e2b2,
    bw1, bb1, bw2, bb2,
    tw1, tb1, tw2, tb2,
    u2w, u2b,
    d2w1, d2b1, d2w2, d2b2,
    u1w, u1b,
    d1w1, d1b1, d1w2, d1b2,
    ow, ob,
    masks1, shm2, shm3, psel1, psel2, up2p, up1p,
    o_ref,
    *, W1,
):
    f32 = jnp.float32
    M1 = x_ref.shape[-1]

    def mm(a, b):
        return jnp.dot(a, b, preferred_element_type=f32)

    # Hoisted once: level-1 boundary masks, each (1, M1).
    msk1 = [masks1[k] for k in range(9)]

    def taps_l1(x):
        # 9 masked shifted copies of x:(C, M1) via XLU rolls + lane masks.
        out = []
        for k in range(9):
            if k == 4:
                out.append(x)
                continue
            dy, dx = k // 3 - 1, k % 3 - 1
            s = dy * W1 + dx
            out.append(pltpu.roll(x, (-s) % M1, axis=1) * msk1[k])
        return out

    def taps_mat(x, sh_ref):
        # 9 shifted copies via tiny constant 0/1 shift matrices (levels 2/3).
        return [x if k == 4 else mm(x, sh_ref[k]) for k in range(9)]

    def conv3x3(srcs, taps_fn, w_ref, b_ref, relu=True):
        # srcs: list of (Cin_i, M); skip "concat" is handled by the tap stacking.
        per_src = [taps_fn(s) for s in srcs]
        pieces = [per_src[si][k] for k in range(9) for si in range(len(srcs))]
        stacked = jnp.concatenate(pieces, axis=0)        # (9*sum Cin, M)
        out = mm(w_ref[...], stacked) + b_ref[...]       # single stacked-K matmul
        return jnp.maximum(out, 0.0) if relu else out

    def maxpool_l1(x):
        # right / below neighbours via rolls; selected (even, even) pixels only
        # ever use in-image neighbours, so no mask is needed.
        m1 = jnp.maximum(x, pltpu.roll(x, (M1 - 1) % M1, axis=1))
        m2 = jnp.maximum(m1, pltpu.roll(m1, (M1 - W1) % M1, axis=1))
        return mm(m2, psel1[...])

    def maxpool_l2(x):
        m1 = jnp.maximum(x, mm(x, shm2[5]))   # (dy=0, dx=+1) neighbour
        m2 = jnp.maximum(m1, mm(m1, shm2[7]))  # (dy=+1, dx=0) neighbour
        return mm(m2, psel2[...])

    def conv_transpose2x2(x, w_ref, b_ref, p_ref):
        # x: (Cin, Mi); w_ref: (4*Cout, Cin) stacked; p_ref: (4, Mi, 4*Mi).
        cout = b_ref.shape[0]
        y = mm(w_ref[...], x)                            # one stacked matmul
        out = None
        for k in range(4):
            t = mm(y[k * cout:(k + 1) * cout, :], p_ref[k])
            out = t if out is None else out + t
        return out + b_ref[...]

    x = x_ref[0]                                         # (Cin_pad, H*W)

    taps_l2 = lambda v: taps_mat(v, shm2)
    taps_l3 = lambda v: taps_mat(v, shm3)

    # encoder
    e1 = conv3x3([x], taps_l1, e1w1, e1b1)
    e1 = conv3x3([e1], taps_l1, e1w2, e1b2)
    q1 = maxpool_l1(e1)

    e2 = conv3x3([q1], taps_l2, e2w1, e2b1)
    e2 = conv3x3([e2], taps_l2, e2w2, e2b2)
    q2 = maxpool_l2(e2)

    # bottleneck
    bn = conv3x3([q2], taps_l3, bw1, bb1)
    bn = conv3x3([bn], taps_l3, bw2, bb2)

    # time embedding MLP (Linear(1,C4) -> ReLU -> Linear(C4,C4)), fused + added
    st = step_ref[0]                                     # (1, 1)
    th = jnp.maximum(tw1[...] * st + tb1[...], 0.0)      # (C4, 1)
    te = mm(tw2[...], th) + tb2[...]                     # (C4, 1)
    bn = bn + te                                         # broadcast over lanes

    # decoder (skip connections fused into the tap stacking, no HBM concat)
    u2 = conv_transpose2x2(bn, u2w, u2b, up2p)
    d2 = conv3x3([u2, e2], taps_l2, d2w1, d2b1)
    d2 = conv3x3([d2], taps_l2, d2w2, d2b2)

    u1 = conv_transpose2x2(d2, u1w, u1b, up1p)
    d1 = conv3x3([u1, e1], taps_l1, d1w1, d1b1)
    d1 = conv3x3([d1], taps_l1, d1w2, d1b2)

    # 1x1 output conv
    o_ref[0] = mm(ow[...], d1) + ob[...]


# ----------------------------------------------------------------------------
# Wrapper: torch-layout params -> kernel layout, one pallas_call
# ----------------------------------------------------------------------------
def _conv_w_stacked(w, cin_pad=None):
    # torch (Cout, Cin, 3, 3) -> (Cout, 9*Cin), column order j = k*Cin + ci,
    # with k = kh*3 + kw (matches the in-kernel tap stacking order).
    co, ci = w.shape[0], w.shape[1]
    if cin_pad is not None and cin_pad > ci:
        w = jnp.pad(w, ((0, 0), (0, cin_pad - ci), (0, 0), (0, 0)))
        ci = cin_pad
    return jnp.transpose(w, (0, 2, 3, 1)).reshape(co, 9 * ci)


def _convt_w_stacked(w):
    # torch (Cin, Cout, 2, 2) -> (4*Cout, Cin), row order k*Cout + co, k = kh*2+kw
    ci, co = w.shape[0], w.shape[1]
    return jnp.transpose(w, (2, 3, 1, 0)).reshape(4 * co, ci)


def _colb(b):     # (C,) -> (C, 1) column bias
    return b.reshape(-1, 1)


def _bspec(shape, batched):
    if batched:
        blk = (1,) + tuple(shape[1:])
        return pl.BlockSpec(blk, lambda b: (b,) + (0,) * (len(shape) - 1))
    return pl.BlockSpec(tuple(shape), lambda b: (0,) * len(shape))


@jax.jit
def denoise_cnn_forward(params, x_nchw, step):
    p = params
    B, Cin, H, W = x_nchw.shape
    assert H % 4 == 0 and W % 4 == 0
    assert p["enc1_w1"].shape[0] % 8 == 0, "base_feats must be a multiple of 8"
    M1 = H * W
    Cin_pad = ((Cin + 7) // 8) * 8            # align sublane concatenation

    # NCHW flattens directly into the (C, H*W) kernel layout (spatial on lanes).
    x = x_nchw.reshape(B, Cin, M1).astype(jnp.float32)
    x = jnp.pad(x, ((0, 0), (0, Cin_pad - Cin), (0, 0)))
    step_in = jnp.broadcast_to(
        step.astype(jnp.float32).reshape(-1), (B,)).reshape(B, 1, 1)

    # constant layout tables (static-shape functions -> baked constants)
    masks1 = jnp.asarray(_tap_masks(H, W)).reshape(9, 1, M1)         # ~9 KiB
    shm2 = jnp.asarray(_tap_shift_matrices(H // 2, W // 2))          # tiny
    shm3 = jnp.asarray(_tap_shift_matrices(H // 4, W // 4))          # tiny
    psel1 = jnp.asarray(_pool_select(H, W))
    psel2 = jnp.asarray(_pool_select(H // 2, W // 2))
    up2p = jnp.asarray(_upsample_scatter(H // 4, W // 4))
    up1p = jnp.asarray(_upsample_scatter(H // 2, W // 2))

    C4 = p["te_w1"].shape[0]

    inputs = [
        x, step_in,
        _conv_w_stacked(p["enc1_w1"], Cin_pad), _colb(p["enc1_b1"]),
        _conv_w_stacked(p["enc1_w2"]), _colb(p["enc1_b2"]),
        _conv_w_stacked(p["enc2_w1"]), _colb(p["enc2_b1"]),
        _conv_w_stacked(p["enc2_w2"]), _colb(p["enc2_b2"]),
        _conv_w_stacked(p["bott_w1"]), _colb(p["bott_b1"]),
        _conv_w_stacked(p["bott_w2"]), _colb(p["bott_b2"]),
        p["te_w1"].reshape(C4, 1), _colb(p["te_b1"]),
        p["te_w2"], _colb(p["te_b2"]),
        _convt_w_stacked(p["up2_w"]), _colb(p["up2_b"]),
        _conv_w_stacked(p["dec2_w1"]), _colb(p["dec2_b1"]),
        _conv_w_stacked(p["dec2_w2"]), _colb(p["dec2_b2"]),
        _convt_w_stacked(p["up1_w"]), _colb(p["up1_b"]),
        _conv_w_stacked(p["dec1_w1"]), _colb(p["dec1_b1"]),
        _conv_w_stacked(p["dec1_w2"]), _colb(p["dec1_b2"]),
        p["out_w"].reshape(p["out_w"].shape[0], p["out_w"].shape[1]),
        _colb(p["out_b"]),
        masks1, shm2, shm3, psel1, psel2, up2p, up1p,
    ]
    batched = [True, True] + [False] * (len(inputs) - 2)
    in_specs = [_bspec(a.shape, bt) for a, bt in zip(inputs, batched)]

    out = pl.pallas_call(
        functools.partial(_denoise_kernel, W1=W),
        out_shape=jax.ShapeDtypeStruct((B, Cin, M1), jnp.float32),
        grid=(B,),
        in_specs=in_specs,
        out_specs=pl.BlockSpec((1, Cin, M1), lambda b: (b, 0, 0)),
        compiler_params=pltpu.CompilerParams(
            dimension_semantics=("parallel",)),   # both TCs on v7x
    )(*inputs)
    return out.reshape(B, Cin, H, W)


# ----------------------------------------------------------------------------
# Parameter init (deterministic, PyTorch-default-like uniform(+-1/sqrt(fan_in)),
# stored in PyTorch layouts)
# ----------------------------------------------------------------------------
def init_params(key, in_channels=2, base_feats=8):
    C, C2, C4 = base_feats, base_feats * 2, base_feats * 4
    keys = iter(jax.random.split(key, 64))

    def uniform(k, shape, fan_in):
        b = 1.0 / math.sqrt(fan_in)
        return jax.random.uniform(k, shape, jnp.float32, -b, b)

    def conv(cin, cout, ksz):
        fan = cin * ksz * ksz
        return (uniform(next(keys), (cout, cin, ksz, ksz), fan),
                uniform(next(keys), (cout,), fan))

    def convt(cin, cout, ksz):
        fan = cout * ksz * ksz
        return (uniform(next(keys), (cin, cout, ksz, ksz), fan),
                uniform(next(keys), (cout,), fan))

    def linear(fin, fout):
        return (uniform(next(keys), (fout, fin), fin),
                uniform(next(keys), (fout,), fin))

    p = {}
    p["enc1_w1"], p["enc1_b1"] = conv(in_channels, C, 3)
    p["enc1_w2"], p["enc1_b2"] = conv(C, C, 3)
    p["enc2_w1"], p["enc2_b1"] = conv(C, C2, 3)
    p["enc2_w2"], p["enc2_b2"] = conv(C2, C2, 3)
    p["bott_w1"], p["bott_b1"] = conv(C2, C4, 3)
    p["bott_w2"], p["bott_b2"] = conv(C4, C4, 3)
    p["te_w1"], p["te_b1"] = linear(1, C4)
    p["te_w2"], p["te_b2"] = linear(C4, C4)
    p["up2_w"], p["up2_b"] = convt(C4, C2, 2)
    p["dec2_w1"], p["dec2_b1"] = conv(2 * C2, C2, 3)
    p["dec2_w2"], p["dec2_b2"] = conv(C2, C2, 3)
    p["up1_w"], p["up1_b"] = convt(C2, C, 2)
    p["dec1_w1"], p["dec1_b1"] = conv(2 * C, C, 3)
    p["dec1_w2"], p["dec1_b2"] = conv(C, C, 3)
    p["out_w"], p["out_b"] = conv(C, in_channels, 1)
    return p


# ----------------------------------------------------------------------------
# Pure-JAX reference of DenoiseCNN.forward (for an in-script sanity check)
# ----------------------------------------------------------------------------
def reference_forward(params, x, step):
    p = params
    B = x.shape[0]
    hp = jax.lax.Precision.HIGHEST

    def conv(v, w, b, pad):
        y = jax.lax.conv_general_dilated(
            v, w, (1, 1), [(pad, pad), (pad, pad)],
            dimension_numbers=("NCHW", "OIHW", "NCHW"), precision=hp)
        return y + b[None, :, None, None]

    def relu(v):
        return jnp.maximum(v, 0.0)

    def pool(v):
        return jax.lax.reduce_window(v, -jnp.inf, jax.lax.max,
                                     (1, 1, 2, 2), (1, 1, 2, 2), "VALID")

    def convt(v, w, b):
        wt = jnp.flip(w, (2, 3)).transpose(1, 0, 2, 3)
        y = jax.lax.conv_general_dilated(
            v, wt, (1, 1), [(1, 1), (1, 1)], lhs_dilation=(2, 2),
            dimension_numbers=("NCHW", "OIHW", "NCHW"), precision=hp)
        return y + b[None, :, None, None]

    e1 = relu(conv(x, p["enc1_w1"], p["enc1_b1"], 1))
    e1 = relu(conv(e1, p["enc1_w2"], p["enc1_b2"], 1))
    q1 = pool(e1)
    e2 = relu(conv(q1, p["enc2_w1"], p["enc2_b1"], 1))
    e2 = relu(conv(e2, p["enc2_w2"], p["enc2_b2"], 1))
    q2 = pool(e2)
    bn = relu(conv(q2, p["bott_w1"], p["bott_b1"], 1))
    bn = relu(conv(bn, p["bott_w2"], p["bott_b2"], 1))
    st = jnp.reshape(step.astype(jnp.float32), (B, 1))
    th = relu(st @ p["te_w1"].T + p["te_b1"])
    te = th @ p["te_w2"].T + p["te_b2"]
    bn = bn + te[:, :, None, None]
    u2 = convt(bn, p["up2_w"], p["up2_b"])
    d2 = relu(conv(jnp.concatenate([u2, e2], 1), p["dec2_w1"], p["dec2_b1"], 1))
    d2 = relu(conv(d2, p["dec2_w2"], p["dec2_b2"], 1))
    u1 = convt(d2, p["up1_w"], p["up1_b"])
    d1 = relu(conv(jnp.concatenate([u1, e1], 1), p["dec1_w1"], p["dec1_b1"], 1))
    d1 = relu(conv(d1, p["dec1_w2"], p["dec1_b2"], 1))
    return conv(d1, p["out_w"], p["out_b"], 0)


# ----------------------------------------------------------------------------
if __name__ == "__main__":
    key = jax.random.PRNGKey(0)
    k_params, k_x, k_step = jax.random.split(key, 3)

    batch, in_channels, base_feats, spatial = 2, 2, 8, 16
    params = init_params(k_params, in_channels=in_channels, base_feats=base_feats)

    x = jax.random.normal(k_x, (batch, in_channels, spatial, spatial), jnp.float32)
    step = jax.random.uniform(k_step, (batch,), jnp.float32, 0.0, 10.0)

    out = denoise_cnn_forward(params, x, step)
    out = jax.block_until_ready(out)

    assert out.shape == (batch, in_channels, spatial, spatial), out.shape
    assert bool(jnp.all(jnp.isfinite(out)))

    # sanity check against a plain-JAX reference (loose tol to accommodate
    # TPU MXU matmul precision)
    ref = reference_forward(params, x, step)
    assert bool(jnp.allclose(out, ref, rtol=5e-2, atol=5e-2)), \
        float(jnp.max(jnp.abs(out - ref)))

    print("KERNEL_OK")
</pallas_src>

<mosaic_0001>
module attributes {stable_mosaic.version = 11 : i64} {
  func.func @_denoise_kernel(%arg0: i32, %arg1: memref<1x8x256xf32, #tpu.memory_space<vmem>>, %arg2: memref<1x1x1xf32, #tpu.memory_space<vmem>>, %arg3: memref<8x72xf32, #tpu.memory_space<vmem>>, %arg4: memref<8x1xf32, #tpu.memory_space<vmem>>, %arg5: memref<8x72xf32, #tpu.memory_space<vmem>>, %arg6: memref<8x1xf32, #tpu.memory_space<vmem>>, %arg7: memref<16x72xf32, #tpu.memory_space<vmem>>, %arg8: memref<16x1xf32, #tpu.memory_space<vmem>>, %arg9: memref<16x144xf32, #tpu.memory_space<vmem>>, %arg10: memref<16x1xf32, #tpu.memory_space<vmem>>, %arg11: memref<32x144xf32, #tpu.memory_space<vmem>>, %arg12: memref<32x1xf32, #tpu.memory_space<vmem>>, %arg13: memref<32x288xf32, #tpu.memory_space<vmem>>, %arg14: memref<32x1xf32, #tpu.memory_space<vmem>>, %arg15: memref<32x1xf32, #tpu.memory_space<vmem>>, %arg16: memref<32x1xf32, #tpu.memory_space<vmem>>, %arg17: memref<32x32xf32, #tpu.memory_space<vmem>>, %arg18: memref<32x1xf32, #tpu.memory_space<vmem>>, %arg19: memref<64x32xf32, #tpu.memory_space<vmem>>, %arg20: memref<16x1xf32, #tpu.memory_space<vmem>>, %arg21: memref<16x288xf32, #tpu.memory_space<vmem>>, %arg22: memref<16x1xf32, #tpu.memory_space<vmem>>, %arg23: memref<16x144xf32, #tpu.memory_space<vmem>>, %arg24: memref<16x1xf32, #tpu.memory_space<vmem>>, %arg25: memref<32x16xf32, #tpu.memory_space<vmem>>, %arg26: memref<8x1xf32, #tpu.memory_space<vmem>>, %arg27: memref<8x144xf32, #tpu.memory_space<vmem>>, %arg28: memref<8x1xf32, #tpu.memory_space<vmem>>, %arg29: memref<8x72xf32, #tpu.memory_space<vmem>>, %arg30: memref<8x1xf32, #tpu.memory_space<vmem>>, %arg31: memref<2x8xf32, #tpu.memory_space<vmem>>, %arg32: memref<2x1xf32, #tpu.memory_space<vmem>>, %arg33: memref<9x1x256xf32, #tpu.memory_space<vmem>>, %arg34: memref<9x64x64xf32, #tpu.memory_space<vmem>>, %arg35: memref<9x16x16xf32, #tpu.memory_space<vmem>>, %arg36: memref<256x64xf32, #tpu.memory_space<vmem>>, %arg37: memref<64x16xf32, #tpu.memory_space<vmem>>, %arg38: memref<4x16x64xf32, #tpu.memory_space<vmem>>, %arg39: memref<4x64x256xf32, #tpu.memory_space<vmem>>, %arg40: memref<1x2x256xf32, #tpu.memory_space<vmem>>) attributes {dimension_semantics = [#tpu.dimension_semantics<parallel>], iteration_bounds = array<i64: 2>, scalar_prefetch = 0 : i64, scratch_operands = 0 : i64, tpu.core_type = #tpu.core_type<tc>, window_params = [{transform_indices = @transform_0, window_bounds = array<i64: 1, 8, 256>}, {transform_indices = @transform_1, window_bounds = array<i64: 1, 1, 1>}, {pipeline_mode = #tpu.pipeline_mode<synchronous>, transform_indices = @transform_2, window_bounds = array<i64: 8, 72>}, {pipeline_mode = #tpu.pipeline_mode<synchronous>, transform_indices = @transform_3, window_bounds = array<i64: 8, 1>}, {pipeline_mode = #tpu.pipeline_mode<synchronous>, transform_indices = @transform_4, window_bounds = array<i64: 8, 72>}, {pipeline_mode = #tpu.pipeline_mode<synchronous>, transform_indices = @transform_5, window_bounds = array<i64: 8, 1>}, {pipeline_mode = #tpu.pipeline_mode<synchronous>, transform_indices = @transform_6, window_bounds = array<i64: 16, 72>}, {pipeline_mode = #tpu.pipeline_mode<synchronous>, transform_indices = @transform_7, window_bounds = array<i64: 16, 1>}, {pipeline_mode = #tpu.pipeline_mode<synchronous>, transform_indices = @transform_8, window_bounds = array<i64: 16, 144>}, {pipeline_mode = #tpu.pipeline_mode<synchronous>, transform_indices = @transform_9, window_bounds = array<i64: 16, 1>}, {pipeline_mode = #tpu.pipeline_mode<synchronous>, transform_indices = @transform_10, window_bounds = array<i64: 32, 144>}, {pipeline_mode = #tpu.pipeline_mode<synchronous>, transform_indices = @transform_11, window_bounds = array<i64: 32, 1>}, {pipeline_mode = #tpu.pipeline_mode<synchronous>, transform_indices = @transform_12, window_bounds = array<i64: 32, 288>}, {pipeline_mode = #tpu.pipeline_mode<synchronous>, transform_indices = @transform_13, window_bounds = array<i64: 32, 1>}, {pipeline_mode = #tpu.pipeline_mode<synchronous>, transform_indices = @transform_14, window_bounds = array<i64: 32, 1>}, {pipeline_mode = #tpu.pipeline_mode<synchronous>, transform_indices = @transform_15, window_bounds = array<i64: 32, 1>}, {pipeline_mode = #tpu.pipeline_mode<synchronous>, transform_indices = @transform_16, window_bounds = array<i64: 32, 32>}, {pipeline_mode = #tpu.pipeline_mode<synchronous>, transform_indices = @transform_17, window_bounds = array<i64: 32, 1>}, {pipeline_mode = #tpu.pipeline_mode<synchronous>, transform_indices = @transform_18, window_bounds = array<i64: 64, 32>}, {pipeline_mode = #tpu.pipeline_mode<synchronous>, transform_indices = @transform_19, window_bounds = array<i64: 16, 1>}, {pipeline_mode = #tpu.pipeline_mode<synchronous>, transform_indices = @transform_20, window_bounds = array<i64: 16, 288>}, {pipeline_mode = #tpu.pipeline_mode<synchronous>, transform_indices = @transform_21, window_bounds = array<i64: 16, 1>}, {pipeline_mode = #tpu.pipeline_mode<synchronous>, transform_indices = @transform_22, window_bounds = array<i64: 16, 144>}, {pipeline_mode = #tpu.pipeline_mode<synchronous>, transform_indices = @transform_23, window_bounds = array<i64: 16, 1>}, {pipeline_mode = #tpu.pipeline_mode<synchronous>, transform_indices = @transform_24, window_bounds = array<i64: 32, 16>}, {pipeline_mode = #tpu.pipeline_mode<synchronous>, transform_indices = @transform_25, window_bounds = array<i64: 8, 1>}, {pipeline_mode = #tpu.pipeline_mode<synchronous>, transform_indices = @transform_26, window_bounds = array<i64: 8, 144>}, {pipeline_mode = #tpu.pipeline_mode<synchronous>, transform_indices = @transform_27, window_bounds = array<i64: 8, 1>}, {pipeline_mode = #tpu.pipeline_mode<synchronous>, transform_indices = @transform_28, window_bounds = array<i64: 8, 72>}, {pipeline_mode = #tpu.pipeline_mode<synchronous>, transform_indices = @transform_29, window_bounds = array<i64: 8, 1>}, {pipeline_mode = #tpu.pipeline_mode<synchronous>, transform_indices = @transform_30, window_bounds = array<i64: 2, 8>}, {pipeline_mode = #tpu.pipeline_mode<synchronous>, transform_indices = @transform_31, window_bounds = array<i64: 2, 1>}, {pipeline_mode = #tpu.pipeline_mode<synchronous>, transform_indices = @transform_32, window_bounds = array<i64: 9, 1, 256>}, {pipeline_mode = #tpu.pipeline_mode<synchronous>, transform_indices = @transform_33, window_bounds = array<i64: 9, 64, 64>}, {pipeline_mode = #tpu.pipeline_mode<synchronous>, transform_indices = @transform_34, window_bounds = array<i64: 9, 16, 16>}, {pipeline_mode = #tpu.pipeline_mode<synchronous>, transform_indices = @transform_35, window_bounds = array<i64: 256, 64>}, {pipeline_mode = #tpu.pipeline_mode<synchronous>, transform_indices = @transform_36, window_bounds = array<i64: 64, 16>}, {pipeline_mode = #tpu.pipeline_mode<synchronous>, transform_indices = @transform_37, window_bounds = array<i64: 4, 16, 64>}, {pipeline_mode = #tpu.pipeline_mode<synchronous>, transform_indices = @transform_38, window_bounds = array<i64: 4, 64, 256>}, {transform_indices = @transform_39, window_bounds = array<i64: 1, 2, 256>}]} {
    %c0 = arith.constant 0 : index
    %c0_0 = arith.constant 0 : index
    %c0_1 = arith.constant 0 : index
    %0 = vector.load %arg33[%c0, %c0_0, %c0_1] : memref<9x1x256xf32, #tpu.memory_space<vmem>>, vector<1x1x256xf32>
    %1 = vector.shape_cast %0 : vector<1x1x256xf32> to vector<1x256xf32>
    %c1 = arith.constant 1 : index
    %c0_2 = arith.constant 0 : index
    %c0_3 = arith.constant 0 : index
    %2 = vector.load %arg33[%c1, %c0_2, %c0_3] : memref<9x1x256xf32, #tpu.memory_space<vmem>>, vector<1x1x256xf32>
    %3 = vector.shape_cast %2 : vector<1x1x256xf32> to vector<1x256xf32>
    %c2 = arith.constant 2 : index
    %c0_4 = arith.constant 0 : index
    %c0_5 = arith.constant 0 : index
    %4 = vector.load %arg33[%c2, %c0_4, %c0_5] : memref<9x1x256xf32, #tpu.memory_space<vmem>>, vector<1x1x256xf32>
    %5 = vector.shape_cast %4 : vector<1x1x256xf32> to vector<1x256xf32>
    %c3 = arith.constant 3 : index
    %c0_6 = arith.constant 0 : index
    %c0_7 = arith.constant 0 : index
    %6 = vector.load %arg33[%c3, %c0_6, %c0_7] : memref<9x1x256xf32, #tpu.memory_space<vmem>>, vector<1x1x256xf32>
    %7 = vector.shape_cast %6 : vector<1x1x256xf32> to vector<1x256xf32>
    %c5 = arith.constant 5 : index
    %c0_8 = arith.constant 0 : index
    %c0_9 = arith.constant 0 : index
    %8 = vector.load %arg33[%c5, %c0_8, %c0_9] : memref<9x1x256xf32, #tpu.memory_space<vmem>>, vector<1x1x256xf32>
    %9 = vector.shape_cast %8 : vector<1x1x256xf32> to vector<1x256xf32>
    %c6 = arith.constant 6 : index
    %c0_10 = arith.constant 0 : index
    %c0_11 = arith.constant 0 : index
    %10 = vector.load %arg33[%c6, %c0_10, %c0_11] : memref<9x1x256xf32, #tpu.memory_space<vmem>>, vector<1x1x256xf32>
    %11 = vector.shape_cast %10 : vector<1x1x256xf32> to vector<1x256xf32>
    %c7 = arith.constant 7 : index
    %c0_12 = arith.constant 0 : index
    %c0_13 = arith.constant 0 : index
    %12 = vector.load %arg33[%c7, %c0_12, %c0_13] : memref<9x1x256xf32, #tpu.memory_space<vmem>>, vector<1x1x256xf32>
    %13 = vector.shape_cast %12 : vector<1x1x256xf32> to vector<1x256xf32>
    %c8 = arith.constant 8 : index
    %c0_14 = arith.constant 0 : index
    %c0_15 = arith.constant 0 : index
    %14 = vector.load %arg33[%c8, %c0_14, %c0_15] : memref<9x1x256xf32, #tpu.memory_space<vmem>>, vector<1x1x256xf32>
    %15 = vector.shape_cast %14 : vector<1x1x256xf32> to vector<1x256xf32>
    %c0_16 = arith.constant 0 : index
    %c0_17 = arith.constant 0 : index
    %c0_18 = arith.constant 0 : index
    %16 = vector.load %arg1[%c0_16, %c0_17, %c0_18] : memref<1x8x256xf32, #tpu.memory_space<vmem>>, vector<1x8x256xf32>
    %17 = vector.shape_cast %16 : vector<1x8x256xf32> to vector<8x256xf32>
    %c17_i32 = arith.constant 17 : i32
    %18 = tpu.dynamic_rotate %17 by %c17_i32 dim 1 : vector<8x256xf32>, i32 -> vector<8x256xf32>
    %19 = vector.broadcast %1 : vector<1x256xf32> to vector<8x256xf32>
    %20 = arith.mulf %18, %19 : vector<8x256xf32>
    %c16_i32 = arith.constant 16 : i32
    %21 = tpu.dynamic_rotate %17 by %c16_i32 dim 1 : vector<8x256xf32>, i32 -> vector<8x256xf32>
    %22 = vector.broadcast %3 : vector<1x256xf32> to vector<8x256xf32>
    %23 = arith.mulf %21, %22 : vector<8x256xf32>
    %c15_i32 = arith.constant 15 : i32
    %24 = tpu.dynamic_rotate %17 by %c15_i32 dim 1 : vector<8x256xf32>, i32 -> vector<8x256xf32>
    %25 = vector.broadcast %5 : vector<1x256xf32> to vector<8x256xf32>
    %26 = arith.mulf %24, %25 : vector<8x256xf32>
    %c1_i32 = arith.constant 1 : i32
    %27 = tpu.dynamic_rotate %17 by %c1_i32 dim 1 : vector<8x256xf32>, i32 -> vector<8x256xf32>
    %28 = vector.broadcast %7 : vector<1x256xf32> to vector<8x256xf32>
    %29 = arith.mulf %27, %28 : vector<8x256xf32>
    %c255_i32 = arith.constant 255 : i32
    %30 = tpu.dynamic_rotate %17 by %c255_i32 dim 1 : vector<8x256xf32>, i32 -> vector<8x256xf32>
    %31 = vector.broadcast %9 : vector<1x256xf32> to vector<8x256xf32>
    %32 = arith.mulf %30, %31 : vector<8x256xf32>
    %c241_i32 = arith.constant 241 : i32
    %33 = tpu.dynamic_rotate %17 by %c241_i32 dim 1 : vector<8x256xf32>, i32 -> vector<8x256xf32>
    %34 = vector.broadcast %11 : vector<1x256xf32> to vector<8x256xf32>
    %35 = arith.mulf %33, %34 : vector<8x256xf32>
    %c240_i32 = arith.constant 240 : i32
    %36 = tpu.dynamic_rotate %17 by %c240_i32 dim 1 : vector<8x256xf32>, i32 -> vector<8x256xf32>
    %37 = vector.broadcast %13 : vector<1x256xf32> to vector<8x256xf32>
    %38 = arith.mulf %36, %37 : vector<8x256xf32>
    %c239_i32 = arith.constant 239 : i32
    %39 = tpu.dynamic_rotate %17 by %c239_i32 dim 1 : vector<8x256xf32>, i32 -> vector<8x256xf32>
    %40 = vector.broadcast %15 : vector<1x256xf32> to vector<8x256xf32>
    %41 = arith.mulf %39, %40 : vector<8x256xf32>
    %42 = tpu.concatenate %20, %23, %26, %29, %17, %32, %35, %38, %41 in 0 : vector<8x256xf32>, vector<8x256xf32>, vector<8x256xf32>, vector<8x256xf32>, vector<8x256xf32>, vector<8x256xf32>, vector<8x256xf32>, vector<8x256xf32>, vector<8x256xf32> -> vector<72x256xf32>
    %c0_19 = arith.constant 0 : index
    %c0_20 = arith.constant 0 : index
    %43 = vector.load %arg3[%c0_19, %c0_20] : memref<8x72xf32, #tpu.memory_space<vmem>>, vector<8x72xf32>
    %cst = arith.constant dense<0.000000e+00> : vector<8x256xf32>
    %44 = tpu.matmul %43, %42, %cst {dimension_numbers = #tpu.dot_dimension_numbers<[1], [0], [0], [1], [0, 0, 1, 1], [], []>} : vector<8x72xf32>, vector<72x256xf32>, vector<8x256xf32> -> vector<8x256xf32>
    %c0_21 = arith.constant 0 : index
    %c0_22 = arith.constant 0 : index
    %45 = vector.load %arg4[%c0_21, %c0_22] : memref<8x1xf32, #tpu.memory_space<vmem>>, vector<8x1xf32>
    %46 = vector.broadcast %45 : vector<8x1xf32> to vector<8x256xf32>
    %47 = arith.addf %44, %46 : vector<8x256xf32>
    %cst_23 = arith.constant 0.000000e+00 : f32
    %48 = vector.broadcast %cst_23 : f32 to vector<8x256xf32>
    %49 = arith.maximumf %47, %48 : vector<8x256xf32>
    %c17_i32_24 = arith.constant 17 : i32
    %50 = tpu.dynamic_rotate %49 by %c17_i32_24 dim 1 : vector<8x256xf32>, i32 -> vector<8x256xf32>
    %51 = vector.broadcast %1 : vector<1x256xf32> to vector<8x256xf32>
    %52 = arith.mulf %50, %51 : vector<8x256xf32>
    %c16_i32_25 = arith.constant 16 : i32
    %53 = tpu.dynamic_rotate %49 by %c16_i32_25 dim 1 : vector<8x256xf32>, i32 -> vector<8x256xf32>
    %54 = vector.broadcast %3 : vector<1x256xf32> to vector<8x256xf32>
    %55 = arith.mulf %53, %54 : vector<8x256xf32>
    %c15_i32_26 = arith.constant 15 : i32
    %56 = tpu.dynamic_rotate %49 by %c15_i32_26 dim 1 : vector<8x256xf32>, i32 -> vector<8x256xf32>
    %57 = vector.broadcast %5 : vector<1x256xf32> to vector<8x256xf32>
    %58 = arith.mulf %56, %57 : vector<8x256xf32>
    %c1_i32_27 = arith.constant 1 : i32
    %59 = tpu.dynamic_rotate %49 by %c1_i32_27 dim 1 : vector<8x256xf32>, i32 -> vector<8x256xf32>
    %60 = vector.broadcast %7 : vector<1x256xf32> to vector<8x256xf32>
    %61 = arith.mulf %59, %60 : vector<8x256xf32>
    %c255_i32_28 = arith.constant 255 : i32
    %62 = tpu.dynamic_rotate %49 by %c255_i32_28 dim 1 : vector<8x256xf32>, i32 -> vector<8x256xf32>
    %63 = vector.broadcast %9 : vector<1x256xf32> to vector<8x256xf32>
    %64 = arith.mulf %62, %63 : vector<8x256xf32>
    %c241_i32_29 = arith.constant 241 : i32
    %65 = tpu.dynamic_rotate %49 by %c241_i32_29 dim 1 : vector<8x256xf32>, i32 -> vector<8x256xf32>
    %66 = vector.broadcast %11 : vector<1x256xf32> to vector<8x256xf32>
    %67 = arith.mulf %65, %66 : vector<8x256xf32>
    %c240_i32_30 = arith.constant 240 : i32
    %68 = tpu.dynamic_rotate %49 by %c240_i32_30 dim 1 : vector<8x256xf32>, i32 -> vector<8x256xf32>
    %69 = vector.broadcast %13 : vector<1x256xf32> to vector<8x256xf32>
    %70 = arith.mulf %68, %69 : vector<8x256xf32>
    %c239_i32_31 = arith.constant 239 : i32
    %71 = tpu.dynamic_rotate %49 by %c239_i32_31 dim 1 : vector<8x256xf32>, i32 -> vector<8x256xf32>
    %72 = vector.broadcast %15 : vector<1x256xf32> to vector<8x256xf32>
    %73 = arith.mulf %71, %72 : vector<8x256xf32>
    %74 = tpu.concatenate %52, %55, %58, %61, %49, %64, %67, %70, %73 in 0 : vector<8x256xf32>, vector<8x256xf32>, vector<8x256xf32>, vector<8x256xf32>, vector<8x256xf32>, vector<8x256xf32>, vector<8x256xf32>, vector<8x256xf32>, vector<8x256xf32> -> vector<72x256xf32>
    %c0_32 = arith.constant 0 : index
    %c0_33 = arith.constant 0 : index
    %75 = vector.load %arg5[%c0_32, %c0_33] : memref<8x72xf32, #tpu.memory_space<vmem>>, vector<8x72xf32>
    %cst_34 = arith.constant dense<0.000000e+00> : vector<8x256xf32>
    %76 = tpu.matmul %75, %74, %cst_34 {dimension_numbers = #tpu.dot_dimension_numbers<[1], [0], [0], [1], [0, 0, 1, 1], [], []>} : vector<8x72xf32>, vector<72x256xf32>, vector<8x256xf32> -> vector<8x256xf32>
    %c0_35 = arith.constant 0 : index
    %c0_36 = arith.constant 0 : index
    %77 = vector.load %arg6[%c0_35, %c0_36] : memref<8x1xf32, #tpu.memory_space<vmem>>, vector<8x1xf32>
    %78 = vector.broadcast %77 : vector<8x1xf32> to vector<8x256xf32>
    %79 = arith.addf %76, %78 : vector<8x256xf32>
    %cst_37 = arith.constant 0.000000e+00 : f32
    %80 = vector.broadcast %cst_37 : f32 to vector<8x256xf32>
    %81 = arith.maximumf %79, %80 : vector<8x256xf32>
    %c255_i32_38 = arith.constant 255 : i32
    %82 = tpu.dynamic_rotate %81 by %c255_i32_38 dim 1 : vector<8x256xf32>, i32 -> vector<8x256xf32>
    %83 = arith.maximumf %81, %82 : vector<8x256xf32>
    %c240_i32_39 = arith.constant 240 : i32
    %84 = tpu.dynamic_rotate %83 by %c240_i32_39 dim 1 : vector<8x256xf32>, i32 -> vector<8x256xf32>
    %85 = arith.maximumf %83, %84 : vector<8x256xf32>
    %c0_40 = arith.constant 0 : index
    %c0_41 = arith.constant 0 : index
    %86 = vector.load %arg36[%c0_40, %c0_41] : memref<256x64xf32, #tpu.memory_space<vmem>>, vector<256x64xf32>
    %cst_42 = arith.constant dense<0.000000e+00> : vector<8x64xf32>
    %87 = tpu.matmul %85, %86, %cst_42 {dimension_numbers = #tpu.dot_dimension_numbers<[1], [0], [0], [1], [0, 0, 1, 1], [], []>} : vector<8x256xf32>, vector<256x64xf32>, vector<8x64xf32> -> vector<8x64xf32>
    %c0_43 = arith.constant 0 : index
    %c0_44 = arith.constant 0 : index
    %c0_45 = arith.constant 0 : index
    %88 = vector.load %arg34[%c0_43, %c0_44, %c0_45] : memref<9x64x64xf32, #tpu.memory_space<vmem>>, vector<1x64x64xf32>
    %89 = vector.shape_cast %88 : vector<1x64x64xf32> to vector<64x64xf32>
    %cst_46 = arith.constant dense<0.000000e+00> : vector<8x64xf32>
    %90 = tpu.matmul %87, %89, %cst_46 {dimension_numbers = #tpu.dot_dimension_numbers<[1], [0], [0], [1], [0, 0, 1, 1], [], []>} : vector<8x64xf32>, vector<64x64xf32>, vector<8x64xf32> -> vector<8x64xf32>
    %c1_47 = arith.constant 1 : index
    %c0_48 = arith.constant 0 : index
    %c0_49 = arith.constant 0 : index
    %91 = vector.load %arg34[%c1_47, %c0_48, %c0_49] : memref<9x64x64xf32, #tpu.memory_space<vmem>>, vector<1x64x64xf32>
    %92 = vector.shape_cast %91 : vector<1x64x64xf32> to vector<64x64xf32>
    %cst_50 = arith.constant dense<0.000000e+00> : vector<8x64xf32>
    %93 = tpu.matmul %87, %92, %cst_50 {dimension_numbers = #tpu.dot_dimension_numbers<[1], [0], [0], [1], [0, 0, 1, 1], [], []>} : vector<8x64xf32>, vector<64x64xf32>, vector<8x64xf32> -> vector<8x64xf32>
    %c2_51 = arith.constant 2 : index
    %c0_52 = arith.constant 0 : index
    %c0_53 = arith.constant 0 : index
    %94 = vector.load %arg34[%c2_51, %c0_52, %c0_53] : memref<9x64x64xf32, #tpu.memory_space<vmem>>, vector<1x64x64xf32>
    %95 = vector.shape_cast %94 : vector<1x64x64xf32> to vector<64x64xf32>
    %cst_54 = arith.constant dense<0.000000e+00> : vector<8x64xf32>
    %96 = tpu.matmul %87, %95, %cst_54 {dimension_numbers = #tpu.dot_dimension_numbers<[1], [0], [0], [1], [0, 0, 1, 1], [], []>} : vector<8x64xf32>, vector<64x64xf32>, vector<8x64xf32> -> vector<8x64xf32>
    %c3_55 = arith.constant 3 : index
    %c0_56 = arith.constant 0 : index
    %c0_57 = arith.constant 0 : index
    %97 = vector.load %arg34[%c3_55, %c0_56, %c0_57] : memref<9x64x64xf32, #tpu.memory_space<vmem>>, vector<1x64x64xf32>
    %98 = vector.shape_cast %97 : vector<1x64x64xf32> to vector<64x64xf32>
    %cst_58 = arith.constant dense<0.000000e+00> : vector<8x64xf32>
    %99 = tpu.matmul %87, %98, %cst_58 {dimension_numbers = #tpu.dot_dimension_numbers<[1], [0], [0], [1], [0, 0, 1, 1], [], []>} : vector<8x64xf32>, vector<64x64xf32>, vector<8x64xf32> -> vector<8x64xf32>
    %c5_59 = arith.constant 5 : index
    %c0_60 = arith.constant 0 : index
    %c0_61 = arith.constant 0 : index
    %100 = vector.load %arg34[%c5_59, %c0_60, %c0_61] : memref<9x64x64xf32, #tpu.memory_space<vmem>>, vector<1x64x64xf32>
    %101 = vector.shape_cast %100 : vector<1x64x64xf32> to vector<64x64xf32>
    %cst_62 = arith.constant dense<0.000000e+00> : vector<8x64xf32>
    %102 = tpu.matmul %87, %101, %cst_62 {dimension_numbers = #tpu.dot_dimension_numbers<[1], [0], [0], [1], [0, 0, 1, 1], [], []>} : vector<8x64xf32>, vector<64x64xf32>, vector<8x64xf32> -> vector<8x64xf32>
    %c6_63 = arith.constant 6 : index
    %c0_64 = arith.constant 0 : index
    %c0_65 = arith.constant 0 : index
    %103 = vector.load %arg34[%c6_63, %c0_64, %c0_65] : memref<9x64x64xf32, #tpu.memory_space<vmem>>, vector<1x64x64xf32>
    %104 = vector.shape_cast %103 : vector<1x64x64xf32> to vector<64x64xf32>
    %cst_66 = arith.constant dense<0.000000e+00> : vector<8x64xf32>
    %105 = tpu.matmul %87, %104, %cst_66 {dimension_numbers = #tpu.dot_dimension_numbers<[1], [0], [0], [1], [0, 0, 1, 1], [], []>} : vector<8x64xf32>, vector<64x64xf32>, vector<8x64xf32> -> vector<8x64xf32>
    %c7_67 = arith.constant 7 : index
    %c0_68 = arith.constant 0 : index
    %c0_69 = arith.constant 0 : index
    %106 = vector.load %arg34[%c7_67, %c0_68, %c0_69] : memref<9x64x64xf32, #tpu.memory_space<vmem>>, vector<1x64x64xf32>
    %107 = vector.shape_cast %106 : vector<1x64x64xf32> to vector<64x64xf32>
    %cst_70 = arith.constant dense<0.000000e+00> : vector<8x64xf32>
    %108 = tpu.matmul %87, %107, %cst_70 {dimension_numbers = #tpu.dot_dimension_numbers<[1], [0], [0], [1], [0, 0, 1, 1], [], []>} : vector<8x64xf32>, vector<64x64xf32>, vector<8x64xf32> -> vector<8x64xf32>
    %c8_71 = arith.constant 8 : index
    %c0_72 = arith.constant 0 : index
    %c0_73 = arith.constant 0 : index
    %109 = vector.load %arg34[%c8_71, %c0_72, %c0_73] : memref<9x64x64xf32, #tpu.memory_space<vmem>>, vector<1x64x64xf32>
    %110 = vector.shape_cast %109 : vector<1x64x64xf32> to vector<64x64xf32>
    %cst_74 = arith.constant dense<0.000000e+00> : vector<8x64xf32>
    %111 = tpu.matmul %87, %110, %cst_74 {dimension_numbers = #tpu.dot_dimension_numbers<[1], [0], [0], [1], [0, 0, 1, 1], [], []>} : vector<8x64xf32>, vector<64x64xf32>, vector<8x64xf32> -> vector<8x64xf32>
    %112 = tpu.concatenate %90, %93, %96, %99, %87, %102, %105, %108, %111 in 0 : vector<8x64xf32>, vector<8x64xf32>, vector<8x64xf32>, vector<8x64xf32>, vector<8x64xf32>, vector<8x64xf32>, vector<8x64xf32>, vector<8x64xf32>, vector<8x64xf32> -> vector<72x64xf32>
    %c0_75 = arith.constant 0 : index
    %c0_76 = arith.constant 0 : index
    %113 = vector.load %arg7[%c0_75, %c0_76] : memref<16x72xf32, #tpu.memory_space<vmem>>, vector<16x72xf32>
    %cst_77 = arith.constant dense<0.000000e+00> : vector<16x64xf32>
    %114 = tpu.matmul %113, %112, %cst_77 {dimension_numbers = #tpu.dot_dimension_numbers<[1], [0], [0], [1], [0, 0, 1, 1], [], []>} : vector<16x72xf32>, vector<72x64xf32>, vector<16x64xf32> -> vector<16x64xf32>
    %c0_78 = arith.constant 0 : index
    %c0_79 = arith.constant 0 : index
    %115 = vector.load %arg8[%c0_78, %c0_79] : memref<16x1xf32, #tpu.memory_space<vmem>>, vector<16x1xf32>
    %116 = vector.broadcast %115 : vector<16x1xf32> to vector<16x64xf32>
    %117 = arith.addf %114, %116 : vector<16x64xf32>
    %cst_80 = arith.constant 0.000000e+00 : f32
    %118 = vector.broadcast %cst_80 : f32 to vector<16x64xf32>
    %119 = arith.maximumf %117, %118 : vector<16x64xf32>
    %c0_81 = arith.constant 0 : index
    %c0_82 = arith.constant 0 : index
    %c0_83 = arith.constant 0 : index
    %120 = vector.load %arg34[%c0_81, %c0_82, %c0_83] : memref<9x64x64xf32, #tpu.memory_space<vmem>>, vector<1x64x64xf32>
    %121 = vector.shape_cast %120 : vector<1x64x64xf32> to vector<64x64xf32>
    %cst_84 = arith.constant dense<0.000000e+00> : vector<16x64xf32>
    %122 = tpu.matmul %119, %121, %cst_84 {dimension_numbers = #tpu.dot_dimension_numbers<[1], [0], [0], [1], [0, 0, 1, 1], [], []>} : vector<16x64xf32>, vector<64x64xf32>, vector<16x64xf32> -> vector<16x64xf32>
    %c1_85 = arith.constant 1 : index
    %c0_86 = arith.constant 0 : index
    %c0_87 = arith.constant 0 : index
    %123 = vector.load %arg34[%c1_85, %c0_86, %c0_87] : memref<9x64x64xf32, #tpu.memory_space<vmem>>, vector<1x64x64xf32>
    %124 = vector.shape_cast %123 : vector<1x64x64xf32> to vector<64x64xf32>
    %cst_88 = arith.constant dense<0.000000e+00> : vector<16x64xf32>
    %125 = tpu.matmul %119, %124, %cst_88 {dimension_numbers = #tpu.dot_dimension_numbers<[1], [0], [0], [1], [0, 0, 1, 1], [], []>} : vector<16x64xf32>, vector<64x64xf32>, vector<16x64xf32> -> vector<16x64xf32>
    %c2_89 = arith.constant 2 : index
    %c0_90 = arith.constant 0 : index
    %c0_91 = arith.constant 0 : index
    %126 = vector.load %arg34[%c2_89, %c0_90, %c0_91] : memref<9x64x64xf32, #tpu.memory_space<vmem>>, vector<1x64x64xf32>
    %127 = vector.shape_cast %126 : vector<1x64x64xf32> to vector<64x64xf32>
    %cst_92 = arith.constant dense<0.000000e+00> : vector<16x64xf32>
    %128 = tpu.matmul %119, %127, %cst_92 {dimension_numbers = #tpu.dot_dimension_numbers<[1], [0], [0], [1], [0, 0, 1, 1], [], []>} : vector<16x64xf32>, vector<64x64xf32>, vector<16x64xf32> -> vector<16x64xf32>
    %c3_93 = arith.constant 3 : index
    %c0_94 = arith.constant 0 : index
    %c0_95 = arith.constant 0 : index
    %129 = vector.load %arg34[%c3_93, %c0_94, %c0_95] : memref<9x64x64xf32, #tpu.memory_space<vmem>>, vector<1x64x64xf32>
    %130 = vector.shape_cast %129 : vector<1x64x64xf32> to vector<64x64xf32>
    %cst_96 = arith.constant dense<0.000000e+00> : vector<16x64xf32>
    %131 = tpu.matmul %119, %130, %cst_96 {dimension_numbers = #tpu.dot_dimension_numbers<[1], [0], [0], [1], [0, 0, 1, 1], [], []>} : vector<16x64xf32>, vector<64x64xf32>, vector<16x64xf32> -> vector<16x64xf32>
    %c5_97 = arith.constant 5 : index
    %c0_98 = arith.constant 0 : index
    %c0_99 = arith.constant 0 : index
    %132 = vector.load %arg34[%c5_97, %c0_98, %c0_99] : memref<9x64x64xf32, #tpu.memory_space<vmem>>, vector<1x64x64xf32>
    %133 = vector.shape_cast %132 : vector<1x64x64xf32> to vector<64x64xf32>
    %cst_100 = arith.constant dense<0.000000e+00> : vector<16x64xf32>
    %134 = tpu.matmul %119, %133, %cst_100 {dimension_numbers = #tpu.dot_dimension_numbers<[1], [0], [0], [1], [0, 0, 1, 1], [], []>} : vector<16x64xf32>, vector<64x64xf32>, vector<16x64xf32> -> vector<16x64xf32>
    %c6_101 = arith.constant 6 : index
    %c0_102 = arith.constant 0 : index
    %c0_103 = arith.constant 0 : index
    %135 = vector.load %arg34[%c6_101, %c0_102, %c0_103] : memref<9x64x64xf32, #tpu.memory_space<vmem>>, vector<1x64x64xf32>
    %136 = vector.shape_cast %135 : vector<1x64x64xf32> to vector<64x64xf32>
    %cst_104 = arith.constant dense<0.000000e+00> : vector<16x64xf32>
    %137 = tpu.matmul %119, %136, %cst_104 {dimension_numbers = #tpu.dot_dimension_numbers<[1], [0], [0], [1], [0, 0, 1, 1], [], []>} : vector<16x64xf32>, vector<64x64xf32>, vector<16x64xf32> -> vector<16x64xf32>
    %c7_105 = arith.constant 7 : index
    %c0_106 = arith.constant 0 : index
    %c0_107 = arith.constant 0 : index
    %138 = vector.load %arg34[%c7_105, %c0_106, %c0_107] : memref<9x64x64xf32, #tpu.memory_space<vmem>>, vector<1x64x64xf32>
    %139 = vector.shape_cast %138 : vector<1x64x64xf32> to vector<64x64xf32>
    %cst_108 = arith.constant dense<0.000000e+00> : vector<16x64xf32>
    %140 = tpu.matmul %119, %139, %cst_108 {dimension_numbers = #tpu.dot_dimension_numbers<[1], [0], [0], [1], [0, 0, 1, 1], [], []>} : vector<16x64xf32>, vector<64x64xf32>, vector<16x64xf32> -> vector<16x64xf32>
    %c8_109 = arith.constant 8 : index
    %c0_110 = arith.constant 0 : index
    %c0_111 = arith.constant 0 : index
    %141 = vector.load %arg34[%c8_109, %c0_110, %c0_111] : memref<9x64x64xf32, #tpu.memory_space<vmem>>, vector<1x64x64xf32>
    %142 = vector.shape_cast %141 : vector<1x64x64xf32> to vector<64x64xf32>
    %cst_112 = arith.constant dense<0.000000e+00> : vector<16x64xf32>
    %143 = tpu.matmul %119, %142, %cst_112 {dimension_numbers = #tpu.dot_dimension_numbers<[1], [0], [0], [1], [0, 0, 1, 1], [], []>} : vector<16x64xf32>, vector<64x64xf32>, vector<16x64xf32> -> vector<16x64xf32>
    %144 = tpu.concatenate %122, %125, %128, %131, %119, %134, %137, %140, %143 in 0 : vector<16x64xf32>, vector<16x64xf32>, vector<16x64xf32>, vector<16x64xf32>, vector<16x64xf32>, vector<16x64xf32>, vector<16x64xf32>, vector<16x64xf32>, vector<16x64xf32> -> vector<144x64xf32>
    %c0_113 = arith.constant 0 : index
    %c0_114 = arith.constant 0 : index
    %145 = vector.load %arg9[%c0_113, %c0_114] : memref<16x144xf32, #tpu.memory_space<vmem>>, vector<16x144xf32>
    %cst_115 = arith.constant dense<0.000000e+00> : vector<16x64xf32>
    %146 = tpu.matmul %145, %144, %cst_115 {dimension_numbers = #tpu.dot_dimension_numbers<[1], [0], [0], [1], [0, 0, 1, 1], [], []>} : vector<16x144xf32>, vector<144x64xf32>, vector<16x64xf32> -> vector<16x64xf32>
    %c0_116 = arith.constant 0 : index
    %c0_117 = arith.constant 0 : index
    %147 = vector.load %arg10[%c0_116, %c0_117] : memref<16x1xf32, #tpu.memory_space<vmem>>, vector<16x1xf32>
    %148 = vector.broadcast %147 : vector<16x1xf32> to vector<16x64xf32>
    %149 = arith.addf %146, %148 : vector<16x64xf32>
    %cst_118 = arith.constant 0.000000e+00 : f32
    %150 = vector.broadcast %cst_118 : f32 to vector<16x64xf32>
    %151 = arith.maximumf %149, %150 : vector<16x64xf32>
    %c5_119 = arith.constant 5 : index
    %c0_120 = arith.constant 0 : index
    %c0_121 = arith.constant 0 : index
    %152 = vector.load %arg34[%c5_119, %c0_120, %c0_121] : memref<9x64x64xf32, #tpu.memory_space<vmem>>, vector<1x64x64xf32>
    %153 = vector.shape_cast %152 : vector<1x64x64xf32> to vector<64x64xf32>
    %cst_122 = arith.constant dense<0.000000e+00> : vector<16x64xf32>
    %154 = tpu.matmul %151, %153, %cst_122 {dimension_numbers = #tpu.dot_dimension_numbers<[1], [0], [0], [1], [0, 0, 1, 1], [], []>} : vector<16x64xf32>, vector<64x64xf32>, vector<16x64xf32> -> vector<16x64xf32>
    %155 = arith.maximumf %151, %154 : vector<16x64xf32>
    %c7_123 = arith.constant 7 : index
    %c0_124 = arith.constant 0 : index
    %c0_125 = arith.constant 0 : index
    %156 = vector.load %arg34[%c7_123, %c0_124, %c0_125] : memref<9x64x64xf32, #tpu.memory_space<vmem>>, vector<1x64x64xf32>
    %157 = vector.shape_cast %156 : vector<1x64x64xf32> to vector<64x64xf32>
    %cst_126 = arith.constant dense<0.000000e+00> : vector<16x64xf32>
    %158 = tpu.matmul %155, %157, %cst_126 {dimension_numbers = #tpu.dot_dimension_numbers<[1], [0], [0], [1], [0, 0, 1, 1], [], []>} : vector<16x64xf32>, vector<64x64xf32>, vector<16x64xf32> -> vector<16x64xf32>
    %159 = arith.maximumf %155, %158 : vector<16x64xf32>
    %c0_127 = arith.constant 0 : index
    %c0_128 = arith.constant 0 : index
    %160 = vector.load %arg37[%c0_127, %c0_128] : memref<64x16xf32, #tpu.memory_space<vmem>>, vector<64x16xf32>
    %cst_129 = arith.constant dense<0.000000e+00> : vector<16x16xf32>
    %161 = tpu.matmul %159, %160, %cst_129 {dimension_numbers = #tpu.dot_dimension_numbers<[1], [0], [0], [1], [0, 0, 1, 1], [], []>} : vector<16x64xf32>, vector<64x16xf32>, vector<16x16xf32> -> vector<16x16xf32>
    %c0_130 = arith.constant 0 : index
    %c0_131 = arith.constant 0 : index
    %c0_132 = arith.constant 0 : index
    %162 = vector.load %arg35[%c0_130, %c0_131, %c0_132] : memref<9x16x16xf32, #tpu.memory_space<vmem>>, vector<1x16x16xf32>
    %163 = vector.shape_cast %162 : vector<1x16x16xf32> to vector<16x16xf32>
    %cst_133 = arith.constant dense<0.000000e+00> : vector<16x16xf32>
    %164 = tpu.matmul %161, %163, %cst_133 {dimension_numbers = #tpu.dot_dimension_numbers<[1], [0], [0], [1], [0, 0, 1, 1], [], []>} : vector<16x16xf32>, vector<16x16xf32>, vector<16x16xf32> -> vector<16x16xf32>
    %c1_134 = arith.constant 1 : index
    %c0_135 = arith.constant 0 : index
    %c0_136 = arith.constant 0 : index
    %165 = vector.load %arg35[%c1_134, %c0_135, %c0_136] : memref<9x16x16xf32, #tpu.memory_space<vmem>>, vector<1x16x16xf32>
    %166 = vector.shape_cast %165 : vector<1x16x16xf32> to vector<16x16xf32>
    %cst_137 = arith.constant dense<0.000000e+00> : vector<16x16xf32>
    %167 = tpu.matmul %161, %166, %cst_137 {dimension_numbers = #tpu.dot_dimension_numbers<[1], [0], [0], [1], [0, 0, 1, 1], [], []>} : vector<16x16xf32>, vector<16x16xf32>, vector<16x16xf32> -> vector<16x16xf32>
    %c2_138 = arith.constant 2 : index
    %c0_139 = arith.constant 0 : index
    %c0_140 = arith.constant 0 : index
    %168 = vector.load %arg35[%c2_138, %c0_139, %c0_140] : memref<9x16x16xf32, #tpu.memory_space<vmem>>, vector<1x16x16xf32>
    %169 = vector.shape_cast %168 : vector<1x16x16xf32> to vector<16x16xf32>
    %cst_141 = arith.constant dense<0.000000e+00> : vector<16x16xf32>
    %170 = tpu.matmul %161, %169, %cst_141 {dimension_numbers = #tpu.dot_dimension_numbers<[1], [0], [0], [1], [0, 0, 1, 1], [], []>} : vector<16x16xf32>, vector<16x16xf32>, vector<16x16xf32> -> vector<16x16xf32>
    %c3_142 = arith.constant 3 : index
    %c0_143 = arith.constant 0 : index
    %c0_144 = arith.constant 0 : index
    %171 = vector.load %arg35[%c3_142, %c0_143, %c0_144] : memref<9x16x16xf32, #tpu.memory_space<vmem>>, vector<1x16x16xf32>
    %172 = vector.shape_cast %171 : vector<1x16x16xf32> to vector<16x16xf32>
    %cst_145 = arith.constant dense<0.000000e+00> : vector<16x16xf32>
    %173 = tpu.matmul %161, %172, %cst_145 {dimension_numbers = #tpu.dot_dimension_numbers<[1], [0], [0], [1], [0, 0, 1, 1], [], []>} : vector<16x16xf32>, vector<16x16xf32>, vector<16x16xf32> -> vector<16x16xf32>
    %c5_146 = arith.constant 5 : index
    %c0_147 = arith.constant 0 : index
    %c0_148 = arith.constant 0 : index
    %174 = vector.load %arg35[%c5_146, %c0_147, %c0_148] : memref<9x16x16xf32, #tpu.memory_space<vmem>>, vector<1x16x16xf32>
    %175 = vector.shape_cast %174 : vector<1x16x16xf32> to vector<16x16xf32>
    %cst_149 = arith.constant dense<0.000000e+00> : vector<16x16xf32>
    %176 = tpu.matmul %161, %175, %cst_149 {dimension_numbers = #tpu.dot_dimension_numbers<[1], [0], [0], [1], [0, 0, 1, 1], [], []>} : vector<16x16xf32>, vector<16x16xf32>, vector<16x16xf32> -> vector<16x16xf32>
    %c6_150 = arith.constant 6 : index
    %c0_151 = arith.constant 0 : index
    %c0_152 = arith.constant 0 : index
    %177 = vector.load %arg35[%c6_150, %c0_151, %c0_152] : memref<9x16x16xf32, #tpu.memory_space<vmem>>, vector<1x16x16xf32>
    %178 = vector.shape_cast %177 : vector<1x16x16xf32> to vector<16x16xf32>
    %cst_153 = arith.constant dense<0.000000e+00> : vector<16x16xf32>
    %179 = tpu.matmul %161, %178, %cst_153 {dimension_numbers = #tpu.dot_dimension_numbers<[1], [0], [0], [1], [0, 0, 1, 1], [], []>} : vector<16x16xf32>, vector<16x16xf32>, vector<16x16xf32> -> vector<16x16xf32>
    %c7_154 = arith.constant 7 : index
    %c0_155 = arith.constant 0 : index
    %c0_156 = arith.constant 0 : index
    %180 = vector.load %arg35[%c7_154, %c0_155, %c0_156] : memref<9x16x16xf32, #tpu.memory_space<vmem>>, vector<1x16x16xf32>
    %181 = vector.shape_cast %180 : vector<1x16x16xf32> to vector<16x16xf32>
    %cst_157 = arith.constant dense<0.000000e+00> : vector<16x16xf32>
    %182 = tpu.matmul %161, %181, %cst_157 {dimension_numbers = #tpu.dot_dimension_numbers<[1], [0], [0], [1], [0, 0, 1, 1], [], []>} : vector<16x16xf32>, vector<16x16xf32>, vector<16x16xf32> -> vector<16x16xf32>
    %c8_158 = arith.constant 8 : index
    %c0_159 = arith.constant 0 : index
    %c0_160 = arith.constant 0 : index
    %183 = vector.load %arg35[%c8_158, %c0_159, %c0_160] : memref<9x16x16xf32, #tpu.memory_space<vmem>>, vector<1x16x16xf32>
    %184 = vector.shape_cast %183 : vector<1x16x16xf32> to vector<16x16xf32>
    %cst_161 = arith.constant dense<0.000000e+00> : vector<16x16xf32>
    %185 = tpu.matmul %161, %184, %cst_161 {dimension_numbers = #tpu.dot_dimension_numbers<[1], [0], [0], [1], [0, 0, 1, 1], [], []>} : vector<16x16xf32>, vector<16x16xf32>, vector<16x16xf32> -> vector<16x16xf32>
    %186 = tpu.concatenate %164, %167, %170, %173, %161, %176, %179, %182, %185 in 0 : vector<16x16xf32>, vector<16x16xf32>, vector<16x16xf32>, vector<16x16xf32>, vector<16x16xf32>, vector<16x16xf32>, vector<16x16xf32>, vector<16x16xf32>, vector<16x16xf32> -> vector<144x16xf32>
    %c0_162 = arith.constant 0 : index
    %c0_163 = arith.constant 0 : index
    %187 = vector.load %arg11[%c0_162, %c0_163] : memref<32x144xf32, #tpu.memory_space<vmem>>, vector<32x144xf32>
    %cst_164 = arith.constant dense<0.000000e+00> : vector<32x16xf32>
    %188 = tpu.matmul %187, %186, %cst_164 {dimension_numbers = #tpu.dot_dimension_numbers<[1], [0], [0], [1], [0, 0, 1, 1], [], []>} : vector<32x144xf32>, vector<144x16xf32>, vector<32x16xf32> -> vector<32x16xf32>
    %c0_165 = arith.constant 0 : index
    %c0_166 = arith.constant 0 : index
    %189 = vector.load %arg12[%c0_165, %c0_166] : memref<32x1xf32, #tpu.memory_space<vmem>>, vector<32x1xf32>
    %190 = vector.broadcast %189 : vector<32x1xf32> to vector<32x16xf32>
    %191 = arith.addf %188, %190 : vector<32x16xf32>
    %cst_167 = arith.constant 0.000000e+00 : f32
    %192 = vector.broadcast %cst_167 : f32 to vector<32x16xf32>
    %193 = arith.maximumf %191, %192 : vector<32x16xf32>
    %c0_168 = arith.constant 0 : index
    %c0_169 = arith.constant 0 : index
    %c0_170 = arith.constant 0 : index
    %194 = vector.load %arg35[%c0_168, %c0_169, %c0_170] : memref<9x16x16xf32, #tpu.memory_space<vmem>>, vector<1x16x16xf32>
    %195 = vector.shape_cast %194 : vector<1x16x16xf32> to vector<16x16xf32>
    %cst_171 = arith.constant dense<0.000000e+00> : vector<32x16xf32>
    %196 = tpu.matmul %193, %195, %cst_171 {dimension_numbers = #tpu.dot_dimension_numbers<[1], [0], [0], [1], [0, 0, 1, 1], [], []>} : vector<32x16xf32>, vector<16x16xf32>, vector<32x16xf32> -> vector<32x16xf32>
    %c1_172 = arith.constant 1 : index
    %c0_173 = arith.constant 0 : index
    %c0_174 = arith.constant 0 : index
    %197 = vector.load %arg35[%c1_172, %c0_173, %c0_174] : memref<9x16x16xf32, #tpu.memory_space<vmem>>, vector<1x16x16xf32>
    %198 = vector.shape_cast %197 : vector<1x16x16xf32> to vector<16x16xf32>
    %cst_175 = arith.constant dense<0.000000e+00> : vector<32x16xf32>
    %199 = tpu.matmul %193, %198, %cst_175 {dimension_numbers = #tpu.dot_dimension_numbers<[1], [0], [0], [1], [0, 0, 1, 1], [], []>} : vector<32x16xf32>, vector<16x16xf32>, vector<32x16xf32> -> vector<32x16xf32>
    %c2_176 = arith.constant 2 : index
    %c0_177 = arith.constant 0 : index
    %c0_178 = arith.constant 0 : index
    %200 = vector.load %arg35[%c2_176, %c0_177, %c0_178] : memref<9x16x16xf32, #tpu.memory_space<vmem>>, vector<1x16x16xf32>
    %201 = vector.shape_cast %200 : vector<1x16x16xf32> to vector<16x16xf32>
    %cst_179 = arith.constant dense<0.000000e+00> : vector<32x16xf32>
    %202 = tpu.matmul %193, %201, %cst_179 {dimension_numbers = #tpu.dot_dimension_numbers<[1], [0], [0], [1], [0, 0, 1, 1], [], []>} : vector<32x16xf32>, vector<16x16xf32>, vector<32x16xf32> -> vector<32x16xf32>
    %c3_180 = arith.constant 3 : index
    %c0_181 = arith.constant 0 : index
    %c0_182 = arith.constant 0 : index
    %203 = vector.load %arg35[%c3_180, %c0_181, %c0_182] : memref<9x16x16xf32, #tpu.memory_space<vmem>>, vector<1x16x16xf32>
    %204 = vector.shape_cast %203 : vector<1x16x16xf32> to vector<16x16xf32>
    %cst_183 = arith.constant dense<0.000000e+00> : vector<32x16xf32>
    %205 = tpu.matmul %193, %204, %cst_183 {dimension_numbers = #tpu.dot_dimension_numbers<[1], [0], [0], [1], [0, 0, 1, 1], [], []>} : vector<32x16xf32>, vector<16x16xf32>, vector<32x16xf32> -> vector<32x16xf32>
    %c5_184 = arith.constant 5 : index
    %c0_185 = arith.constant 0 : index
    %c0_186 = arith.constant 0 : index
    %206 = vector.load %arg35[%c5_184, %c0_185, %c0_186] : memref<9x16x16xf32, #tpu.memory_space<vmem>>, vector<1x16x16xf32>
    %207 = vector.shape_cast %206 : vector<1x16x16xf32> to vector<16x16xf32>
    %cst_187 = arith.constant dense<0.000000e+00> : vector<32x16xf32>
    %208 = tpu.matmul %193, %207, %cst_187 {dimension_numbers = #tpu.dot_dimension_numbers<[1], [0], [0], [1], [0, 0, 1, 1], [], []>} : vector<32x16xf32>, vector<16x16xf32>, vector<32x16xf32> -> vector<32x16xf32>
    %c6_188 = arith.constant 6 : index
    %c0_189 = arith.constant 0 : index
    %c0_190 = arith.constant 0 : index
    %209 = vector.load %arg35[%c6_188, %c0_189, %c0_190] : memref<9x16x16xf32, #tpu.memory_space<vmem>>, vector<1x16x16xf32>
    %210 = vector.shape_cast %209 : vector<1x16x16xf32> to vector<16x16xf32>
    %cst_191 = arith.constant dense<0.000000e+00> : vector<32x16xf32>
    %211 = tpu.matmul %193, %210, %cst_191 {dimension_numbers = #tpu.dot_dimension_numbers<[1], [0], [0], [1], [0, 0, 1, 1], [], []>} : vector<32x16xf32>, vector<16x16xf32>, vector<32x16xf32> -> vector<32x16xf32>
    %c7_192 = arith.constant 7 : index
    %c0_193 = arith.constant 0 : index
    %c0_194 = arith.constant 0 : index
    %212 = vector.load %arg35[%c7_192, %c0_193, %c0_194] : memref<9x16x16xf32, #tpu.memory_space<vmem>>, vector<1x16x16xf32>
    %213 = vector.shape_cast %212 : vector<1x16x16xf32> to vector<16x16xf32>
    %cst_195 = arith.constant dense<0.000000e+00> : vector<32x16xf32>
    %214 = tpu.matmul %193, %213, %cst_195 {dimension_numbers = #tpu.dot_dimension_numbers<[1], [0], [0], [1], [0, 0, 1, 1], [], []>} : vector<32x16xf32>, vector<16x16xf32>, vector<32x16xf32> -> vector<32x16xf32>
    %c8_196 = arith.constant 8 : index
    %c0_197 = arith.constant 0 : index
    %c0_198 = arith.constant 0 : index
    %215 = vector.load %arg35[%c8_196, %c0_197, %c0_198] : memref<9x16x16xf32, #tpu.memory_space<vmem>>, vector<1x16x16xf32>
    %216 = vector.shape_cast %215 : vector<1x16x16xf32> to vector<16x16xf32>
    %cst_199 = arith.constant dense<0.000000e+00> : vector<32x16xf32>
    %217 = tpu.matmul %193, %216, %cst_199 {dimension_numbers = #tpu.dot_dimension_numbers<[1], [0], [0], [1], [0, 0, 1, 1], [], []>} : vector<32x16xf32>, vector<16x16xf32>, vector<32x16xf32> -> vector<32x16xf32>
    %218 = tpu.concatenate %196, %199, %202, %205, %193, %208, %211, %214, %217 in 0 : vector<32x16xf32>, vector<32x16xf32>, vector<32x16xf32>, vector<32x16xf32>, vector<32x16xf32>, vector<32x16xf32>, vector<32x16xf32>, vector<32x16xf32>, vector<32x16xf32> -> vector<288x16xf32>
    %c0_200 = arith.constant 0 : index
    %c0_201 = arith.constant 0 : index
    %219 = vector.load %arg13[%c0_200, %c0_201] : memref<32x288xf32, #tpu.memory_space<vmem>>, vector<32x288xf32>
    %cst_202 = arith.constant dense<0.000000e+00> : vector<32x16xf32>
    %220 = tpu.matmul %219, %218, %cst_202 {dimension_numbers = #tpu.dot_dimension_numbers<[1], [0], [0], [1], [0, 0, 1, 1], [], []>} : vector<32x288xf32>, vector<288x16xf32>, vector<32x16xf32> -> vector<32x16xf32>
    %c0_203 = arith.constant 0 : index
    %c0_204 = arith.constant 0 : index
    %221 = vector.load %arg14[%c0_203, %c0_204] : memref<32x1xf32, #tpu.memory_space<vmem>>, vector<32x1xf32>
    %222 = vector.broadcast %221 : vector<32x1xf32> to vector<32x16xf32>
    %223 = arith.addf %220, %222 : vector<32x16xf32>
    %cst_205 = arith.constant 0.000000e+00 : f32
    %224 = vector.broadcast %cst_205 : f32 to vector<32x16xf32>
    %225 = arith.maximumf %223, %224 : vector<32x16xf32>
    %c0_206 = arith.constant 0 : index
    %c0_207 = arith.constant 0 : index
    %c0_208 = arith.constant 0 : index
    %226 = vector.load %arg2[%c0_206, %c0_207, %c0_208] : memref<1x1x1xf32, #tpu.memory_space<vmem>>, vector<1x1x1xf32>
    %227 = vector.shape_cast %226 : vector<1x1x1xf32> to vector<1x1xf32>
    %c0_209 = arith.constant 0 : index
    %c0_210 = arith.constant 0 : index
    %228 = vector.load %arg15[%c0_209, %c0_210] : memref<32x1xf32, #tpu.memory_space<vmem>>, vector<32x1xf32>
    %229 = vector.broadcast %227 : vector<1x1xf32> to vector<32x1xf32>
    %230 = arith.mulf %228, %229 : vector<32x1xf32>
    %c0_211 = arith.constant 0 : index
    %c0_212 = arith.constant 0 : index
    %231 = vector.load %arg16[%c0_211, %c0_212] : memref<32x1xf32, #tpu.memory_space<vmem>>, vector<32x1xf32>
    %232 = arith.addf %230, %231 : vector<32x1xf32>
    %cst_213 = arith.constant 0.000000e+00 : f32
    %233 = vector.broadcast %cst_213 : f32 to vector<32x1xf32>
    %234 = arith.maximumf %232, %233 : vector<32x1xf32>
    %c0_214 = arith.constant 0 : index
    %c0_215 = arith.constant 0 : index
    %235 = vector.load %arg17[%c0_214, %c0_215] : memref<32x32xf32, #tpu.memory_space<vmem>>, vector<32x32xf32>
    %cst_216 = arith.constant dense<0.000000e+00> : vector<32x1xf32>
    %236 = tpu.matmul %235, %234, %cst_216 {dimension_numbers = #tpu.dot_dimension_numbers<[1], [0], [0], [1], [0, 0, 1, 1], [], []>} : vector<32x32xf32>, vector<32x1xf32>, vector<32x1xf32> -> vector<32x1xf32>
    %c0_217 = arith.constant 0 : index
    %c0_218 = arith.constant 0 : index
    %237 = vector.load %arg18[%c0_217, %c0_218] : memref<32x1xf32, #tpu.memory_space<vmem>>, vector<32x1xf32>
    %238 = arith.addf %236, %237 : vector<32x1xf32>
    %239 = vector.broadcast %238 : vector<32x1xf32> to vector<32x16xf32>
    %240 = arith.addf %225, %239 : vector<32x16xf32>
    %c0_219 = arith.constant 0 : index
    %c0_220 = arith.constant 0 : index
    %241 = vector.load %arg19[%c0_219, %c0_220] : memref<64x32xf32, #tpu.memory_space<vmem>>, vector<64x32xf32>
    %cst_221 = arith.constant dense<0.000000e+00> : vector<64x16xf32>
    %242 = tpu.matmul %241, %240, %cst_221 {dimension_numbers = #tpu.dot_dimension_numbers<[1], [0], [0], [1], [0, 0, 1, 1], [], []>} : vector<64x32xf32>, vector<32x16xf32>, vector<64x16xf32> -> vector<64x16xf32>
    %243 = vector.extract_strided_slice %242 {offsets = [0, 0], sizes = [16, 16], strides = [1, 1]} : vector<64x16xf32> to vector<16x16xf32>
    %c0_222 = arith.constant 0 : index
    %c0_223 = arith.constant 0 : index
    %c0_224 = arith.constant 0 : index
    %244 = vector.load %arg38[%c0_222, %c0_223, %c0_224] : memref<4x16x64xf32, #tpu.memory_space<vmem>>, vector<1x16x64xf32>
    %245 = vector.shape_cast %244 : vector<1x16x64xf32> to vector<16x64xf32>
    %cst_225 = arith.constant dense<0.000000e+00> : vector<16x64xf32>
    %246 = tpu.matmul %243, %245, %cst_225 {dimension_numbers = #tpu.dot_dimension_numbers<[1], [0], [0], [1], [0, 0, 1, 1], [], []>} : vector<16x16xf32>, vector<16x64xf32>, vector<16x64xf32> -> vector<16x64xf32>
    %247 = vector.extract_strided_slice %242 {offsets = [16, 0], sizes = [16, 16], strides = [1, 1]} : vector<64x16xf32> to vector<16x16xf32>
    %c1_226 = arith.constant 1 : index
    %c0_227 = arith.constant 0 : index
    %c0_228 = arith.constant 0 : index
    %248 = vector.load %arg38[%c1_226, %c0_227, %c0_228] : memref<4x16x64xf32, #tpu.memory_space<vmem>>, vector<1x16x64xf32>
    %249 = vector.shape_cast %248 : vector<1x16x64xf32> to vector<16x64xf32>
    %cst_229 = arith.constant dense<0.000000e+00> : vector<16x64xf32>
    %250 = tpu.matmul %247, %249, %cst_229 {dimension_numbers = #tpu.dot_dimension_numbers<[1], [0], [0], [1], [0, 0, 1, 1], [], []>} : vector<16x16xf32>, vector<16x64xf32>, vector<16x64xf32> -> vector<16x64xf32>
    %251 = arith.addf %246, %250 : vector<16x64xf32>
    %252 = vector.extract_strided_slice %242 {offsets = [32, 0], sizes = [16, 16], strides = [1, 1]} : vector<64x16xf32> to vector<16x16xf32>
    %c2_230 = arith.constant 2 : index
    %c0_231 = arith.constant 0 : index
    %c0_232 = arith.constant 0 : index
    %253 = vector.load %arg38[%c2_230, %c0_231, %c0_232] : memref<4x16x64xf32, #tpu.memory_space<vmem>>, vector<1x16x64xf32>
    %254 = vector.shape_cast %253 : vector<1x16x64xf32> to vector<16x64xf32>
    %cst_233 = arith.constant dense<0.000000e+00> : vector<16x64xf32>
    %255 = tpu.matmul %252, %254, %cst_233 {dimension_numbers = #tpu.dot_dimension_numbers<[1], [0], [0], [1], [0, 0, 1, 1], [], []>} : vector<16x16xf32>, vector<16x64xf32>, vector<16x64xf32> -> vector<16x64xf32>
    %256 = arith.addf %251, %255 : vector<16x64xf32>
    %257 = vector.extract_strided_slice %242 {offsets = [48, 0], sizes = [16, 16], strides = [1, 1]} : vector<64x16xf32> to vector<16x16xf32>
    %c3_234 = arith.constant 3 : index
    %c0_235 = arith.constant 0 : index
    %c0_236 = arith.constant 0 : index
    %258 = vector.load %arg38[%c3_234, %c0_235, %c0_236] : memref<4x16x64xf32, #tpu.memory_space<vmem>>, vector<1x16x64xf32>
    %259 = vector.shape_cast %258 : vector<1x16x64xf32> to vector<16x64xf32>
    %cst_237 = arith.constant dense<0.000000e+00> : vector<16x64xf32>
    %260 = tpu.matmul %257, %259, %cst_237 {dimension_numbers = #tpu.dot_dimension_numbers<[1], [0], [0], [1], [0, 0, 1, 1], [], []>} : vector<16x16xf32>, vector<16x64xf32>, vector<16x64xf32> -> vector<16x64xf32>
    %261 = arith.addf %256, %260 : vector<16x64xf32>
    %c0_238 = arith.constant 0 : index
    %c0_239 = arith.constant 0 : index
    %262 = vector.load %arg20[%c0_238, %c0_239] : memref<16x1xf32, #tpu.memory_space<vmem>>, vector<16x1xf32>
    %263 = vector.broadcast %262 : vector<16x1xf32> to vector<16x64xf32>
    %264 = arith.addf %261, %263 : vector<16x64xf32>
    %c0_240 = arith.constant 0 : index
    %c0_241 = arith.constant 0 : index
    %c0_242 = arith.constant 0 : index
    %265 = vector.load %arg34[%c0_240, %c0_241, %c0_242] : memref<9x64x64xf32, #tpu.memory_space<vmem>>, vector<1x64x64xf32>
    %266 = vector.shape_cast %265 : vector<1x64x64xf32> to vector<64x64xf32>
    %cst_243 = arith.constant dense<0.000000e+00> : vector<16x64xf32>
    %267 = tpu.matmul %264, %266, %cst_243 {dimension_numbers = #tpu.dot_dimension_numbers<[1], [0], [0], [1], [0, 0, 1, 1], [], []>} : vector<16x64xf32>, vector<64x64xf32>, vector<16x64xf32> -> vector<16x64xf32>
    %c1_244 = arith.constant 1 : index
    %c0_245 = arith.constant 0 : index
    %c0_246 = arith.constant 0 : index
    %268 = vector.load %arg34[%c1_244, %c0_245, %c0_246] : memref<9x64x64xf32, #tpu.memory_space<vmem>>, vector<1x64x64xf32>
    %269 = vector.shape_cast %268 : vector<1x64x64xf32> to vector<64x64xf32>
    %cst_247 = arith.constant dense<0.000000e+00> : vector<16x64xf32>
    %270 = tpu.matmul %264, %269, %cst_247 {dimension_numbers = #tpu.dot_dimension_numbers<[1], [0], [0], [1], [0, 0, 1, 1], [], []>} : vector<16x64xf32>, vector<64x64xf32>, vector<16x64xf32> -> vector<16x64xf32>
    %c2_248 = arith.constant 2 : index
    %c0_249 = arith.constant 0 : index
    %c0_250 = arith.constant 0 : index
    %271 = vector.load %arg34[%c2_248, %c0_249, %c0_250] : memref<9x64x64xf32, #tpu.memory_space<vmem>>, vector<1x64x64xf32>
    %272 = vector.shape_cast %271 : vector<1x64x64xf32> to vector<64x64xf32>
    %cst_251 = arith.constant dense<0.000000e+00> : vector<16x64xf32>
    %273 = tpu.matmul %264, %272, %cst_251 {dimension_numbers = #tpu.dot_dimension_numbers<[1], [0], [0], [1], [0, 0, 1, 1], [], []>} : vector<16x64xf32>, vector<64x64xf32>, vector<16x64xf32> -> vector<16x64xf32>
    %c3_252 = arith.constant 3 : index
    %c0_253 = arith.constant 0 : index
    %c0_254 = arith.constant 0 : index
    %274 = vector.load %arg34[%c3_252, %c0_253, %c0_254] : memref<9x64x64xf32, #tpu.memory_space<vmem>>, vector<1x64x64xf32>
    %275 = vector.shape_cast %274 : vector<1x64x64xf32> to vector<64x64xf32>
    %cst_255 = arith.constant dense<0.000000e+00> : vector<16x64xf32>
    %276 = tpu.matmul %264, %275, %cst_255 {dimension_numbers = #tpu.dot_dimension_numbers<[1], [0], [0], [1], [0, 0, 1, 1], [], []>} : vector<16x64xf32>, vector<64x64xf32>, vector<16x64xf32> -> vector<16x64xf32>
    %c5_256 = arith.constant 5 : index
    %c0_257 = arith.constant 0 : index
    %c0_258 = arith.constant 0 : index
    %277 = vector.load %arg34[%c5_256, %c0_257, %c0_258] : memref<9x64x64xf32, #tpu.memory_space<vmem>>, vector<1x64x64xf32>
    %278 = vector.shape_cast %277 : vector<1x64x64xf32> to vector<64x64xf32>
    %cst_259 = arith.constant dense<0.000000e+00> : vector<16x64xf32>
    %279 = tpu.matmul %264, %278, %cst_259 {dimension_numbers = #tpu.dot_dimension_numbers<[1], [0], [0], [1], [0, 0, 1, 1], [], []>} : vector<16x64xf32>, vector<64x64xf32>, vector<16x64xf32> -> vector<16x64xf32>
    %c6_260 = arith.constant 6 : index
    %c0_261 = arith.constant 0 : index
    %c0_262 = arith.constant 0 : index
    %280 = vector.load %arg34[%c6_260, %c0_261, %c0_262] : memref<9x64x64xf32, #tpu.memory_space<vmem>>, vector<1x64x64xf32>
    %281 = vector.shape_cast %280 : vector<1x64x64xf32> to vector<64x64xf32>
    %cst_263 = arith.constant dense<0.000000e+00> : vector<16x64xf32>
    %282 = tpu.matmul %264, %281, %cst_263 {dimension_numbers = #tpu.dot_dimension_numbers<[1], [0], [0], [1], [0, 0, 1, 1], [], []>} : vector<16x64xf32>, vector<64x64xf32>, vector<16x64xf32> -> vector<16x64xf32>
    %c7_264 = arith.constant 7 : index
    %c0_265 = arith.constant 0 : index
    %c0_266 = arith.constant 0 : index
    %283 = vector.load %arg34[%c7_264, %c0_265, %c0_266] : memref<9x64x64xf32, #tpu.memory_space<vmem>>, vector<1x64x64xf32>
    %284 = vector.shape_cast %283 : vector<1x64x64xf32> to vector<64x64xf32>
    %cst_267 = arith.constant dense<0.000000e+00> : vector<16x64xf32>
    %285 = tpu.matmul %264, %284, %cst_267 {dimension_numbers = #tpu.dot_dimension_numbers<[1], [0], [0], [1], [0, 0, 1, 1], [], []>} : vector<16x64xf32>, vector<64x64xf32>, vector<16x64xf32> -> vector<16x64xf32>
    %c8_268 = arith.constant 8 : index
    %c0_269 = arith.constant 0 : index
    %c0_270 = arith.constant 0 : index
    %286 = vector.load %arg34[%c8_268, %c0_269, %c0_270] : memref<9x64x64xf32, #tpu.memory_space<vmem>>, vector<1x64x64xf32>
    %287 = vector.shape_cast %286 : vector<1x64x64xf32> to vector<64x64xf32>
    %cst_271 = arith.constant dense<0.000000e+00> : vector<16x64xf32>
    %288 = tpu.matmul %264, %287, %cst_271 {dimension_numbers = #tpu.dot_dimension_numbers<[1], [0], [0], [1], [0, 0, 1, 1], [], []>} : vector<16x64xf32>, vector<64x64xf32>, vector<16x64xf32> -> vector<16x64xf32>
    %c0_272 = arith.constant 0 : index
    %c0_273 = arith.constant 0 : index
    %c0_274 = arith.constant 0 : index
    %289 = vector.load %arg34[%c0_272, %c0_273, %c0_274] : memref<9x64x64xf32, #tpu.memory_space<vmem>>, vector<1x64x64xf32>
    %290 = vector.shape_cast %289 : vector<1x64x64xf32> to vector<64x64xf32>
    %cst_275 = arith.constant dense<0.000000e+00> : vector<16x64xf32>
    %291 = tpu.matmul %151, %290, %cst_275 {dimension_numbers = #tpu.dot_dimension_numbers<[1], [0], [0], [1], [0, 0, 1, 1], [], []>} : vector<16x64xf32>, vector<64x64xf32>, vector<16x64xf32> -> vector<16x64xf32>
    %c1_276 = arith.constant 1 : index
    %c0_277 = arith.constant 0 : index
    %c0_278 = arith.constant 0 : index
    %292 = vector.load %arg34[%c1_276, %c0_277, %c0_278] : memref<9x64x64xf32, #tpu.memory_space<vmem>>, vector<1x64x64xf32>
    %293 = vector.shape_cast %292 : vector<1x64x64xf32> to vector<64x64xf32>
    %cst_279 = arith.constant dense<0.000000e+00> : vector<16x64xf32>
    %294 = tpu.matmul %151, %293, %cst_279 {dimension_numbers = #tpu.dot_dimension_numbers<[1], [0], [0], [1], [0, 0, 1, 1], [], []>} : vector<16x64xf32>, vector<64x64xf32>, vector<16x64xf32> -> vector<16x64xf32>
    %c2_280 = arith.constant 2 : index
    %c0_281 = arith.constant 0 : index
    %c0_282 = arith.constant 0 : index
    %295 = vector.load %arg34[%c2_280, %c0_281, %c0_282] : memref<9x64x64xf32, #tpu.memory_space<vmem>>, vector<1x64x64xf32>
    %296 = vector.shape_cast %295 : vector<1x64x64xf32> to vector<64x64xf32>
    %cst_283 = arith.constant dense<0.000000e+00> : vector<16x64xf32>
    %297 = tpu.matmul %151, %296, %cst_283 {dimension_numbers = #tpu.dot_dimension_numbers<[1], [0], [0], [1], [0, 0, 1, 1], [], []>} : vector<16x64xf32>, vector<64x64xf32>, vector<16x64xf32> -> vector<16x64xf32>
    %c3_284 = arith.constant 3 : index
    %c0_285 = arith.constant 0 : index
    %c0_286 = arith.constant 0 : index
    %298 = vector.load %arg34[%c3_284, %c0_285, %c0_286] : memref<9x64x64xf32, #tpu.memory_space<vmem>>, vector<1x64x64xf32>
    %299 = vector.shape_cast %298 : vector<1x64x64xf32> to vector<64x64xf32>
    %cst_287 = arith.constant dense<0.000000e+00> : vector<16x64xf32>
    %300 = tpu.matmul %151, %299, %cst_287 {dimension_numbers = #tpu.dot_dimension_numbers<[1], [0], [0], [1], [0, 0, 1, 1], [], []>} : vector<16x64xf32>, vector<64x64xf32>, vector<16x64xf32> -> vector<16x64xf32>
    %c5_288 = arith.constant 5 : index
    %c0_289 = arith.constant 0 : index
    %c0_290 = arith.constant 0 : index
    %301 = vector.load %arg34[%c5_288, %c0_289, %c0_290] : memref<9x64x64xf32, #tpu.memory_space<vmem>>, vector<1x64x64xf32>
    %302 = vector.shape_cast %301 : vector<1x64x64xf32> to vector<64x64xf32>
    %cst_291 = arith.constant dense<0.000000e+00> : vector<16x64xf32>
    %303 = tpu.matmul %151, %302, %cst_291 {dimension_numbers = #tpu.dot_dimension_numbers<[1], [0], [0], [1], [0, 0, 1, 1], [], []>} : vector<16x64xf32>, vector<64x64xf32>, vector<16x64xf32> -> vector<16x64xf32>
    %c6_292 = arith.constant 6 : index
    %c0_293 = arith.constant 0 : index
    %c0_294 = arith.constant 0 : index
    %304 = vector.load %arg34[%c6_292, %c0_293, %c0_294] : memref<9x64x64xf32, #tpu.memory_space<vmem>>, vector<1x64x64xf32>
    %305 = vector.shape_cast %304 : vector<1x64x64xf32> to vector<64x64xf32>
    %cst_295 = arith.constant dense<0.000000e+00> : vector<16x64xf32>
    %306 = tpu.matmul %151, %305, %cst_295 {dimension_numbers = #tpu.dot_dimension_numbers<[1], [0], [0], [1], [0, 0, 1, 1], [], []>} : vector<16x64xf32>, vector<64x64xf32>, vector<16x64xf32> -> vector<16x64xf32>
    %c7_296 = arith.constant 7 : index
    %c0_297 = arith.constant 0 : index
    %c0_298 = arith.constant 0 : index
    %307 = vector.load %arg34[%c7_296, %c0_297, %c0_298] : memref<9x64x64xf32, #tpu.memory_space<vmem>>, vector<1x64x64xf32>
    %308 = vector.shape_cast %307 : vector<1x64x64xf32> to vector<64x64xf32>
    %cst_299 = arith.constant dense<0.000000e+00> : vector<16x64xf32>
    %309 = tpu.matmul %151, %308, %cst_299 {dimension_numbers = #tpu.dot_dimension_numbers<[1], [0], [0], [1], [0, 0, 1, 1], [], []>} : vector<16x64xf32>, vector<64x64xf32>, vector<16x64xf32> -> vector<16x64xf32>
    %c8_300 = arith.constant 8 : index
    %c0_301 = arith.constant 0 : index
    %c0_302 = arith.constant 0 : index
    %310 = vector.load %arg34[%c8_300, %c0_301, %c0_302] : memref<9x64x64xf32, #tpu.memory_space<vmem>>, vector<1x64x64xf32>
    %311 = vector.shape_cast %310 : vector<1x64x64xf32> to vector<64x64xf32>
    %cst_303 = arith.constant dense<0.000000e+00> : vector<16x64xf32>
    %312 = tpu.matmul %151, %311, %cst_303 {dimension_numbers = #tpu.dot_dimension_numbers<[1], [0], [0], [1], [0, 0, 1, 1], [], []>} : vector<16x64xf32>, vector<64x64xf32>, vector<16x64xf32> -> vector<16x64xf32>
    %313 = tpu.concatenate %267, %291, %270, %294, %273, %297, %276, %300, %264, %151, %279, %303, %282, %306, %285, %309 in 0 : vector<16x64xf32>, vector<16x64xf32>, vector<16x64xf32>, vector<16x64xf32>, vector<16x64xf32>, vector<16x64xf32>, vector<16x64xf32>, vector<16x64xf32>, vector<16x64xf32>, vector<16x64xf32>, vector<16x64xf32>, vector<16x64xf32>, vector<16x64xf32>, vector<16x64xf32>, vector<16x64xf32>, vector<16x64xf32> -> vector<256x64xf32>
    %314 = tpu.concatenate %288, %312 in 0 : vector<16x64xf32>, vector<16x64xf32> -> vector<32x64xf32>
    %315 = tpu.concatenate %313, %314 in 0 : vector<256x64xf32>, vector<32x64xf32> -> vector<288x64xf32>
    %c0_304 = arith.constant 0 : index
    %c0_305 = arith.constant 0 : index
    %316 = vector.load %arg21[%c0_304, %c0_305] : memref<16x288xf32, #tpu.memory_space<vmem>>, vector<16x288xf32>
    %cst_306 = arith.constant dense<0.000000e+00> : vector<16x64xf32>
    %317 = tpu.matmul %316, %315, %cst_306 {dimension_numbers = #tpu.dot_dimension_numbers<[1], [0], [0], [1], [0, 0, 1, 1], [], []>} : vector<16x288xf32>, vector<288x64xf32>, vector<16x64xf32> -> vector<16x64xf32>
    %c0_307 = arith.constant 0 : index
    %c0_308 = arith.constant 0 : index
    %318 = vector.load %arg22[%c0_307, %c0_308] : memref<16x1xf32, #tpu.memory_space<vmem>>, vector<16x1xf32>
    %319 = vector.broadcast %318 : vector<16x1xf32> to vector<16x64xf32>
    %320 = arith.addf %317, %319 : vector<16x64xf32>
    %cst_309 = arith.constant 0.000000e+00 : f32
    %321 = vector.broadcast %cst_309 : f32 to vector<16x64xf32>
    %322 = arith.maximumf %320, %321 : vector<16x64xf32>
    %c0_310 = arith.constant 0 : index
    %c0_311 = arith.constant 0 : index
    %c0_312 = arith.constant 0 : index
    %323 = vector.load %arg34[%c0_310, %c0_311, %c0_312] : memref<9x64x64xf32, #tpu.memory_space<vmem>>, vector<1x64x64xf32>
    %324 = vector.shape_cast %323 : vector<1x64x64xf32> to vector<64x64xf32>
    %cst_313 = arith.constant dense<0.000000e+00> : vector<16x64xf32>
    %325 = tpu.matmul %322, %324, %cst_313 {dimension_numbers = #tpu.dot_dimension_numbers<[1], [0], [0], [1], [0, 0, 1, 1], [], []>} : vector<16x64xf32>, vector<64x64xf32>, vector<16x64xf32> -> vector<16x64xf32>
    %c1_314 = arith.constant 1 : index
    %c0_315 = arith.constant 0 : index
    %c0_316 = arith.constant 0 : index
    %326 = vector.load %arg34[%c1_314, %c0_315, %c0_316] : memref<9x64x64xf32, #tpu.memory_space<vmem>>, vector<1x64x64xf32>
    %327 = vector.shape_cast %326 : vector<1x64x64xf32> to vector<64x64xf32>
    %cst_317 = arith.constant dense<0.000000e+00> : vector<16x64xf32>
    %328 = tpu.matmul %322, %327, %cst_317 {dimension_numbers = #tpu.dot_dimension_numbers<[1], [0], [0], [1], [0, 0, 1, 1], [], []>} : vector<16x64xf32>, vector<64x64xf32>, vector<16x64xf32> -> vector<16x64xf32>
    %c2_318 = arith.constant 2 : index
    %c0_319 = arith.constant 0 : index
    %c0_320 = arith.constant 0 : index
    %329 = vector.load %arg34[%c2_318, %c0_319, %c0_320] : memref<9x64x64xf32, #tpu.memory_space<vmem>>, vector<1x64x64xf32>
    %330 = vector.shape_cast %329 : vector<1x64x64xf32> to vector<64x64xf32>
    %cst_321 = arith.constant dense<0.000000e+00> : vector<16x64xf32>
    %331 = tpu.matmul %322, %330, %cst_321 {dimension_numbers = #tpu.dot_dimension_numbers<[1], [0], [0], [1], [0, 0, 1, 1], [], []>} : vector<16x64xf32>, vector<64x64xf32>, vector<16x64xf32> -> vector<16x64xf32>
    %c3_322 = arith.constant 3 : index
    %c0_323 = arith.constant 0 : index
    %c0_324 = arith.constant 0 : index
    %332 = vector.load %arg34[%c3_322, %c0_323, %c0_324] : memref<9x64x64xf32, #tpu.memory_space<vmem>>, vector<1x64x64xf32>
    %333 = vector.shape_cast %332 : vector<1x64x64xf32> to vector<64x64xf32>
    %cst_325 = arith.constant dense<0.000000e+00> : vector<16x64xf32>
    %334 = tpu.matmul %322, %333, %cst_325 {dimension_numbers = #tpu.dot_dimension_numbers<[1], [0], [0], [1], [0, 0, 1, 1], [], []>} : vector<16x64xf32>, vector<64x64xf32>, vector<16x64xf32> -> vector<16x64xf32>
    %c5_326 = arith.constant 5 : index
    %c0_327 = arith.constant 0 : index
    %c0_328 = arith.constant 0 : index
    %335 = vector.load %arg34[%c5_326, %c0_327, %c0_328] : memref<9x64x64xf32, #tpu.memory_space<vmem>>, vector<1x64x64xf32>
    %336 = vector.shape_cast %335 : vector<1x64x64xf32> to vector<64x64xf32>
    %cst_329 = arith.constant dense<0.000000e+00> : vector<16x64xf32>
    %337 = tpu.matmul %322, %336, %cst_329 {dimension_numbers = #tpu.dot_dimension_numbers<[1], [0], [0], [1], [0, 0, 1, 1], [], []>} : vector<16x64xf32>, vector<64x64xf32>, vector<16x64xf32> -> vector<16x64xf32>
    %c6_330 = arith.constant 6 : index
    %c0_331 = arith.constant 0 : index
    %c0_332 = arith.constant 0 : index
    %338 = vector.load %arg34[%c6_330, %c0_331, %c0_332] : memref<9x64x64xf32, #tpu.memory_space<vmem>>, vector<1x64x64xf32>
    %339 = vector.shape_cast %338 : vector<1x64x64xf32> to vector<64x64xf32>
    %cst_333 = arith.constant dense<0.000000e+00> : vector<16x64xf32>
    %340 = tpu.matmul %322, %339, %cst_333 {dimension_numbers = #tpu.dot_dimension_numbers<[1], [0], [0], [1], [0, 0, 1, 1], [], []>} : vector<16x64xf32>, vector<64x64xf32>, vector<16x64xf32> -> vector<16x64xf32>
    %c7_334 = arith.constant 7 : index
    %c0_335 = arith.constant 0 : index
    %c0_336 = arith.constant 0 : index
    %341 = vector.load %arg34[%c7_334, %c0_335, %c0_336] : memref<9x64x64xf32, #tpu.memory_space<vmem>>, vector<1x64x64xf32>
    %342 = vector.shape_cast %341 : vector<1x64x64xf32> to vector<64x64xf32>
    %cst_337 = arith.constant dense<0.000000e+00> : vector<16x64xf32>
    %343 = tpu.matmul %322, %342, %cst_337 {dimension_numbers = #tpu.dot_dimension_numbers<[1], [0], [0], [1], [0, 0, 1, 1], [], []>} : vector<16x64xf32>, vector<64x64xf32>, vector<16x64xf32> -> vector<16x64xf32>
    %c8_338 = arith.constant 8 : index
    %c0_339 = arith.constant 0 : index
    %c0_340 = arith.constant 0 : index
    %344 = vector.load %arg34[%c8_338, %c0_339, %c0_340] : memref<9x64x64xf32, #tpu.memory_space<vmem>>, vector<1x64x64xf32>
    %345 = vector.shape_cast %344 : vector<1x64x64xf32> to vector<64x64xf32>
    %cst_341 = arith.constant dense<0.000000e+00> : vector<16x64xf32>
    %346 = tpu.matmul %322, %345, %cst_341 {dimension_numbers = #tpu.dot_dimension_numbers<[1], [0], [0], [1], [0, 0, 1, 1], [], []>} : vector<16x64xf32>, vector<64x64xf32>, vector<16x64xf32> -> vector<16x64xf32>
    %347 = tpu.concatenate %325, %328, %331, %334, %322, %337, %340, %343, %346 in 0 : vector<16x64xf32>, vector<16x64xf32>, vector<16x64xf32>, vector<16x64xf32>, vector<16x64xf32>, vector<16x64xf32>, vector<16x64xf32>, vector<16x64xf32>, vector<16x64xf32> -> vector<144x64xf32>
    %c0_342 = arith.constant 0 : index
    %c0_343 = arith.constant 0 : index
    %348 = vector.load %arg23[%c0_342, %c0_343] : memref<16x144xf32, #tpu.memory_space<vmem>>, vector<16x144xf32>
    %cst_344 = arith.constant dense<0.000000e+00> : vector<16x64xf32>
    %349 = tpu.matmul %348, %347, %cst_344 {dimension_numbers = #tpu.dot_dimension_numbers<[1], [0], [0], [1], [0, 0, 1, 1], [], []>} : vector<16x144xf32>, vector<144x64xf32>, vector<16x64xf32> -> vector<16x64xf32>
    %c0_345 = arith.constant 0 : index
    %c0_346 = arith.constant 0 : index
    %350 = vector.load %arg24[%c0_345, %c0_346] : memref<16x1xf32, #tpu.memory_space<vmem>>, vector<16x1xf32>
    %351 = vector.broadcast %350 : vector<16x1xf32> to vector<16x64xf32>
    %352 = arith.addf %349, %351 : vector<16x64xf32>
    %cst_347 = arith.constant 0.000000e+00 : f32
    %353 = vector.broadcast %cst_347 : f32 to vector<16x64xf32>
    %354 = arith.maximumf %352, %353 : vector<16x64xf32>
    %c0_348 = arith.constant 0 : index
    %c0_349 = arith.constant 0 : index
    %355 = vector.load %arg25[%c0_348, %c0_349] : memref<32x16xf32, #tpu.memory_space<vmem>>, vector<32x16xf32>
    %cst_350 = arith.constant dense<0.000000e+00> : vector<32x64xf32>
    %356 = tpu.matmul %355, %354, %cst_350 {dimension_numbers = #tpu.dot_dimension_numbers<[1], [0], [0], [1], [0, 0, 1, 1], [], []>} : vector<32x16xf32>, vector<16x64xf32>, vector<32x64xf32> -> vector<32x64xf32>
    %357 = vector.extract_strided_slice %356 {offsets = [0, 0], sizes = [8, 64], strides = [1, 1]} : vector<32x64xf32> to vector<8x64xf32>
    %c0_351 = arith.constant 0 : index
    %c0_352 = arith.constant 0 : index
    %c0_353 = arith.constant 0 : index
    %358 = vector.load %arg39[%c0_351, %c0_352, %c0_353] : memref<4x64x256xf32, #tpu.memory_space<vmem>>, vector<1x64x256xf32>
    %359 = vector.shape_cast %358 : vector<1x64x256xf32> to vector<64x256xf32>
    %cst_354 = arith.constant dense<0.000000e+00> : vector<8x256xf32>
    %360 = tpu.matmul %357, %359, %cst_354 {dimension_numbers = #tpu.dot_dimension_numbers<[1], [0], [0], [1], [0, 0, 1, 1], [], []>} : vector<8x64xf32>, vector<64x256xf32>, vector<8x256xf32> -> vector<8x256xf32>
    %361 = vector.extract_strided_slice %356 {offsets = [8, 0], sizes = [8, 64], strides = [1, 1]} : vector<32x64xf32> to vector<8x64xf32>
    %c1_355 = arith.constant 1 : index
    %c0_356 = arith.constant 0 : index
    %c0_357 = arith.constant 0 : index
    %362 = vector.load %arg39[%c1_355, %c0_356, %c0_357] : memref<4x64x256xf32, #tpu.memory_space<vmem>>, vector<1x64x256xf32>
    %363 = vector.shape_cast %362 : vector<1x64x256xf32> to vector<64x256xf32>
    %cst_358 = arith.constant dense<0.000000e+00> : vector<8x256xf32>
    %364 = tpu.matmul %361, %363, %cst_358 {dimension_numbers = #tpu.dot_dimension_numbers<[1], [0], [0], [1], [0, 0, 1, 1], [], []>} : vector<8x64xf32>, vector<64x256xf32>, vector<8x256xf32> -> vector<8x256xf32>
    %365 = arith.addf %360, %364 : vector<8x256xf32>
    %366 = vector.extract_strided_slice %356 {offsets = [16, 0], sizes = [8, 64], strides = [1, 1]} : vector<32x64xf32> to vector<8x64xf32>
    %c2_359 = arith.constant 2 : index
    %c0_360 = arith.constant 0 : index
    %c0_361 = arith.constant 0 : index
    %367 = vector.load %arg39[%c2_359, %c0_360, %c0_361] : memref<4x64x256xf32, #tpu.memory_space<vmem>>, vector<1x64x256xf32>
    %368 = vector.shape_cast %367 : vector<1x64x256xf32> to vector<64x256xf32>
    %cst_362 = arith.constant dense<0.000000e+00> : vector<8x256xf32>
    %369 = tpu.matmul %366, %368, %cst_362 {dimension_numbers = #tpu.dot_dimension_numbers<[1], [0], [0], [1], [0, 0, 1, 1], [], []>} : vector<8x64xf32>, vector<64x256xf32>, vector<8x256xf32> -> vector<8x256xf32>
    %370 = arith.addf %365, %369 : vector<8x256xf32>
    %371 = vector.extract_strided_slice %356 {offsets = [24, 0], sizes = [8, 64], strides = [1, 1]} : vector<32x64xf32> to vector<8x64xf32>
    %c3_363 = arith.constant 3 : index
    %c0_364 = arith.constant 0 : index
    %c0_365 = arith.constant 0 : index
    %372 = vector.load %arg39[%c3_363, %c0_364, %c0_365] : memref<4x64x256xf32, #tpu.memory_space<vmem>>, vector<1x64x256xf32>
    %373 = vector.shape_cast %372 : vector<1x64x256xf32> to vector<64x256xf32>
    %cst_366 = arith.constant dense<0.000000e+00> : vector<8x256xf32>
    %374 = tpu.matmul %371, %373, %cst_366 {dimension_numbers = #tpu.dot_dimension_numbers<[1], [0], [0], [1], [0, 0, 1, 1], [], []>} : vector<8x64xf32>, vector<64x256xf32>, vector<8x256xf32> -> vector<8x256xf32>
    %375 = arith.addf %370, %374 : vector<8x256xf32>
    %c0_367 = arith.constant 0 : index
    %c0_368 = arith.constant 0 : index
    %376 = vector.load %arg26[%c0_367, %c0_368] : memref<8x1xf32, #tpu.memory_space<vmem>>, vector<8x1xf32>
    %377 = vector.broadcast %376 : vector<8x1xf32> to vector<8x256xf32>
    %378 = arith.addf %375, %377 : vector<8x256xf32>
    %c17_i32_369 = arith.constant 17 : i32
    %379 = tpu.dynamic_rotate %378 by %c17_i32_369 dim 1 : vector<8x256xf32>, i32 -> vector<8x256xf32>
    %380 = vector.broadcast %1 : vector<1x256xf32> to vector<8x256xf32>
    %381 = arith.mulf %379, %380 : vector<8x256xf32>
    %c16_i32_370 = arith.constant 16 : i32
    %382 = tpu.dynamic_rotate %378 by %c16_i32_370 dim 1 : vector<8x256xf32>, i32 -> vector<8x256xf32>
    %383 = vector.broadcast %3 : vector<1x256xf32> to vector<8x256xf32>
    %384 = arith.mulf %382, %383 : vector<8x256xf32>
    %c15_i32_371 = arith.constant 15 : i32
    %385 = tpu.dynamic_rotate %378 by %c15_i32_371 dim 1 : vector<8x256xf32>, i32 -> vector<8x256xf32>
    %386 = vector.broadcast %5 : vector<1x256xf32> to vector<8x256xf32>
    %387 = arith.mulf %385, %386 : vector<8x256xf32>
    %c1_i32_372 = arith.constant 1 : i32
    %388 = tpu.dynamic_rotate %378 by %c1_i32_372 dim 1 : vector<8x256xf32>, i32 -> vector<8x256xf32>
    %389 = vector.broadcast %7 : vector<1x256xf32> to vector<8x256xf32>
    %390 = arith.mulf %388, %389 : vector<8x256xf32>
    %c255_i32_373 = arith.constant 255 : i32
    %391 = tpu.dynamic_rotate %378 by %c255_i32_373 dim 1 : vector<8x256xf32>, i32 -> vector<8x256xf32>
    %392 = vector.broadcast %9 : vector<1x256xf32> to vector<8x256xf32>
    %393 = arith.mulf %391, %392 : vector<8x256xf32>
    %c241_i32_374 = arith.constant 241 : i32
    %394 = tpu.dynamic_rotate %378 by %c241_i32_374 dim 1 : vector<8x256xf32>, i32 -> vector<8x256xf32>
    %395 = vector.broadcast %11 : vector<1x256xf32> to vector<8x256xf32>
    %396 = arith.mulf %394, %395 : vector<8x256xf32>
    %c240_i32_375 = arith.constant 240 : i32
    %397 = tpu.dynamic_rotate %378 by %c240_i32_375 dim 1 : vector<8x256xf32>, i32 -> vector<8x256xf32>
    %398 = vector.broadcast %13 : vector<1x256xf32> to vector<8x256xf32>
    %399 = arith.mulf %397, %398 : vector<8x256xf32>
    %c239_i32_376 = arith.constant 239 : i32
    %400 = tpu.dynamic_rotate %378 by %c239_i32_376 dim 1 : vector<8x256xf32>, i32 -> vector<8x256xf32>
    %401 = vector.broadcast %15 : vector<1x256xf32> to vector<8x256xf32>
    %402 = arith.mulf %400, %401 : vector<8x256xf32>
    %c17_i32_377 = arith.constant 17 : i32
    %403 = tpu.dynamic_rotate %81 by %c17_i32_377 dim 1 : vector<8x256xf32>, i32 -> vector<8x256xf32>
    %404 = vector.broadcast %1 : vector<1x256xf32> to vector<8x256xf32>
    %405 = arith.mulf %403, %404 : vector<8x256xf32>
    %c16_i32_378 = arith.constant 16 : i32
    %406 = tpu.dynamic_rotate %81 by %c16_i32_378 dim 1 : vector<8x256xf32>, i32 -> vector<8x256xf32>
    %407 = vector.broadcast %3 : vector<1x256xf32> to vector<8x256xf32>
    %408 = arith.mulf %406, %407 : vector<8x256xf32>
    %c15_i32_379 = arith.constant 15 : i32
    %409 = tpu.dynamic_rotate %81 by %c15_i32_379 dim 1 : vector<8x256xf32>, i32 -> vector<8x256xf32>
    %410 = vector.broadcast %5 : vector<1x256xf32> to vector<8x256xf32>
    %411 = arith.mulf %409, %410 : vector<8x256xf32>
    %c1_i32_380 = arith.constant 1 : i32
    %412 = tpu.dynamic_rotate %81 by %c1_i32_380 dim 1 : vector<8x256xf32>, i32 -> vector<8x256xf32>
    %413 = vector.broadcast %7 : vector<1x256xf32> to vector<8x256xf32>
    %414 = arith.mulf %412, %413 : vector<8x256xf32>
    %c255_i32_381 = arith.constant 255 : i32
    %415 = tpu.dynamic_rotate %81 by %c255_i32_381 dim 1 : vector<8x256xf32>, i32 -> vector<8x256xf32>
    %416 = vector.broadcast %9 : vector<1x256xf32> to vector<8x256xf32>
    %417 = arith.mulf %415, %416 : vector<8x256xf32>
    %c241_i32_382 = arith.constant 241 : i32
    %418 = tpu.dynamic_rotate %81 by %c241_i32_382 dim 1 : vector<8x256xf32>, i32 -> vector<8x256xf32>
    %419 = vector.broadcast %11 : vector<1x256xf32> to vector<8x256xf32>
    %420 = arith.mulf %418, %419 : vector<8x256xf32>
    %c240_i32_383 = arith.constant 240 : i32
    %421 = tpu.dynamic_rotate %81 by %c240_i32_383 dim 1 : vector<8x256xf32>, i32 -> vector<8x256xf32>
    %422 = vector.broadcast %13 : vector<1x256xf32> to vector<8x256xf32>
    %423 = arith.mulf %421, %422 : vector<8x256xf32>
    %c239_i32_384 = arith.constant 239 : i32
    %424 = tpu.dynamic_rotate %81 by %c239_i32_384 dim 1 : vector<8x256xf32>, i32 -> vector<8x256xf32>
    %425 = vector.broadcast %15 : vector<1x256xf32> to vector<8x256xf32>
    %426 = arith.mulf %424, %425 : vector<8x256xf32>
    %427 = tpu.concatenate %381, %405, %384, %408, %387, %411, %390, %414, %378, %81, %393, %417, %396, %420, %399, %423 in 0 : vector<8x256xf32>, vector<8x256xf32>, vector<8x256xf32>, vector<8x256xf32>, vector<8x256xf32>, vector<8x256xf32>, vector<8x256xf32>, vector<8x256xf32>, vector<8x256xf32>, vector<8x256xf32>, vector<8x256xf32>, vector<8x256xf32>, vector<8x256xf32>, vector<8x256xf32>, vector<8x256xf32>, vector<8x256xf32> -> vector<128x256xf32>
    %428 = tpu.concatenate %402, %426 in 0 : vector<8x256xf32>, vector<8x256xf32> -> vector<16x256xf32>
    %429 = tpu.concatenate %427, %428 in 0 : vector<128x256xf32>, vector<16x256xf32> -> vector<144x256xf32>
    %c0_385 = arith.constant 0 : index
    %c0_386 = arith.constant 0 : index
    %430 = vector.load %arg27[%c0_385, %c0_386] : memref<8x144xf32, #tpu.memory_space<vmem>>, vector<8x144xf32>
    %cst_387 = arith.constant dense<0.000000e+00> : vector<8x256xf32>
    %431 = tpu.matmul %430, %429, %cst_387 {dimension_numbers = #tpu.dot_dimension_numbers<[1], [0], [0], [1], [0, 0, 1, 1], [], []>} : vector<8x144xf32>, vector<144x256xf32>, vector<8x256xf32> -> vector<8x256xf32>
    %c0_388 = arith.constant 0 : index
    %c0_389 = arith.constant 0 : index
    %432 = vector.load %arg28[%c0_388, %c0_389] : memref<8x1xf32, #tpu.memory_space<vmem>>, vector<8x1xf32>
    %433 = vector.broadcast %432 : vector<8x1xf32> to vector<8x256xf32>
    %434 = arith.addf %431, %433 : vector<8x256xf32>
    %cst_390 = arith.constant 0.000000e+00 : f32
    %435 = vector.broadcast %cst_390 : f32 to vector<8x256xf32>
    %436 = arith.maximumf %434, %435 : vector<8x256xf32>
    %c17_i32_391 = arith.constant 17 : i32
    %437 = tpu.dynamic_rotate %436 by %c17_i32_391 dim 1 : vector<8x256xf32>, i32 -> vector<8x256xf32>
    %438 = vector.broadcast %1 : vector<1x256xf32> to vector<8x256xf32>
    %439 = arith.mulf %437, %438 : vector<8x256xf32>
    %c16_i32_392 = arith.constant 16 : i32
    %440 = tpu.dynamic_rotate %436 by %c16_i32_392 dim 1 : vector<8x256xf32>, i32 -> vector<8x256xf32>
    %441 = vector.broadcast %3 : vector<1x256xf32> to vector<8x256xf32>
    %442 = arith.mulf %440, %441 : vector<8x256xf32>
    %c15_i32_393 = arith.constant 15 : i32
    %443 = tpu.dynamic_rotate %436 by %c15_i32_393 dim 1 : vector<8x256xf32>, i32 -> vector<8x256xf32>
    %444 = vector.broadcast %5 : vector<1x256xf32> to vector<8x256xf32>
    %445 = arith.mulf %443, %444 : vector<8x256xf32>
    %c1_i32_394 = arith.constant 1 : i32
    %446 = tpu.dynamic_rotate %436 by %c1_i32_394 dim 1 : vector<8x256xf32>, i32 -> vector<8x256xf32>
    %447 = vector.broadcast %7 : vector<1x256xf32> to vector<8x256xf32>
    %448 = arith.mulf %446, %447 : vector<8x256xf32>
    %c255_i32_395 = arith.constant 255 : i32
    %449 = tpu.dynamic_rotate %436 by %c255_i32_395 dim 1 : vector<8x256xf32>, i32 -> vector<8x256xf32>
    %450 = vector.broadcast %9 : vector<1x256xf32> to vector<8x256xf32>
    %451 = arith.mulf %449, %450 : vector<8x256xf32>
    %c241_i32_396 = arith.constant 241 : i32
    %452 = tpu.dynamic_rotate %436 by %c241_i32_396 dim 1 : vector<8x256xf32>, i32 -> vector<8x256xf32>
    %453 = vector.broadcast %11 : vector<1x256xf32> to vector<8x256xf32>
    %454 = arith.mulf %452, %453 : vector<8x256xf32>
    %c240_i32_397 = arith.constant 240 : i32
    %455 = tpu.dynamic_rotate %436 by %c240_i32_397 dim 1 : vector<8x256xf32>, i32 -> vector<8x256xf32>
    %456 = vector.broadcast %13 : vector<1x256xf32> to vector<8x256xf32>
    %457 = arith.mulf %455, %456 : vector<8x256xf32>
    %c239_i32_398 = arith.constant 239 : i32
    %458 = tpu.dynamic_rotate %436 by %c239_i32_398 dim 1 : vector<8x256xf32>, i32 -> vector<8x256xf32>
    %459 = vector.broadcast %15 : vector<1x256xf32> to vector<8x256xf32>
    %460 = arith.mulf %458, %459 : vector<8x256xf32>
    %461 = tpu.concatenate %439, %442, %445, %448, %436, %451, %454, %457, %460 in 0 : vector<8x256xf32>, vector<8x256xf32>, vector<8x256xf32>, vector<8x256xf32>, vector<8x256xf32>, vector<8x256xf32>, vector<8x256xf32>, vector<8x256xf32>, vector<8x256xf32> -> vector<72x256xf32>
    %c0_399 = arith.constant 0 : index
    %c0_400 = arith.constant 0 : index
    %462 = vector.load %arg29[%c0_399, %c0_400] : memref<8x72xf32, #tpu.memory_space<vmem>>, vector<8x72xf32>
    %cst_401 = arith.constant dense<0.000000e+00> : vector<8x256xf32>
    %463 = tpu.matmul %462, %461, %cst_401 {dimension_numbers = #tpu.dot_dimension_numbers<[1], [0], [0], [1], [0, 0, 1, 1], [], []>} : vector<8x72xf32>, vector<72x256xf32>, vector<8x256xf32> -> vector<8x256xf32>
    %c0_402 = arith.constant 0 : index
    %c0_403 = arith.constant 0 : index
    %464 = vector.load %arg30[%c0_402, %c0_403] : memref<8x1xf32, #tpu.memory_space<vmem>>, vector<8x1xf32>
    %465 = vector.broadcast %464 : vector<8x1xf32> to vector<8x256xf32>
    %466 = arith.addf %463, %465 : vector<8x256xf32>
    %cst_404 = arith.constant 0.000000e+00 : f32
    %467 = vector.broadcast %cst_404 : f32 to vector<8x256xf32>
    %468 = arith.maximumf %466, %467 : vector<8x256xf32>
    %c0_405 = arith.constant 0 : index
    %c0_406 = arith.constant 0 : index
    %469 = vector.load %arg31[%c0_405, %c0_406] : memref<2x8xf32, #tpu.memory_space<vmem>>, vector<2x8xf32>
    %cst_407 = arith.constant dense<0.000000e+00> : vector<2x256xf32>
    %470 = tpu.matmul %469, %468, %cst_407 {dimension_numbers = #tpu.dot_dimension_numbers<[1], [0], [0], [1], [0, 0, 1, 1], [], []>} : vector<2x8xf32>, vector<8x256xf32>, vector<2x256xf32> -> vector<2x256xf32>
    %c0_408 = arith.constant 0 : index
    %c0_409 = arith.constant 0 : index
    %471 = vector.load %arg32[%c0_408, %c0_409] : memref<2x1xf32, #tpu.memory_space<vmem>>, vector<2x1xf32>
    %472 = vector.broadcast %471 : vector<2x1xf32> to vector<2x256xf32>
    %473 = arith.addf %470, %472 : vector<2x256xf32>
    %c0_410 = arith.constant 0 : index
    %c0_411 = arith.constant 0 : index
    %c0_412 = arith.constant 0 : index
    %474 = vector.load %arg40[%c0_410, %c0_411, %c0_412] : memref<1x2x256xf32, #tpu.memory_space<vmem>>, vector<1x2x256xf32>
    %475 = vector.shape_cast %474 : vector<1x2x256xf32> to vector<2x256xf32>
    %476 = vector.shape_cast %473 : vector<2x256xf32> to vector<1x2x256xf32>
    tpu.vector_store %arg40[%c0_410, %c0_411, %c0_412], %476 {strides = array<i32>} : memref<1x2x256xf32, #tpu.memory_space<vmem>>, vector<1x2x256xf32>,
    return
  }
  func.func @transform_0(%arg0: i32) -> (i32, i32, i32) {
    %c0_i32 = arith.constant 0 : i32
    %c0_i32_0 = arith.constant 0 : i32
    %c0_i32_1 = arith.constant 0 : i32
    return %arg0, %c0_i32, %c0_i32_0 : i32, i32, i32
  }
  func.func @transform_1(%arg0: i32) -> (i32, i32, i32) {
    %c0_i32 = arith.constant 0 : i32
    %c0_i32_0 = arith.constant 0 : i32
    %c0_i32_1 = arith.constant 0 : i32
    return %arg0, %c0_i32, %c0_i32_0 : i32, i32, i32
  }
  func.func @transform_2(%arg0: i32) -> (i32, i32) {
    %c0_i32 = arith.constant 0 : i32
    %c0_i32_0 = arith.constant 0 : i32
    %c0_i32_1 = arith.constant 0 : i32
    return %c0_i32, %c0_i32_0 : i32, i32
  }
  func.func @transform_3(%arg0: i32) -> (i32, i32) {
    %c0_i32 = arith.constant 0 : i32
    %c0_i32_0 = arith.constant 0 : i32
    %c0_i32_1 = arith.constant 0 : i32
    return %c0_i32, %c0_i32_0 : i32, i32
  }
  func.func @transform_4(%arg0: i32) -> (i32, i32) {
    %c0_i32 = arith.constant 0 : i32
    %c0_i32_0 = arith.constant 0 : i32
    %c0_i32_1 = arith.constant 0 : i32
    return %c0_i32, %c0_i32_0 : i32, i32
  }
  func.func @transform_5(%arg0: i32) -> (i32, i32) {
    %c0_i32 = arith.constant 0 : i32
    %c0_i32_0 = arith.constant 0 : i32
    %c0_i32_1 = arith.constant 0 : i32
    return %c0_i32, %c0_i32_0 : i32, i32
  }
  func.func @transform_6(%arg0: i32) -> (i32, i32) {
    %c0_i32 = arith.constant 0 : i32
    %c0_i32_0 = arith.constant 0 : i32
    %c0_i32_1 = arith.constant 0 : i32
    return %c0_i32, %c0_i32_0 : i32, i32
  }
  func.func @transform_7(%arg0: i32) -> (i32, i32) {
    %c0_i32 = arith.constant 0 : i32
    %c0_i32_0 = arith.constant 0 : i32
    %c0_i32_1 = arith.constant 0 : i32
    return %c0_i32, %c0_i32_0 : i32, i32
  }
  func.func @transform_8(%arg0: i32) -> (i32, i32) {
    %c0_i32 = arith.constant 0 : i32
    %c0_i32_0 = arith.constant 0 : i32
    %c0_i32_1 = arith.constant 0 : i32
    return %c0_i32, %c0_i32_0 : i32, i32
  }
  func.func @transform_9(%arg0: i32) -> (i32, i32) {
    %c0_i32 = arith.constant 0 : i32
    %c0_i32_0 = arith.constant 0 : i32
    %c0_i32_1 = arith.constant 0 : i32
    return %c0_i32, %c0_i32_0 : i32, i32
  }
  func.func @transform_10(%arg0: i32) -> (i32, i32) {
    %c0_i32 = arith.constant 0 : i32
    %c0_i32_0 = arith.constant 0 : i32
    %c0_i32_1 = arith.constant 0 : i32
    return %c0_i32, %c0_i32_0 : i32, i32
  }
  func.func @transform_11(%arg0: i32) -> (i32, i32) {
    %c0_i32 = arith.constant 0 : i32
    %c0_i32_0 = arith.constant 0 : i32
    %c0_i32_1 = arith.constant 0 : i32
    return %c0_i32, %c0_i32_0 : i32, i32
  }
  func.func @transform_12(%arg0: i32) -> (i32, i32) {
    %c0_i32 = arith.constant 0 : i32
    %c0_i32_0 = arith.constant 0 : i32
    %c0_i32_1 = arith.constant 0 : i32
    return %c0_i32, %c0_i32_0 : i32, i32
  }
  func.func @transform_13(%arg0: i32) -> (i32, i32) {
    %c0_i32 = arith.constant 0 : i32
    %c0_i32_0 = arith.constant 0 : i32
    %c0_i32_1 = arith.constant 0 : i32
    return %c0_i32, %c0_i32_0 : i32, i32
  }
  func.func @transform_14(%arg0: i32) -> (i32, i32) {
    %c0_i32 = arith.constant 0 : i32
    %c0_i32_0 = arith.constant 0 : i32
    %c0_i32_1 = arith.constant 0 : i32
    return %c0_i32, %c0_i32_0 : i32, i32
  }
  func.func @transform_15(%arg0: i32) -> (i32, i32) {
    %c0_i32 = arith.constant 0 : i32
    %c0_i32_0 = arith.constant 0 : i32
    %c0_i32_1 = arith.constant 0 : i32
    return %c0_i32, %c0_i32_0 : i32, i32
  }
  func.func @transform_16(%arg0: i32) -> (i32, i32) {
    %c0_i32 = arith.constant 0 : i32
    %c0_i32_0 = arith.constant 0 : i32
    %c0_i32_1 = arith.constant 0 : i32
    return %c0_i32, %c0_i32_0 : i32, i32
  }
  func.func @transform_17(%arg0: i32) -> (i32, i32) {
    %c0_i32 = arith.constant 0 : i32
    %c0_i32_0 = arith.constant 0 : i32
    %c0_i32_1 = arith.constant 0 : i32
    return %c0_i32, %c0_i32_0 : i32, i32
  }
  func.func @transform_18(%arg0: i32) -> (i32, i32) {
    %c0_i32 = arith.constant 0 : i32
    %c0_i32_0 = arith.constant 0 : i32
    %c0_i32_1 = arith.constant 0 : i32
    return %c0_i32, %c0_i32_0 : i32, i32
  }
  func.func @transform_19(%arg0: i32) -> (i32, i32) {
    %c0_i32 = arith.constant 0 : i32
    %c0_i32_0 = arith.constant 0 : i32
    %c0_i32_1 = arith.constant 0 : i32
    return %c0_i32, %c0_i32_0 : i32, i32
  }
  func.func @transform_20(%arg0: i32) -> (i32, i32) {
    %c0_i32 = arith.constant 0 : i32
    %c0_i32_0 = arith.constant 0 : i32
    %c0_i32_1 = arith.constant 0 : i32
    return %c0_i32, %c0_i32_0 : i32, i32
  }
  func.func @transform_21(%arg0: i32) -> (i32, i32) {
    %c0_i32 = arith.constant 0 : i32
    %c0_i32_0 = arith.constant 0 : i32
    %c0_i32_1 = arith.constant 0 : i32
    return %c0_i32, %c0_i32_0 : i32, i32
  }
  func.func @transform_22(%arg0: i32) -> (i32, i32) {
    %c0_i32 = arith.constant 0 : i32
    %c0_i32_0 = arith.constant 0 : i32
    %c0_i32_1 = arith.constant 0 : i32
    return %c0_i32, %c0_i32_0 : i32, i32
  }
  func.func @transform_23(%arg0: i32) -> (i32, i32) {
    %c0_i32 = arith.constant 0 : i32
    %c0_i32_0 = arith.constant 0 : i32
    %c0_i32_1 = arith.constant 0 : i32
    return %c0_i32, %c0_i32_0 : i32, i32
  }
  func.func @transform_24(%arg0: i32) -> (i32, i32) {
    %c0_i32 = arith.constant 0 : i32
    %c0_i32_0 = arith.constant 0 : i32
    %c0_i32_1 = arith.constant 0 : i32
    return %c0_i32, %c0_i32_0 : i32, i32
  }
  func.func @transform_25(%arg0: i32) -> (i32, i32) {
    %c0_i32 = arith.constant 0 : i32
    %c0_i32_0 = arith.constant 0 : i32
    %c0_i32_1 = arith.constant 0 : i32
    return %c0_i32, %c0_i32_0 : i32, i32
  }
  func.func @transform_26(%arg0: i32) -> (i32, i32) {
    %c0_i32 = arith.constant 0 : i32
    %c0_i32_0 = arith.constant 0 : i32
    %c0_i32_1 = arith.constant 0 : i32
    return %c0_i32, %c0_i32_0 : i32, i32
  }
  func.func @transform_27(%arg0: i32) -> (i32, i32) {
    %c0_i32 = arith.constant 0 : i32
    %c0_i32_0 = arith.constant 0 : i32
    %c0_i32_1 = arith.constant 0 : i32
    return %c0_i32, %c0_i32_0 : i32, i32
  }
  func.func @transform_28(%arg0: i32) -> (i32, i32) {
    %c0_i32 = arith.constant 0 : i32
    %c0_i32_0 = arith.constant 0 : i32
    %c0_i32_1 = arith.constant 0 : i32
    return %c0_i32, %c0_i32_0 : i32, i32
  }
  func.func @transform_29(%arg0: i32) -> (i32, i32) {
    %c0_i32 = arith.constant 0 : i32
    %c0_i32_0 = arith.constant 0 : i32
    %c0_i32_1 = arith.constant 0 : i32
    return %c0_i32, %c0_i32_0 : i32, i32
  }
  func.func @transform_30(%arg0: i32) -> (i32, i32) {
    %c0_i32 = arith.constant 0 : i32
    %c0_i32_0 = arith.constant 0 : i32
    %c0_i32_1 = arith.constant 0 : i32
    return %c0_i32, %c0_i32_0 : i32, i32
  }
  func.func @transform_31(%arg0: i32) -> (i32, i32) {
    %c0_i32 = arith.constant 0 : i32
    %c0_i32_0 = arith.constant 0 : i32
    %c0_i32_1 = arith.constant 0 : i32
    return %c0_i32, %c0_i32_0 : i32, i32
  }
  func.func @transform_32(%arg0: i32) -> (i32, i32, i32) {
    %c0_i32 = arith.constant 0 : i32
    %c0_i32_0 = arith.constant 0 : i32
    %c0_i32_1 = arith.constant 0 : i32
    %c0_i32_2 = arith.constant 0 : i32
    return %c0_i32, %c0_i32_0, %c0_i32_1 : i32, i32, i32
  }
  func.func @transform_33(%arg0: i32) -> (i32, i32, i32) {
    %c0_i32 = arith.constant 0 : i32
    %c0_i32_0 = arith.constant 0 : i32
    %c0_i32_1 = arith.constant 0 : i32
    %c0_i32_2 = arith.constant 0 : i32
    return %c0_i32, %c0_i32_0, %c0_i32_1 : i32, i32, i32
  }
  func.func @transform_34(%arg0: i32) -> (i32, i32, i32) {
    %c0_i32 = arith.constant 0 : i32
    %c0_i32_0 = arith.constant 0 : i32
    %c0_i32_1 = arith.constant 0 : i32
    %c0_i32_2 = arith.constant 0 : i32
    return %c0_i32, %c0_i32_0, %c0_i32_1 : i32, i32, i32
  }
  func.func @transform_35(%arg0: i32) -> (i32, i32) {
    %c0_i32 = arith.constant 0 : i32
    %c0_i32_0 = arith.constant 0 : i32
    %c0_i32_1 = arith.constant 0 : i32
    return %c0_i32, %c0_i32_0 : i32, i32
  }
  func.func @transform_36(%arg0: i32) -> (i32, i32) {
    %c0_i32 = arith.constant 0 : i32
    %c0_i32_0 = arith.constant 0 : i32
    %c0_i32_1 = arith.constant 0 : i32
    return %c0_i32, %c0_i32_0 : i32, i32
  }
  func.func @transform_37(%arg0: i32) -> (i32, i32, i32) {
    %c0_i32 = arith.constant 0 : i32
    %c0_i32_0 = arith.constant 0 : i32
    %c0_i32_1 = arith.constant 0 : i32
    %c0_i32_2 = arith.constant 0 : i32
    return %c0_i32, %c0_i32_0, %c0_i32_1 : i32, i32, i32
  }
  func.func @transform_38(%arg0: i32) -> (i32, i32, i32) {
    %c0_i32 = arith.constant 0 : i32
    %c0_i32_0 = arith.constant 0 : i32
    %c0_i32_1 = arith.constant 0 : i32
    %c0_i32_2 = arith.constant 0 : i32
    return %c0_i32, %c0_i32_0, %c0_i32_1 : i32, i32, i32
  }
  func.func @transform_39(%arg0: i32) -> (i32, i32, i32) {
    %c0_i32 = arith.constant 0 : i32
    %c0_i32_0 = arith.constant 0 : i32
    %c0_i32_1 = arith.constant 0 : i32
    return %arg0, %c0_i32, %c0_i32_0 : i32, i32, i32
  }
}

</mosaic_0001>

<bundles_post_ra>
// kernel: denoise_cnn_forward.1
= control target key start
LH: loop header
LB: loop body
LE: loop exit
PB: predicated region body
PF: predicated region fallthrough
CT: control target
= control target key end

     0   :  { %s10963_s6 = smov 1   ;;  %s10964_s10 = smov 2   ;;  %s13577_s0 = inlined_call_operand.smem [shape: u32[40], index: -1, kind: input, shape index: {}] }
   0x1   :  { %s11021_s5 = sld [smem:[%s13577_s0]]   ;;  %s10965_s14 = smov 3  }
   0x2   :  { %s11026_s9 = sld [smem:[%s13577_s0 + %s10963_s6]]   ;;  %s10966_s18 = smov 4  }
   0x3   :  { %s11031_s13 = sld [smem:[%s13577_s0 + %s10964_s10]]   ;;  %s10967_s22 = smov 5  }
   0x4   :  { %s11036_s17 = sld [smem:[%s13577_s0 + %s10965_s14]]   ;;  %s10968_s26 = smov 6  }
   0x5   :  { %s11041_s21 = sld [smem:[%s13577_s0 + %s10966_s18]]   ;;  %s10969_s30 = smov 7  }
   0x6   :  { %s11046_s25 = sld [smem:[%s13577_s0 + %s10967_s22]]   ;;  %s10970_s4 = smov 8  }
   0x7   :  { %13764 = sst [smem:[#allocation2_spill]] %s11021_s5  ;;  %s10971_s10 = smov 9  }
   0x8   :  { %13765 = sst [smem:[#allocation3_spill]] %s11026_s9  ;;  %s10972_s15 = smov 10  }
   0x9   :  { %s11051_s29 = sld [smem:[%s13577_s0 + %s10968_s26]]   ;;  %s10973_s20 = smov 11  }
   0xa   :  { %s11056_s3 = sld [smem:[%s13577_s0 + %s10969_s30]]   ;;  %s10974_s26 = smov 12  }
   0xb   :  { %s11061_s8 = sld [smem:[%s13577_s0 + %s10970_s4]]   ;;  %s10975_s1 = smov 13  }
   0xc   :  { %s11066_s14 = sld [smem:[%s13577_s0 + %s10971_s10]]   ;;  %s10976_s7 = smov 14  }
   0xd   :  { %s11071_s19 = sld [smem:[%s13577_s0 + %s10972_s15]]   ;;  %s10977_s15 = smov 15  }
   0xe   :  { %s11076_s24 = sld [smem:[%s13577_s0 + %s10973_s20]]   ;;  %s10978_s22 = smov 16  }
   0xf   :  { %s11081_s30 = sld [smem:[%s13577_s0 + %s10974_s26]]   ;;  %s10979_s28 = smov 17  }
  0x10   :  { %13766 = sst [smem:[#allocation4_spill]] %s11056_s3 }
  0x11   :  { %13767 = sst [smem:[#allocation5_spill]] %s11061_s8 }
  0x12   :  { %s11086_s6 = sld [smem:[%s13577_s0 + %s10975_s1]]  }
  0x13   :  { %13768 = sst [smem:[#allocation6_spill]] %s11071_s19 }
  0x14   :  { %s11091_s12 = sld [smem:[%s13577_s0 + %s10976_s7]]   ;;  %s10980_s7 = smov 18  }
  0x15   :  { %13769 = sst [smem:[#allocation7_spill]] %s11081_s30 }
  0x16   :  { %s11096_s20 = sld [smem:[%s13577_s0 + %s10977_s15]]   ;;  %s10981_s15 = smov 19  }
  0x17   :  { %s11101_s27 = sld [smem:[%s13577_s0 + %s10978_s22]]   ;;  %s10982_s22 = smov 20  }
  0x18   :  { %13770 = sst [smem:[#allocation8_spill]] %s11086_s6 }
  0x19   :  { %s11106_s4 = sld [smem:[%s13577_s0 + %s10979_s28]]   ;;  %s10983_s28 = smov 21  }
  0x1a   :  { %13771 = sst [smem:[#allocation9_spill]] %s11091_s12 }
  0x1b   :  { %s11111_s12 = sld [smem:[%s13577_s0 + %s10980_s7]]   ;;  %s10984_s7 = smov 22  }
  0x1c   :  { %13772 = sst [smem:[#allocation10_spill]] %s11096_s20 }
  0x1d   :  { %13773 = sst [smem:[#allocation11_spill]] %s11101_s27 }
  0x1e   :  { %s11116_s20 = sld [smem:[%s13577_s0 + %s10981_s15]]   ;;  %s10985_s15 = smov 23  }
  0x1f   :  { %13774 = sst [smem:[#allocation12_spill]] %s11106_s4 }
  0x20   :  { %s11121_s27 = sld [smem:[%s13577_s0 + %s10982_s22]]   ;;  %s10986_s22 = smov 24  }
  0x21   :  { %13775 = sst [smem:[#allocation13_spill]] %s11111_s12 }
  0x22   :  { %s11126_s4 = sld [smem:[%s13577_s0 + %s10983_s28]]   ;;  %s10987_s28 = smov 25  }
  0x23   :  { %s11131_s12 = sld [smem:[%s13577_s0 + %s10984_s7]]   ;;  %s10988_s7 = smov 26  }
  0x24   :  { %13776 = sst [smem:[#allocation14_spill]] %s11116_s20 }
  0x25   :  { %s11136_s20 = sld [smem:[%s13577_s0 + %s10985_s15]]   ;;  %s10989_s15 = smov 27  }
  0x26   :  { %13777 = sst [smem:[#allocation15_spill]] %s11121_s27 }
  0x27   :  { %s11141_s27 = sld [smem:[%s13577_s0 + %s10986_s22]]   ;;  %s10990_s22 = smov 28  }
  0x28   :  { %13778 = sst [smem:[#allocation16_spill]] %s11126_s4 }
  0x29   :  { %13779 = sst [smem:[#allocation17_spill]] %s11131_s12 }
  0x2a   :  { %s11146_s4 = sld [smem:[%s13577_s0 + %s10987_s28]]   ;;  %s10991_s28 = smov 29  }
  0x2b   :  { %13780 = sst [smem:[#allocation18_spill]] %s11136_s20 }
  0x2c   :  { %s11151_s12 = sld [smem:[%s13577_s0 + %s10988_s7]]   ;;  %s10992_s7 = smov 30  }
  0x2d   :  { %13781 = sst [smem:[#allocation19_spill]] %s11141_s27 }
  0x2e   :  { %s11156_s20 = sld [smem:[%s13577_s0 + %s10989_s15]]   ;;  %s10993_s15 = smov 31  }
  0x2f   :  { %s11161_s27 = sld [smem:[%s13577_s0 + %s10990_s22]]   ;;  %s10994_s22 = smov 32  }
  0x30   :  { %13782 = sst [smem:[#allocation20_spill]] %s11146_s4 }
  0x31   :  { %s11166_s4 = sld [smem:[%s13577_s0 + %s10991_s28]]   ;;  %s10995_s28 = smov 33  }
  0x32   :  { %13783 = sst [smem:[#allocation21_spill]] %s11151_s12 }
  0x33   :  { %s11171_s12 = sld [smem:[%s13577_s0 + %s10992_s7]]   ;;  %s10996_s7 = smov 34  }
  0x34   :  { %13784 = sst [smem:[#allocation22_spill]] %s11156_s20 }
  0x35   :  { %13785 = sst [smem:[#allocation23_spill]] %s11161_s27 }
  0x36   :  { %s11176_s20 = sld [smem:[%s13577_s0 + %s10993_s15]]   ;;  %s10997_s15 = smov 35  }
  0x37   :  { %13786 = sst [smem:[#allocation24_spill]] %s11166_s4 }
  0x38   :  { %s11181_s27 = sld [smem:[%s13577_s0 + %s10994_s22]]   ;;  %s10998_s22 = smov 36  }
  0x39   :  { %13787 = sst [smem:[#allocation25_spill]] %s11171_s12 }
  0x3a   :  { %s11186_s4 = sld [smem:[%s13577_s0 + %s10995_s28]]   ;;  %s10999_s28 = smov 37  }
  0x3b   :  { %s11191_s12 = sld [smem:[%s13577_s0 + %s10996_s7]]   ;;  %s11000_s7 = smov 38  }
  0x3c   :  { %13788 = sst [smem:[#allocation26_spill]] %s11176_s20 }
  0x3d   :  { %s11196_s20 = sld [smem:[%s13577_s0 + %s10997_s15]]   ;;  %s11001_s15 = smov 39  }
  0x3e   :  { %s11201_s9 = sld [smem:[%s13577_s0 + %s10998_s22]]   ;;  %s11218_s22 = smov 0  }
  0x3f   :  { %s11206_s30 = sld [smem:[%s13577_s0 + %s10999_s28]]  }
  0x40   :  { %13789 = sst [smem:[#allocation27_spill]] %s11186_s4 }
  0x41   :  { %13790 = sst [smem:[#allocation28_spill]] %s11191_s12 }
  0x42   :  { %s11211_s19 = sld [smem:[%s13577_s0 + %s11000_s7]]  }
  0x43   :  { %s11216_s12 = sld [smem:[%s13577_s0 + %s11001_s15]]  }
  0x44   :  { %13791 = sst [smem:[#allocation29_spill]] %s11201_s9 }
  0x45 LB: > { %s13792_s9 = sld [smem:[#allocation29_spill]]  ;;  %s8779_s23 = sadd.s32 4294967295, %s10961_s22   ;;  %s10961_s22 = sphi %s11218_s22, %s89_s22  }
  0x46   : > { %s13793_s8 = sld [smem:[#allocation5_spill]]  ;;  %p8783_p0 = scmp.ge.s32.totalorder %s10961_s22, 1 }
  0x47   : > { %s13794_s4 = sld [smem:[#allocation27_spill]]  ;;  %p1085_p1 = scmp.lt.s32.totalorder %s10961_s22, 3 }
  0x48   : > { %s13795_s6 = sld [smem:[#allocation8_spill]] }
  0x49   : > { %s13796_s3 = sld [smem:[#allocation4_spill]]  ;;  %p1086_p2 = pnand %p8783_p0, %p1085_p1 }
  0x4b   : > { %1089 = sbr.rel (%p1086_p2) target bundleno = 6567 (0x19a7), region = 176 }
  0x50   : > { %p1184_p3 = scmp.lt.s32.totalorder %s8779_s23, 1  ;;  %s13797_s5 = sld [smem:[#allocation2_spill]]  ;;  %v13637_v2 = vmov 0.0   ;;  %v11009_v3 = vmov 0   ;;  %v1377_v4 = vld [vmem:[%s11036_s17] sm:$0xff]  ;;  %v1218_v5 = vlaneseq  ;;  %vm1383_vm8 = vcmask 588800  }
  0x51   : > { %s13671_s28 = smov 112   ;;  %s13657_s1 = smov 111   ;;  %1451 = vmatprep.mubr.f32.mxu0 %v13637_v2  ;;  %1598 = vmatprep.mubr.f32.mxu1 %v13637_v2  ;;  %v8794_v10 = vld [vmem:[%s11181_s27 + $0x10] sm:$0x3]  ;;  %v8793_v13 = vld [vmem:[%s11181_s27 + $0xe] sm:$0x3] }
  0x52   : > { %s13982_s23 = smov (!%p1184_p3, %s8779_s23), 1  ;;  %s13669_s2 = smov 113   ;;  %10884 = vset.pattern.permute.xlu0 %v11009_v3  ;;  %10890 = vset.pattern.permute.xlu1 %v11009_v3  ;;  %v1225_v6 = vshrl.u32 %v1218_v5, 7  ;;  %v11269_v7 = vand.u32 127, %v1218_v5  ;;  %v8792_v14 = vld [vmem:[%s11181_s27 + $0xc] sm:$0x3] }
  0x53   : > { %s9096_s0 = sshll.u32 %s13982_s23, 4  ;;  %s13659_s7 = smov 127   ;;  %v8791_v29 = vld [vmem:[%s11181_s27 + $0xa] sm:$0x3]  ;;  %v8790_v40 = vld [vmem:[%s11181_s27 + $0x6] sm:$0x3] }
  0x54   : > { %s13667_s10 = smov 1   ;;  %s13665_s11 = smov 15   ;;  %13798 = vst [vmem:[#allocation30_spill] sm:$0xff] %v11269_v7  ;;  %v11271_v8 = vsub.s32 1, %v1225_v6  ;;  %v11273_v9 = vsub.s32 0, %v1225_v6  ;;  %vm1340_vm0 = vcmp.lt.s32.totalorder %v11269_v7, 112 }
  0x55   : > { %s13663_s15 = smov 16   ;;  %s13661_s16 = smov 17   ;;  %vm1360_vm1 = vcmp.lt.s32.totalorder %v11269_v7, 111  ;;  %vm1320_vm2 = vcmp.lt.s32.totalorder %v11269_v7, 113  ;;  %vm1300_vm3 = vcmp.lt.s32.totalorder %v11269_v7, 127  ;;  %vm1280_vm4 = vcmp.lt.s32.totalorder %v11269_v7, 1 }
  0x56   : > { %s1188_s26 = scalar_lea.vmem %s13797_s5, %s9096_s0  ;;  %v11281_v15 = vrot.slane %v8794_v10, %v11271_v8  ;;  %v11284_v16 = vrot.slane %v8794_v10, %v11273_v9  ;;  %v11288_v19 = vrot.slane %v8793_v13, %v11271_v8  ;;  %v11291_v20 = vrot.slane %v8792_v14, %v11271_v8  ;;  %v8789_v49 = vld [vmem:[%s11181_s27 + $0x4] sm:$0x3]  ;;  %v8788_v58 = vld [vmem:[%s11181_s27 + $0x2] sm:$0x3]  ;;  %s13842_s18 = sld [smem:[#allocation28_spill]] }
  0x57   : > { %v11230_v0 = vld [vmem:[%s1188_s26] sm:$0xff]  ;;  %v11236_v1 = vld [vmem:[%s1188_s26 + $0x8] sm:$0xff]  ;;  %v11300_v24 = vrot.slane %v8793_v13, %v11273_v9  ;;  %v11307_v28 = vrot.slane %v8792_v14, %v11273_v9  ;;  %v11320_v38 = vrot.slane %v8791_v29, %v11271_v8  ;;  %v11323_v39 = vrot.slane %v8791_v29, %v11273_v9  ;;  %s13843_s0 = sld [smem:[#allocation6_spill]]  ;;  %s13861_s5 = smov 16  }
  0x58   : > { %1336 = vrot.lane.b32.xlu1 %v11230_v0, %s13671_s28  ;;  %1356 = vrot.lane.b32.xlu0 %v11230_v0, %s13657_s1  ;;  %13799 = vst [vmem:[#allocation31_spill] sm:$0xff] %v11281_v15  ;;  %13800 = vst [vmem:[#allocation32_spill] sm:$0xff] %v11284_v16  ;;  %v11334_v47 = vrot.slane %v8790_v40, %v11271_v8  ;;  %v11337_v48 = vrot.slane %v8790_v40, %v11273_v9  ;;  %vm1260_vm5 = vcmp.lt.s32.totalorder %v11269_v7, 15  ;;  %vm11012_vm9 = vmmov 0   ;;  %s13844_s26 = sld [smem:[#allocation7_spill]] }
  0x59   : > { %13801 = vst [vmem:[#allocation33_spill] sm:$0xff] %v11288_v19  ;;  %13802 = vst [vmem:[#allocation34_spill] sm:$0xff] %v11291_v20  ;;  %v11348_v55 = vrot.slane %v8789_v49, %v11273_v9  ;;  %v11351_v56 = vrot.slane %v8789_v49, %v11271_v8  ;;  %vm1240_vm6 = vcmp.lt.s32.totalorder %v11269_v7, 16  ;;  %v11364_v3 = vrot.slane %v8788_v58, %v11273_v9 }
  0x5a   : > { %13803 = vst [vmem:[#allocation35_spill] sm:$0xff] %v11300_v24  ;;  %13804 = vst [vmem:[#allocation36_spill] sm:$0xff] %v11307_v28  ;;  %vm1220_vm7 = vcmp.lt.s32.totalorder %v11269_v7, 17  ;;  %vm1733_vm10 = vcmask 523264   ;;  %v11848_v7 = vld [vmem:[%s13794_s4 + $0x220] sm:$0xff]  ;;  %vm3079_vm11 = vcmask 130048  }
  0x5b   : > { %13805 = vst [vmem:[#allocation37_spill] sm:$0xff] %v11320_v38  ;;  %13806 = vst [vmem:[#allocation38_spill] sm:$0xff] %v11323_v39  ;;  %vm4908_vm12 = vcmask 261120   ;;  %vm8589_vm13 = vcmask 64512  }
  0x5c   : > { %1338 = vrot.lane.b32.xlu1 %v11236_v1, %s13671_s28  ;;  %1358 = vrot.lane.b32.xlu0 %v11236_v1, %s13657_s1  ;;  %13807 = vst [vmem:[#allocation39_spill] sm:$0xff] %v11334_v47  ;;  %13808 = vst [vmem:[#allocation40_spill] sm:$0xff] %v11337_v48 }
  0x5d   : > { %13809 = vst [vmem:[#allocation41_spill] sm:$0xff] %v11348_v55  ;;  %13810 = vst [vmem:[#allocation42_spill] sm:$0xff] %v11351_v56 }
  0x5e   : > { %13811 = vst [vmem:[#allocation43_spill] sm:$0xff] %v11364_v3  ;;  %13825 = vst [vmem:[#allocation57_spill] sm:$0xff] %v11848_v7 }
  0x60   : > { %1318 = vrot.lane.b32.xlu1 %v11236_v1, %s13669_s2  ;;  %1316 = vrot.lane.b32.xlu0 %v11230_v0, %s13669_s2 }
  0x64   : > { %1298 = vrot.lane.b32.xlu1 %v11236_v1, %s13659_s7  ;;  %1296 = vrot.lane.b32.xlu0 %v11230_v0, %s13659_s7 }
  0x68   : > { %1278 = vrot.lane.b32.xlu1 %v11236_v1, %s13667_s10  ;;  %1276 = vrot.lane.b32.xlu0 %v11230_v0, %s13667_s10 }
  0x6c   : > { %1258 = vrot.lane.b32.xlu1 %v11236_v1, %s13665_s11  ;;  %1256 = vrot.lane.b32.xlu0 %v11230_v0, %s13665_s11 }
  0x70   : > { %1238 = vrot.lane.b32.xlu1 %v11236_v1, %s13663_s15  ;;  %1236 = vrot.lane.b32.xlu0 %v11230_v0, %s13663_s15 }
  0x74   : > { %1216 = vrot.lane.b32.xlu1 %v11236_v1, %s13661_s16  ;;  %1214 = vrot.lane.b32.xlu0 %v11230_v0, %s13661_s16 }
  0x78   : > { %1380 = vperm.xlu0 %10884, %v1377_v4   ;;  %v1197_v4 = vld [vmem:[%s11181_s27] sm:$0x3] }
  0x79   : > { %v11378_v14 = vrot.slane %v1197_v4, %v11273_v9 }
  0x7b   : > { %13813 = vst [vmem:[#allocation45_spill] sm:$0xff] %v11378_v14 }
  0xca   : > { %v1337_v11 = vpop.permute.xlu1 %1336  ;;  %v1357_v12 = vpop.permute.xlu0 %1356 }
  0xce   : > { %v1339_v17 = vpop.permute.xlu1 %1338  ;;  %v1359_v18 = vpop.permute.xlu0 %1358 }
  0xcf   : > { %v1342_v21 = vsel %vm1340_vm0, %v1339_v17, %v1337_v11  ;;  %v1362_v22 = vsel %vm1360_vm1, %v1359_v18, %v1357_v12  ;;  %v1361_v23 = vsel %vm1360_vm1, %v1357_v12, %v1359_v18  ;;  %v1341_v25 = vsel %vm1340_vm0, %v1337_v11, %v1339_v17 }
  0xd0   : > { %v1375_v26 = vmul.f32 %v11281_v15, %v1362_v22  ;;  %v1374_v27 = vmul.f32 %v11284_v16, %v1361_v23  ;;  %v1355_v32 = vmul.f32 %v11288_v19, %v1342_v21  ;;  %v1354_v35 = vmul.f32 %v11300_v24, %v1341_v25 }
  0xd1   : > { %v11381_v17 = vrot.slane %v1197_v4, %v11271_v8 }
  0xd2   : > { %v1319_v30 = vpop.permute.xlu1 %1318  ;;  %1401 = vmatprep.subr.mxu0 %v1375_v26  ;;  %v1317_v31 = vpop.permute.xlu0 %1316 }
  0xd3   : > { %v1321_v33 = vsel %vm1320_vm2, %v1317_v31, %v1319_v30  ;;  %v1322_v34 = vsel %vm1320_vm2, %v1319_v30, %v1317_v31  ;;  %1402 = vmatpush1.msra.mxu0 %v1374_v27  ;;  %13814 = vst [vmem:[#allocation46_spill] sm:$0xff] %v11381_v17  ;;  %v1376_v27 = vld [vmem:[%s11031_s13] sm:$0xff] }
  0xd4   : > { %1403 = vmatprep.subr.mxu0 %v1355_v32  ;;  %v1335_v36 = vmul.f32 %v11291_v20, %v1322_v34  ;;  %v1334_v37 = vmul.f32 %v11307_v28, %v1321_v33  ;;  %v1525_v34 = vld [vmem:[%s11046_s25] sm:$0xff] }
  0xd5   : > { %1404 = vmatpush1.msra.mxu0 %v1354_v35 }
  0xd6   : > { %v1299_v41 = vpop.permute.xlu1 %1298  ;;  %1405 = vmatprep.subr.mxu0 %v1335_v36  ;;  %v1297_v42 = vpop.permute.xlu0 %1296 }
  0xd7   : > { %v1301_v43 = vsel %vm1300_vm3, %v1297_v42, %v1299_v41  ;;  %v1302_v44 = vsel %vm1300_vm3, %v1299_v41, %v1297_v42  ;;  %1406 = vmatpush1.msra.mxu0 %v1334_v37 }
  0xd8   : > { %v1315_v45 = vmul.f32 %v11320_v38, %v1302_v44  ;;  %v1314_v46 = vmul.f32 %v11323_v39, %v1301_v43 }
  0xda   : > { %v1279_v50 = vpop.permute.xlu1 %1278  ;;  %1407 = vmatprep.subr.mxu0 %v1315_v45  ;;  %v1277_v51 = vpop.permute.xlu0 %1276 }
  0xdb   : > { %v1281_v52 = vsel %vm1280_vm4, %v1277_v51, %v1279_v50  ;;  %v1282_v53 = vsel %vm1280_vm4, %v1279_v50, %v1277_v51  ;;  %1408 = vmatpush1.msra.mxu0 %v1314_v46 }
  0xdc   : > { %1409 = vmatprep.subr.mxu0 %v11236_v1  ;;  %v1295_v54 = vmul.f32 %v11334_v47, %v1281_v52  ;;  %v1294_v57 = vmul.f32 %v11337_v48, %v1282_v53 }
  0xdd   : > { %1410 = vmatpush1.msra.mxu0 %v11230_v0  ;;  %v11367_v0 = vrot.slane %v8788_v58, %v11271_v8 }
  0xde   : > { %v1259_v59 = vpop.permute.xlu1 %1258  ;;  %1411 = vmatprep.subr.mxu0 %v1295_v54  ;;  %v1257_v60 = vpop.permute.xlu0 %1256 }
  0xdf   : > { %v1261_v61 = vsel %vm1260_vm5, %v1257_v60, %v1259_v59  ;;  %v1262_v62 = vsel %vm1260_vm5, %v1259_v59, %v1257_v60  ;;  %1412 = vmatpush1.msra.mxu0 %v1294_v57  ;;  %13812 = vst [vmem:[#allocation44_spill] sm:$0xff] %v11367_v0 }
  0xe0   : > { %v1274_v63 = vmul.f32 %v11348_v55, %v1262_v62  ;;  %v1275_v1 = vmul.f32 %v11351_v56, %v1261_v61 }
  0xe2   : > { %v1239_v5 = vpop.permute.xlu1 %1238  ;;  %1413 = vmatprep.subr.mxu0 %v1275_v1  ;;  %v1237_v6 = vpop.permute.xlu0 %1236 }
  0xe3   : > { %v1241_v10 = vsel %vm1240_vm6, %v1237_v6, %v1239_v5  ;;  %v1242_v11 = vsel %vm1240_vm6, %v1239_v5, %v1237_v6  ;;  %1414 = vmatpush1.msra.mxu0 %v1274_v63 }
  0xe4   : > { %v1254_v12 = vmul.f32 %v11364_v3, %v1242_v11  ;;  %v1255_v13 = vmul.f32 %v11367_v0, %v1241_v10 }
  0xe6   : > { %v1217_v18 = vpop.permute.xlu1 %1216  ;;  %1415 = vmatprep.subr.mxu0 %v1255_v13  ;;  %v1215_v21 = vpop.permute.xlu0 %1214 }
  0xe7   : > { %v1221_v22 = vsel %vm1220_vm7, %v1215_v21, %v1217_v18  ;;  %v1222_v23 = vsel %vm1220_vm7, %v1217_v18, %v1215_v21  ;;  %1416 = vmatpush1.msra.mxu0 %v1254_v12 }
  0xe8   : > { %v1234_v25 = vmul.f32 %v11378_v14, %v1222_v23  ;;  %v1235_v26 = vmul.f32 %v11381_v17, %v1221_v22 }
  0xea   : > { %1417 = vmatprep.subr.mxu0 %v1235_v26 }
  0xeb   : > { %1418 = vmatpush1.msra.mxu0 %v1234_v25 }
  0xec   : > { %8795 = vmatmul.mubr.msk.f32.vlgmr.msra.gmra.mxu0 %vm1383_vm8, %v1376_v27 }
  0xf3   : > { %v1381_v8 = vpop.permute.xlu0 %1380 }
 0x1ac   : > { %v1453_v9 = vpop.f32.mrf.mxu0 }
 0x1ad   : > { %v1454_v29 = vadd.f32 %v1453_v9, %v1381_v8 }
 0x1ae   : > { %v1455_v30 = vpop.f32.mrf.mxu0 }
 0x1af   : > { %v1458_v31 = vmax.f32 %v1454_v29, 0.0  ;;  %v1456_v32 = vadd.f32 %v1455_v30, %v1381_v8 }
 0x1b1   : > { %1508 = vrot.lane.b32.xlu0 %v1458_v31, %s13671_s28  ;;  %1516 = vrot.lane.b32.xlu1 %v1458_v31, %s13657_s1  ;;  %v1459_v33 = vmax.f32 %v1456_v32, 0.0 }
 0x1b5   : > { %1500 = vrot.lane.b32.xlu0 %v1458_v31, %s13669_s2  ;;  %1518 = vrot.lane.b32.xlu1 %v1459_v33, %s13657_s1  ;;  %s13845_s1 = sld [smem:[#allocation3_spill]] }
 0x1b9   : > { %1492 = vrot.lane.b32.xlu0 %v1458_v31, %s13659_s7  ;;  %1510 = vrot.lane.b32.xlu1 %v1459_v33, %s13671_s28 }
 0x1bd   : > { %1484 = vrot.lane.b32.xlu0 %v1458_v31, %s13667_s10  ;;  %1502 = vrot.lane.b32.xlu1 %v1459_v33, %s13669_s2  ;;  %s13852_s2 = sld [smem:[#allocation16_spill]] }
 0x1c1   : > { %1476 = vrot.lane.b32.xlu0 %v1458_v31, %s13665_s11  ;;  %1494 = vrot.lane.b32.xlu1 %v1459_v33, %s13659_s7 }
 0x1c5   : > { %1468 = vrot.lane.b32.xlu0 %v1458_v31, %s13663_s15  ;;  %1486 = vrot.lane.b32.xlu1 %v1459_v33, %s13667_s10  ;;  %s13851_s10 = sld [smem:[#allocation14_spill]] }
 0x1c9   : > { %1460 = vrot.lane.b32.xlu0 %v1458_v31, %s13661_s16  ;;  %1478 = vrot.lane.b32.xlu1 %v1459_v33, %s13665_s11  ;;  %s13850_s11 = sld [smem:[#allocation13_spill]] }
 0x1cd   : > { %1528 = vperm.xlu0 %10884, %v1525_v34   ;;  %1470 = vrot.lane.b32.xlu1 %v1459_v33, %s13663_s15  ;;  %s1191_s15 = scalar_lea.vmem %s13845_s1, %s13982_s23  ;;  %s13848_s1 = sld [smem:[#allocation11_spill]] }
 0x1d1   : > { %1462 = vrot.lane.b32.xlu1 %v1459_v33, %s13661_s16  ;;  %s13847_s16 = sld [smem:[#allocation10_spill]] }
 0x223   : > { %v1509_v35 = vpop.permute.xlu0 %1508  ;;  %v1517_v36 = vpop.permute.xlu1 %1516 }
 0x227   : > { %v1501_v37 = vpop.permute.xlu0 %1500  ;;  %v1519_v40 = vpop.permute.xlu1 %1518 }
 0x228   : > { %v1520_v41 = vsel %vm1360_vm1, %v1517_v36, %v1519_v40  ;;  %v1521_v42 = vsel %vm1360_vm1, %v1519_v40, %v1517_v36 }
 0x229   : > { %v1523_v43 = vmul.f32 %v1521_v42, %v11281_v15  ;;  %v1522_v44 = vmul.f32 %v1520_v41, %v11284_v16  ;;  %v11741_v16 = vld [vmem:[%s13794_s4 + $0x1d8] sm:$0xff]  ;;  %v11748_v15 = vld [vmem:[%s13794_s4 + $0xd0] sm:$0xff] }
 0x22b   : > { %v1493_v45 = vpop.permute.xlu0 %1492  ;;  %1548 = vmatprep.subr.mxu1 %v1523_v43  ;;  %v1511_v46 = vpop.permute.xlu1 %1510 }
 0x22c   : > { %v1512_v49 = vsel %vm1340_vm0, %v1509_v35, %v1511_v46  ;;  %v1513_v50 = vsel %vm1340_vm0, %v1511_v46, %v1509_v35  ;;  %1549 = vmatpush1.msra.mxu1 %v1522_v44 }
 0x22d   : > { %v1514_v51 = vmul.f32 %v1512_v49, %v11300_v24  ;;  %v1515_v52 = vmul.f32 %v1513_v50, %v11288_v19  ;;  %v2362_v49 = vld [vmem:[%s13796_s3] sm:$0xff]  ;;  %v11836_v24 = vld [vmem:[%s13794_s4 + $0x230] sm:$0xff]  ;;  %v11843_v19 = vld [vmem:[%s13794_s4 + $0x228] sm:$0xff] }
 0x22e   : > { %v3067_v50 = vld [vmem:[%s11066_s14] sm:$0xff]  ;;  %13823 = vst [vmem:[#allocation55_spill] sm:$0xff] %v11836_v24  ;;  %13824 = vst [vmem:[#allocation56_spill] sm:$0xff] %v11843_v19 }
 0x22f   : > { %1550 = vmatprep.subr.mxu1 %v1515_v52  ;;  %v1503_v53 = vpop.permute.xlu1 %1502  ;;  %v1485_v58 = vpop.permute.xlu0 %1484  ;;  %v4057_v52 = vld [vmem:[%s11076_s24 + $0x10] sm:$0xff] }
 0x230   : > { %v1504_v54 = vsel %vm1320_vm2, %v1501_v37, %v1503_v53  ;;  %v1505_v57 = vsel %vm1320_vm2, %v1503_v53, %v1501_v37  ;;  %1551 = vmatpush1.msra.mxu1 %v1514_v51  ;;  %v1524_v37 = vld [vmem:[%s11041_s21] sm:$0xff]  ;;  %v4887_v53 = vld [vmem:[%s13795_s6 + $0x18] sm:$0xff] }
 0x231   : > { %v1506_v59 = vmul.f32 %v1504_v54, %v11307_v28  ;;  %v1507_v60 = vmul.f32 %v1505_v57, %v11291_v20  ;;  %v4055_v51 = vld [vmem:[%s11076_s24] sm:$0xff]  ;;  %v1654_v54 = vld [vmem:[%s11196_s20 + $0xf8] sm:$0xff] }
 0x232   : > { %v1638_v57 = vld [vmem:[%s11196_s20 + $0x78] sm:$0xff]  ;;  %9098 = vmatprep.subr.mxu0 %v1654_v54  ;;  %v11824_v28 = vld [vmem:[%s13794_s4 + $0x180] sm:$0xff] }
 0x233   : > { %1552 = vmatprep.subr.mxu1 %v1507_v60  ;;  %v1495_v61 = vpop.permute.xlu1 %1494  ;;  %v1477_v5 = vpop.permute.xlu0 %1476  ;;  %v4885_v60 = vld [vmem:[%s13795_s6 + $0x8] sm:$0xff]  ;;  %9099 = vmatpush3.msra.mxu0 %v1638_v57  ;;  %v11540_v54 = vld [vmem:[%s13794_s4 + $0x18] sm:$0xff]  ;;  %v11545_v57 = vld [vmem:[%s13794_s4 + $0x10] sm:$0xff]  ;;  %13821 = vst [vmem:[#allocation53_spill] sm:$0xff] %v11824_v28 }
 0x234   : > { %v1496_v62 = vsel %vm1300_vm3, %v1493_v45, %v1495_v61  ;;  %v1497_v63 = vsel %vm1300_vm3, %v1495_v61, %v1493_v45  ;;  %1553 = vmatpush1.msra.mxu1 %v1506_v59  ;;  %v1637_v59 = vld [vmem:[%s11196_s20 + $0x70] sm:$0xff]  ;;  %v1652_v61 = vld [vmem:[%s11196_s20 + $0xe8] sm:$0xff]  ;;  %v11829_v20 = vld [vmem:[%s13794_s4 + $0x238] sm:$0xff] }
 0x235   : > { %v1498_v1 = vmul.f32 %v1496_v62, %v11323_v39  ;;  %v1499_v4 = vmul.f32 %v1497_v63, %v11320_v38  ;;  %v1636_v62 = vld [vmem:[%s11196_s20 + $0x68] sm:$0xff]  ;;  %v1651_v63 = vld [vmem:[%s11196_s20 + $0xe0] sm:$0xff]  ;;  %v11809_v39 = vld [vmem:[%s13794_s4 + $0x198] sm:$0xff]  ;;  %13822 = vst [vmem:[#allocation54_spill] sm:$0xff] %v11829_v20 }
 0x236   : > { %v11819_v38 = vld [vmem:[%s13794_s4 + $0x188] sm:$0xff] }
 0x237   : > { %1554 = vmatprep.subr.mxu1 %v1499_v4  ;;  %v1487_v6 = vpop.permute.xlu1 %1486  ;;  %v1469_v23 = vpop.permute.xlu0 %1468  ;;  %v1650_v4 = vld [vmem:[%s11196_s20 + $0xd8] sm:$0xff]  ;;  %13820 = vst [vmem:[#allocation52_spill] sm:$0xff] %v11819_v38 }
 0x238   : > { %v1488_v10 = vsel %vm1280_vm4, %v1485_v58, %v1487_v6  ;;  %v1489_v11 = vsel %vm1280_vm4, %v1487_v6, %v1485_v58  ;;  %1555 = vmatpush1.msra.mxu1 %v1498_v1  ;;  %v1653_v58 = vld [vmem:[%s11196_s20 + $0xf0] sm:$0xff]  ;;  %v1635_v1 = vld [vmem:[%s11196_s20 + $0x60] sm:$0xff] }
 0x239   : > { %v1490_v12 = vmul.f32 %v1489_v11, %v11337_v48  ;;  %v1491_v13 = vmul.f32 %v1488_v10, %v11334_v47  ;;  %1556 = vmatprep.subr.mxu1 %v1459_v33  ;;  %9100 = vmatprep.subr.mxu0 %v1653_v58  ;;  %v1649_v6 = vld [vmem:[%s11196_s20 + $0xd0] sm:$0xff]  ;;  %v1648_v11 = vld [vmem:[%s11196_s20 + $0xc8] sm:$0xff] }
 0x23a   : > { %1557 = vmatpush1.msra.mxu1 %v1458_v31  ;;  %9101 = vmatpush3.msra.mxu0 %v1637_v59  ;;  %v1633_v10 = vld [vmem:[%s11196_s20 + $0x50] sm:$0xff]  ;;  %v11797_v47 = vld [vmem:[%s13794_s4 + $0x1a8] sm:$0xff] }
 0x23b   : > { %1558 = vmatprep.subr.mxu1 %v1491_v13  ;;  %v1479_v18 = vpop.permute.xlu1 %1478  ;;  %v1461_v31 = vpop.permute.xlu0 %1460  ;;  %9102 = vmatprep.subr.mxu0 %v1652_v61  ;;  %v1647_v13 = vld [vmem:[%s11196_s20 + $0xc0] sm:$0xff]  ;;  %v11790_v48 = vld [vmem:[%s13794_s4 + $0x1b0] sm:$0xff] }
 0x23c   : > { %v1480_v21 = vsel %vm1260_vm5, %v1477_v5, %v1479_v18  ;;  %v1481_v22 = vsel %vm1260_vm5, %v1479_v18, %v1477_v5  ;;  %1559 = vmatpush1.msra.mxu1 %v1490_v12  ;;  %9103 = vmatpush3.msra.mxu0 %v1636_v62  ;;  %v1634_v5 = vld [vmem:[%s11196_s20 + $0x58] sm:$0xff]  ;;  %v1632_v12 = vld [vmem:[%s11196_s20 + $0x48] sm:$0xff]  ;;  %v1631_v18 = vld [vmem:[%s11196_s20 + $0x40] sm:$0xff] }
 0x23d   : > { %v1482_v25 = vmul.f32 %v1481_v22, %v11348_v55  ;;  %v1483_v26 = vmul.f32 %v1480_v21, %v11351_v56  ;;  %9104 = vmatprep.subr.mxu0 %v1651_v63  ;;  %v1646_v21 = vld [vmem:[%s11196_s20 + $0xb8] sm:$0xff]  ;;  %v11773_v55 = vld [vmem:[%s13794_s4 + $0x1c0] sm:$0xff] }
 0x23e   : > { %9105 = vmatpush3.msra.mxu0 %v1635_v1  ;;  %v1630_v22 = vld [vmem:[%s11196_s20 + $0x38] sm:$0xff] }
 0x23f   : > { %1560 = vmatprep.subr.mxu1 %v1483_v26  ;;  %v1471_v27 = vpop.permute.xlu1 %1470  ;;  %9106 = vmatprep.subr.mxu0 %v1650_v4  ;;  %v1644_v26 = vld [vmem:[%s11196_s20 + $0xa8] sm:$0xff]  ;;  %v11554_v4 = vld [vmem:[%s13794_s4 + $0xb8] sm:$0xff] }
 0x240   : > { %v1472_v8 = vsel %vm1240_vm6, %v1469_v23, %v1471_v27  ;;  %v1473_v9 = vsel %vm1240_vm6, %v1471_v27, %v1469_v23  ;;  %1561 = vmatpush1.msra.mxu1 %v1482_v25  ;;  %9107 = vmatpush3.msra.mxu0 %v1634_v5  ;;  %v1645_v23 = vld [vmem:[%s11196_s20 + $0xb0] sm:$0xff]  ;;  %v1628_v27 = vld [vmem:[%s11196_s20 + $0x28] sm:$0xff]  ;;  %v11781_v56 = vld [vmem:[%s13794_s4 + $0x1b8] sm:$0xff] }
 0x241   : > { %v1474_v29 = vmul.f32 %v1473_v9, %v11364_v3  ;;  %v1475_v30 = vmul.f32 %v1472_v8, %v11367_v0  ;;  %9108 = vmatprep.subr.mxu0 %v1649_v6  ;;  %v1629_v25 = vld [vmem:[%s11196_s20 + $0x30] sm:$0xff]  ;;  %v1643_v8 = vld [vmem:[%s11196_s20 + $0xa0] sm:$0xff]  ;;  %v11562_v6 = vld [vmem:[%s13794_s4 + $0xa8] sm:$0xff] }
 0x242   : > { %9109 = vmatpush3.msra.mxu0 %v1633_v10  ;;  %v1627_v9 = vld [vmem:[%s11196_s20 + $0x20] sm:$0xff]  ;;  %v11557_v5 = vld [vmem:[%s13794_s4 + $0xb0] sm:$0xff]  ;;  %v11761_v3 = vld [vmem:[%s13794_s4 + $0x1c8] sm:$0xff] }
 0x243   : > { %1562 = vmatprep.subr.mxu1 %v1475_v30  ;;  %v1463_v32 = vpop.permute.xlu1 %1462  ;;  %9110 = vmatprep.subr.mxu0 %v1648_v11  ;;  %v1626_v30 = vld [vmem:[%s11196_s20 + $0x18] sm:$0xff]  ;;  %v11567_v10 = vld [vmem:[%s13794_s4 + $0xa0] sm:$0xff] }
 0x244   : > { %v1464_v33 = vsel %vm1220_vm7, %v1461_v31, %v1463_v32  ;;  %v1465_v34 = vsel %vm1220_vm7, %v1463_v32, %v1461_v31  ;;  %1563 = vmatpush1.msra.mxu1 %v1474_v29  ;;  %9111 = vmatpush3.msra.mxu0 %v1632_v12  ;;  %v1642_v29 = vld [vmem:[%s11196_s20 + $0x98] sm:$0xff]  ;;  %v1641_v31 = vld [vmem:[%s11196_s20 + $0x90] sm:$0xff]  ;;  %v11768_v0 = vld [vmem:[%s13794_s4 + $0xc0] sm:$0xff] }
 0x245   : > { %v1466_v35 = vmul.f32 %v1465_v34, %v11378_v14  ;;  %v1467_v36 = vmul.f32 %v1464_v33, %v11381_v17  ;;  %9112 = vmatprep.subr.mxu0 %v1647_v13  ;;  %v1625_v32 = vld [vmem:[%s11196_s20 + $0x10] sm:$0xff]  ;;  %v1640_v33 = vld [vmem:[%s11196_s20 + $0x88] sm:$0xff]  ;;  %v11572_v11 = vld [vmem:[%s13794_s4 + $0x98] sm:$0xff] }
 0x246   : > { %9113 = vmatpush3.msra.mxu0 %v1631_v18  ;;  %v1624_v34 = vld [vmem:[%s11196_s20 + $0x8] sm:$0xff]  ;;  %v11577_v12 = vld [vmem:[%s13794_s4 + $0x90] sm:$0xff] }
 0x247   : > { %1564 = vmatprep.subr.mxu1 %v1467_v36  ;;  %9114 = vmatprep.subr.mxu0 %v1646_v21  ;;  %v1623_v36 = vld [vmem:[%s11196_s20] sm:$0xff]  ;;  %v11584_v13 = vld [vmem:[%s13794_s4 + $0x8] sm:$0xff]  ;;  %v11751_v14 = vld [vmem:[%s13794_s4 + $0x1d0] sm:$0xff] }
 0x248   : > { %1565 = vmatpush1.msra.mxu1 %v1466_v35  ;;  %v1529_v40 = vpop.permute.xlu0 %1528  ;;  %9115 = vmatpush3.msra.mxu0 %v1630_v22  ;;  %v1639_v35 = vld [vmem:[%s11196_s20 + $0x80] sm:$0xff]  ;;  %v11587_v18 = vld [vmem:[%s13794_s4 + $0x88] sm:$0xff] }
 0x249   : > { %8796 = vmatmul.mubr.msk.f32.vlgmr.msra.gmra.mxu1 %vm1383_vm8, %v1524_v37  ;;  %9774 = vmatprep.subr.mxu1 %v13637_v2  ;;  %v11507_v37 = vld [vmem:[%s13794_s4 + $0x38] sm:$0xff]  ;;  %v11594_v21 = vld [vmem:[%s13794_s4] sm:$0xff]  ;;  %v11758_v17 = vld [vmem:[%s13794_s4 + $0xc8] sm:$0xff] }
 0x24a   : > { %9116 = vmatprep.subr.mxu0 %v1645_v23  ;;  %9775 = vmatpush3.msra.mxu1 %v11507_v37  ;;  %v11597_v22 = vld [vmem:[%s13794_s4 + $0x80] sm:$0xff] }
 0x24b   : > { %9117 = vmatpush3.msra.mxu0 %v1629_v25  ;;  %9776 = vmatprep.subr.mxu1 %v13637_v2 }
 0x24c   : > { %9118 = vmatprep.subr.mxu0 %v1644_v26  ;;  %9790 = vmatprep.mubr.msk.f32.mxu1 %vm11012_vm9, %v13637_v2 }
 0x24d   : > { %9119 = vmatpush3.msra.mxu0 %v1628_v27  ;;  %v11610_v27 = vld [vmem:[%s13794_s4 + $0x78] sm:$0xff] }
 0x24e   : > { %9120 = vmatprep.subr.mxu0 %v1643_v8  ;;  %v11613_v8 = vld [vmem:[%s13794_s4 + $0x178] sm:$0xff] }
 0x24f   : > { %9121 = vmatpush3.msra.mxu0 %v1627_v9  ;;  %v11620_v9 = vld [vmem:[%s13794_s4 + $0x70] sm:$0xff] }
 0x250   : > { %9122 = vmatprep.subr.mxu0 %v1642_v29  ;;  %v11623_v29 = vld [vmem:[%s13794_s4 + $0x170] sm:$0xff] }
 0x251   : > { %9123 = vmatpush3.msra.mxu0 %v1626_v30  ;;  %v11630_v30 = vld [vmem:[%s13794_s4 + $0x68] sm:$0xff] }
 0x252   : > { %9124 = vmatprep.subr.mxu0 %v1641_v31  ;;  %v11633_v31 = vld [vmem:[%s13794_s4 + $0x168] sm:$0xff] }
 0x253   : > { %9125 = vmatpush3.msra.mxu0 %v1625_v32  ;;  %v11640_v32 = vld [vmem:[%s13794_s4 + $0x60] sm:$0xff] }
 0x254   : > { %9126 = vmatprep.subr.mxu0 %v1640_v33  ;;  %v11643_v33 = vld [vmem:[%s13794_s4 + $0x160] sm:$0xff] }
 0x255   : > { %9127 = vmatpush3.msra.mxu0 %v1624_v34  ;;  %v11650_v34 = vld [vmem:[%s13794_s4 + $0x58] sm:$0xff] }
 0x256   : > { %9128 = vmatprep.subr.mxu0 %v1639_v35  ;;  %v11653_v35 = vld [vmem:[%s13794_s4 + $0x158] sm:$0xff] }
 0x257   : > { %9129 = vmatpush3.msra.mxu0 %v1623_v36  ;;  %v11660_v36 = vld [vmem:[%s13794_s4 + $0x50] sm:$0xff] }
 0x258   : > { %9812 = vmatprep.subr.mxu0 %v13637_v2 }
 0x309   : > { %v1600_v41 = vpop.f32.mrf.mxu1 }
 0x30a   : > { %v1601_v42 = vadd.f32 %v1600_v41, %v1529_v40 }
 0x30b   : > { %v1602_v43 = vpop.f32.mrf.mxu1 }
 0x30c   : > { %v11459_v44 = vmax.f32 %v1601_v42, 0.0  ;;  %v1603_v45 = vadd.f32 %v1602_v43, %v1529_v40 }
 0x30e   : > { %13815 = vst [vmem:[#allocation47_spill] sm:$0xff] %v11459_v44  ;;  %v11461_v46 = vmax.f32 %v1603_v45, 0.0  ;;  %1607 = vrot.lane.b32.xlu1 %v11459_v44, %s13659_s7  ;;  %v11520_v45 = vld [vmem:[%s13794_s4 + $0x30] sm:$0xff] }
 0x30f   : > { %9777 = vmatpush3.msra.mxu1 %v11520_v45 }
 0x310   : > { %13816 = vst [vmem:[#allocation48_spill] sm:$0xff] %v11461_v46  ;;  %1609 = vrot.lane.b32.xlu0 %v11461_v46, %s13659_s7  ;;  %9778 = vmatprep.subr.mxu1 %v13637_v2  ;;  %s13846_s7 = sld [smem:[#allocation9_spill]] }
 0x314   : > { %2366 = vperm.xlu0 %10884, %v2362_v49  }
 0x318   : > { %3071 = vperm.xlu0 %10884, %v3067_v50  }
 0x31c   : > { %4061 = vperm.xlu0 %10884, %v4055_v51   ;;  %v11529_v51 = vld [vmem:[%s13794_s4 + $0x28] sm:$0xff] }
 0x31d   : > { %9779 = vmatpush3.msra.mxu1 %v11529_v51 }
 0x31e   : > { %9780 = vmatprep.subr.mxu1 %v13637_v2 }
 0x320   : > { %4071 = vperm.xlu0 %10884, %v4057_v52  }
 0x324   : > { %4905 = vperm.xlu0 %10884, %v4887_v53   ;;  %v11534_v53 = vld [vmem:[%s13794_s4 + $0x20] sm:$0xff] }
 0x325   : > { %9781 = vmatpush3.msra.mxu1 %v11534_v53 }
 0x326   : > { %9782 = vmatprep.subr.mxu1 %v13637_v2 }
 0x327   : > { %9783 = vmatpush3.msra.mxu1 %v11540_v54 }
 0x328   : > { %4895 = vperm.xlu0 %10884, %v4885_v60   ;;  %9784 = vmatprep.subr.mxu1 %v13637_v2 }
 0x329   : > { %9785 = vmatpush3.msra.mxu1 %v11545_v57 }
 0x32a   : > { %9786 = vmatprep.subr.mxu1 %v13637_v2 }
 0x32b   : > { %9787 = vmatpush3.msra.mxu1 %v11584_v13 }
 0x32c   : > { %9788 = vmatprep.subr.mxu1 %v13637_v2 }
 0x32d   : > { %9789 = vmatpush3.msra.mxu1 %v11594_v21 }
 0x32e   : > { %9793 = vmatprep.subr.mxu1 %v13637_v2 }
 0x380   : > { %v1608_v40 = vpop.permute.xlu1 %1607 }
 0x382   : > { %v1610_v41 = vpop.permute.xlu0 %1609 }
 0x383   : > { %v11512_v42 = vsel %vm1300_vm3, %v1608_v40, %v1610_v41  ;;  %v11516_v43 = vsel %vm1300_vm3, %v1610_v41, %v1608_v40  ;;  %v11663_v40 = vld [vmem:[%s13794_s4 + $0x150] sm:$0xff]  ;;  %v11670_v41 = vld [vmem:[%s13794_s4 + $0x48] sm:$0xff] }
 0x384   : > { %13817 = vst [vmem:[#allocation49_spill] sm:$0xff] %v11512_v42  ;;  %13818 = vst [vmem:[#allocation50_spill] sm:$0xff] %v11516_v43  ;;  %v1613_v49 = vmax.f32 %v11459_v44, %v11512_v42  ;;  %v1614_v50 = vmax.f32 %v11461_v46, %v11516_v43  ;;  %v11804_v42 = vld [vmem:[%s13794_s4 + $0x1a0] sm:$0xff]  ;;  %v11814_v43 = vld [vmem:[%s13794_s4 + $0x190] sm:$0xff] }
 0x385   : > { %13819 = vst [vmem:[#allocation51_spill] sm:$0xff] %v11814_v43  ;;  %v11853_v46 = vld [vmem:[%s13794_s4 + $0x218] sm:$0xff]  ;;  %v11858_v44 = vld [vmem:[%s13794_s4 + $0x210] sm:$0xff] }
 0x386   : > { %v10885_v52 = vpack.i.bf16 %v1614_v50, %v1613_v49  ;;  %13826 = vst [vmem:[#allocation58_spill] sm:$0xff] %v11853_v46  ;;  %13827 = vst [vmem:[#allocation59_spill] sm:$0xff] %v11858_v44 }
 0x388   : > { %10886 = vrot.lane.b32.xlu1 %v10885_v52, %s13671_s28  ;;  %v11685_v52 = vld [vmem:[%s13794_s4 + $0x140] sm:$0xff]  ;;  %s13853_s28 = sld [smem:[#allocation18_spill]] }
 0x3fa   : > { %v10887_v58 = vpop.permute.xlu1 %10886 }
 0x3fb   : > { %v10889_v59 = vunpack.i.h.bf16 %v10887_v58  ;;  %v10888_v60 = vunpack.i.l.bf16 %v10887_v58  ;;  %v11696_v58 = vld [vmem:[%s13794_s4 + $0xf8] sm:$0xff] }
 0x3fd   : > { %v1619_v61 = vsel %vm1340_vm0, %v10888_v60, %v10889_v59  ;;  %v1620_v62 = vsel %vm1340_vm0, %v10889_v59, %v10888_v60  ;;  %v11699_v59 = vld [vmem:[%s13794_s4 + $0x1f8] sm:$0xff]  ;;  %v11708_v60 = vld [vmem:[%s13794_s4 + $0xf0] sm:$0xff] }
 0x3fe   : > { %v1621_v63 = vmax.f32 %v1613_v49, %v1619_v61  ;;  %v1622_v1 = vmax.f32 %v1614_v50, %v1620_v62  ;;  %v11673_v49 = vld [vmem:[%s13794_s4 + $0x148] sm:$0xff]  ;;  %v11680_v50 = vld [vmem:[%s13794_s4 + $0x40] sm:$0xff]  ;;  %v11711_v61 = vld [vmem:[%s13794_s4 + $0x1f0] sm:$0xff] }
 0x3ff   : > { %v11718_v62 = vld [vmem:[%s13794_s4 + $0xe8] sm:$0xff] }
 0x400   : > { %1719 = vmatprep.mubr.f32.mxu0 %v1622_v1  ;;  %v11728_v1 = vld [vmem:[%s13794_s4 + $0xe0] sm:$0xff] }
 0x401   : > { %1720 = vmatmul.mubr.f32.vlgmr.msra.gmra.mxu0 %v1621_v63  ;;  %v11721_v63 = vld [vmem:[%s13794_s4 + $0x1e8] sm:$0xff] }
 0x402   : > { %9813 = vmatpush3.msra.mxu0 %v11554_v4  ;;  %9828 = vmatprep.mubr.msk.f32.mxu0 %vm11012_vm9, %v13637_v2 }
 0x403   : > { %9814 = vmatprep.subr.mxu0 %v13637_v2 }
 0x404   : > { %9815 = vmatpush3.msra.mxu0 %v11557_v5 }
 0x405   : > { %9816 = vmatprep.subr.mxu0 %v13637_v2 }
 0x406   : > { %9817 = vmatpush3.msra.mxu0 %v11562_v6 }
 0x407   : > { %9818 = vmatprep.subr.mxu0 %v13637_v2 }
 0x408   : > { %9819 = vmatpush3.msra.mxu0 %v11567_v10 }
 0x409   : > { %9820 = vmatprep.subr.mxu0 %v13637_v2 }
 0x40a   : > { %9821 = vmatpush3.msra.mxu0 %v11572_v11 }
 0x40b   : > { %9822 = vmatprep.subr.mxu0 %v13637_v2 }
 0x40c   : > { %9823 = vmatpush3.msra.mxu0 %v11577_v12 }
 0x40d   : > { %9824 = vmatprep.subr.mxu0 %v13637_v2 }
 0x40e   : > { %9825 = vmatpush3.msra.mxu0 %v11587_v18 }
 0x40f   : > { %9826 = vmatprep.subr.mxu0 %v13637_v2 }
 0x410   : > { %9827 = vmatpush3.msra.mxu0 %v11597_v22 }
 0x411   : > { %9850 = vmatprep.subr.mxu0 %v13637_v2 }
 0x4c1   : > { %v9130_v23 = vpop.f32.mrf.mxu0 }
 0x4c3   : > { %v9131_v25 = vpop.f32.mrf.mxu0 }
 0x4c4   : > { %v11607_v26 = vadd.f32 %v9131_v25, %v9130_v23  ;;  %v11731_v23 = vld [vmem:[%s13794_s4 + $0x1e0] sm:$0xff]  ;;  %v11738_v25 = vld [vmem:[%s13794_s4 + $0xd8] sm:$0xff] }
 0x4c6   : > { %9791 = vmatmul.mubr.msk.f32.vlgmr.msra.gmra.mxu1 %vm1733_vm10, %v11607_v26  ;;  %9829 = vmatmul.mubr.msk.f32.vlgmr.msra.gmra.mxu0 %vm1733_vm10, %v11607_v26 }
 0x4c7   : > { %9794 = vmatpush3.msra.mxu1 %v11610_v27  ;;  %9851 = vmatpush3.msra.mxu0 %v11613_v8 }
 0x4c8   : > { %9795 = vmatprep.subr.mxu1 %v13637_v2  ;;  %9852 = vmatprep.subr.mxu0 %v13637_v2 }
 0x4c9   : > { %9796 = vmatpush3.msra.mxu1 %v11620_v9  ;;  %9853 = vmatpush3.msra.mxu0 %v11623_v29 }
 0x4ca   : > { %9797 = vmatprep.subr.mxu1 %v13637_v2  ;;  %9854 = vmatprep.subr.mxu0 %v13637_v2 }
 0x4cb   : > { %9798 = vmatpush3.msra.mxu1 %v11630_v30  ;;  %9855 = vmatpush3.msra.mxu0 %v11633_v31 }
 0x4cc   : > { %9799 = vmatprep.subr.mxu1 %v13637_v2  ;;  %9856 = vmatprep.subr.mxu0 %v13637_v2 }
 0x4cd   : > { %9800 = vmatpush3.msra.mxu1 %v11640_v32  ;;  %9857 = vmatpush3.msra.mxu0 %v11643_v33 }
 0x4ce   : > { %9801 = vmatprep.subr.mxu1 %v13637_v2  ;;  %9858 = vmatprep.subr.mxu0 %v13637_v2 }
 0x4cf   : > { %9802 = vmatpush3.msra.mxu1 %v11650_v34  ;;  %9859 = vmatpush3.msra.mxu0 %v11653_v35 }
 0x4d0   : > { %9803 = vmatprep.subr.mxu1 %v13637_v2  ;;  %9860 = vmatprep.subr.mxu0 %v13637_v2 }
 0x4d1   : > { %9804 = vmatpush3.msra.mxu1 %v11660_v36  ;;  %9861 = vmatpush3.msra.mxu0 %v11663_v40 }
 0x4d2   : > { %9805 = vmatprep.subr.mxu1 %v13637_v2  ;;  %9862 = vmatprep.subr.mxu0 %v13637_v2 }
 0x4d3   : > { %9806 = vmatpush3.msra.mxu1 %v11670_v41  ;;  %9863 = vmatpush3.msra.mxu0 %v11673_v49 }
 0x4d4   : > { %9807 = vmatprep.subr.mxu1 %v13637_v2  ;;  %9864 = vmatprep.subr.mxu0 %v13637_v2 }
 0x4d5   : > { %9808 = vmatpush3.msra.mxu1 %v11680_v50  ;;  %9809 = vmatprep.mubr.msk.f32.mxu1 %vm11012_vm9, %v13637_v2 }
 0x4d6   : > { %9865 = vmatpush3.msra.mxu0 %v11685_v52  ;;  %9866 = vmatprep.mubr.msk.f32.mxu0 %vm11012_vm9, %v13637_v2 }
 0x4d7   : > { %9810 = vmatmul.mubr.msk.f32.vlgmr.msra.gmra.mxu1 %vm1733_vm10, %v11607_v26  ;;  %9831 = vmatprep.subr.mxu1 %v13637_v2 }
 0x4d8   : > { %9867 = vmatmul.mubr.msk.f32.vlgmr.msra.gmra.mxu0 %vm1733_vm10, %v11607_v26  ;;  %9888 = vmatprep.subr.mxu0 %v13637_v2 }
 0x4d9   : > { %9832 = vmatpush3.msra.mxu1 %v11696_v58  ;;  %9889 = vmatpush3.msra.mxu0 %v11699_v59 }
 0x4da   : > { %9833 = vmatprep.subr.mxu1 %v13637_v2  ;;  %9890 = vmatprep.subr.mxu0 %v13637_v2 }
 0x4db   : > { %9834 = vmatpush3.msra.mxu1 %v11708_v60  ;;  %9891 = vmatpush3.msra.mxu0 %v11711_v61 }
 0x4dc   : > { %9835 = vmatprep.subr.mxu1 %v13637_v2  ;;  %9892 = vmatprep.subr.mxu0 %v13637_v2 }
 0x4dd   : > { %9836 = vmatpush3.msra.mxu1 %v11718_v62  ;;  %9893 = vmatpush3.msra.mxu0 %v11721_v63 }
 0x4de   : > { %9837 = vmatprep.subr.mxu1 %v13637_v2  ;;  %9894 = vmatprep.subr.mxu0 %v13637_v2 }
 0x4df   : > { %9838 = vmatpush3.msra.mxu1 %v11728_v1  ;;  %9895 = vmatpush3.msra.mxu0 %v11731_v23 }
 0x4e0   : > { %9839 = vmatprep.subr.mxu1 %v13637_v2  ;;  %9896 = vmatprep.subr.mxu0 %v13637_v2 }
 0x4e1   : > { %9840 = vmatpush3.msra.mxu1 %v11738_v25  ;;  %9897 = vmatpush3.msra.mxu0 %v11741_v16 }
 0x4e2   : > { %9841 = vmatprep.subr.mxu1 %v13637_v2  ;;  %9898 = vmatprep.subr.mxu0 %v13637_v2 }
 0x4e3   : > { %9842 = vmatpush3.msra.mxu1 %v11748_v15  ;;  %9899 = vmatpush3.msra.mxu0 %v11751_v14 }
 0x4e4   : > { %9843 = vmatprep.subr.mxu1 %v13637_v2  ;;  %9900 = vmatprep.subr.mxu0 %v13637_v2 }
 0x4e5   : > { %9844 = vmatpush3.msra.mxu1 %v11758_v17  ;;  %9901 = vmatpush3.msra.mxu0 %v11761_v3 }
 0x4e6   : > { %9845 = vmatprep.subr.mxu1 %v13637_v2  ;;  %9902 = vmatprep.subr.mxu0 %v13637_v2 }
 0x4e7   : > { %9846 = vmatpush3.msra.mxu1 %v11768_v0  ;;  %9847 = vmatprep.mubr.msk.f32.mxu1 %vm11012_vm9, %v13637_v2 }
 0x4e8   : > { %9903 = vmatpush3.msra.mxu0 %v11773_v55  ;;  %9904 = vmatprep.mubr.msk.f32.mxu0 %vm11012_vm9, %v13637_v2 }
 0x4e9   : > { %9848 = vmatmul.mubr.msk.f32.vlgmr.msra.gmra.mxu1 %vm1733_vm10, %v11607_v26  ;;  %9869 = vmatprep.subr.mxu1 %v13637_v2 }
 0x4ea   : > { %9905 = vmatmul.mubr.msk.f32.vlgmr.msra.gmra.mxu0 %vm1733_vm10, %v11607_v26  ;;  %9870 = vmatpush3.msra.mxu1 %v11781_v56 }
 0x4eb   : > { %9871 = vmatprep.subr.mxu1 %v13637_v2  ;;  %9885 = vmatprep.mubr.msk.f32.mxu1 %vm11012_vm9, %v13637_v2 }
 0x4ec   : > { %9872 = vmatpush3.msra.mxu1 %v11790_v48 }
 0x4ed   : > { %9873 = vmatprep.subr.mxu1 %v13637_v2 }
 0x4ee   : > { %9874 = vmatpush3.msra.mxu1 %v11797_v47 }
 0x4ef   : > { %9875 = vmatprep.subr.mxu1 %v13637_v2 }
 0x4f0   : > { %9876 = vmatpush3.msra.mxu1 %v11804_v42 }
 0x4f1   : > { %9877 = vmatprep.subr.mxu1 %v13637_v2 }
 0x4f2   : > { %9878 = vmatpush3.msra.mxu1 %v11809_v39 }
 0x4f3   : > { %9879 = vmatprep.subr.mxu1 %v13637_v2 }
 0x4f4   : > { %9880 = vmatpush3.msra.mxu1 %v11814_v43 }
 0x4f5   : > { %9881 = vmatprep.subr.mxu1 %v13637_v2 }
 0x4f6   : > { %9882 = vmatpush3.msra.mxu1 %v11819_v38 }
 0x4f7   : > { %9883 = vmatprep.subr.mxu1 %v13637_v2 }
 0x4f8   : > { %9884 = vmatpush3.msra.mxu1 %v11824_v28 }
 0x4f9   : > { %9886 = vmatmul.mubr.msk.f32.vlgmr.msra.gmra.mxu1 %vm1733_vm10, %v11607_v26  ;;  %9907 = vmatprep.subr.mxu1 %v13637_v2 }
 0x4fa   : > { %9908 = vmatpush3.msra.mxu1 %v11829_v20  ;;  %9923 = vmatprep.mubr.msk.f32.mxu1 %vm11012_vm9, %v13637_v2 }
 0x4fb   : > { %9909 = vmatprep.subr.mxu1 %v13637_v2 }
 0x4fc   : > { %9910 = vmatpush3.msra.mxu1 %v11836_v24  ;;  %v11863_v24 = vld [vmem:[%s13794_s4 + $0x208] sm:$0xff] }
 0x4fd   : > { %9911 = vmatprep.subr.mxu1 %v13637_v2  ;;  %13828 = vst [vmem:[#allocation60_spill] sm:$0xff] %v11863_v24 }
 0x4fe   : > { %9912 = vmatpush3.msra.mxu1 %v11843_v19  ;;  %v11868_v19 = vld [vmem:[%s13794_s4 + $0x200] sm:$0xff] }
 0x4ff   : > { %9913 = vmatprep.subr.mxu1 %v13637_v2  ;;  %13829 = vst [vmem:[#allocation61_spill] sm:$0xff] %v11868_v19 }
 0x500   : > { %9914 = vmatpush3.msra.mxu1 %v11848_v7 }
 0x501   : > { %9915 = vmatprep.subr.mxu1 %v13637_v2 }
 0x502   : > { %9916 = vmatpush3.msra.mxu1 %v11853_v46 }
 0x503   : > { %9917 = vmatprep.subr.mxu1 %v13637_v2 }
 0x504   : > { %9918 = vmatpush3.msra.mxu1 %v11858_v44 }
 0x505   : > { %9919 = vmatprep.subr.mxu1 %v13637_v2 }
 0x506   : > { %9920 = vmatpush3.msra.mxu1 %v11863_v24 }
 0x507   : > { %9921 = vmatprep.subr.mxu1 %v13637_v2 }
 0x508   : > { %9922 = vmatpush3.msra.mxu1 %v11868_v19 }
 0x509   : > { %9924 = vmatmul.mubr.msk.f32.vlgmr.msra.gmra.mxu1 %vm1733_vm10, %v11607_v26  ;;  %9947 = vmatprep.subr.mxu1 %v11507_v37 }
 0x50a   : > { %9948 = vmatpush3.msra.mxu1 %v11507_v37  ;;  %v2360_v37 = vld [vmem:[%s11051_s29] sm:$0xff] }
 0x50b   : > { %9949 = vmatprep.subr.mxu1 %v11520_v45  ;;  %9944 = vmatprep.mubr.msk.f32.mxu0 %vm1383_vm8, %v2360_v37 }
 0x50c   : > { %9950 = vmatpush3.msra.mxu1 %v11520_v45  ;;  %v2363_v45 = vld [vmem:[%s13796_s3 + $0x8] sm:$0xff]  ;;  %s13858_s3 = smov 113  }
 0x50d   : > { %9951 = vmatprep.subr.mxu1 %v11529_v51  ;;  %2371 = vperm.xlu1 %10890, %v2363_v45  }
 0x50e   : > { %9952 = vmatpush3.msra.mxu1 %v11529_v51  ;;  %v3068_v51 = vld [vmem:[%s11066_s14 + $0x8] sm:$0xff] }
 0x50f   : > { %9953 = vmatprep.subr.mxu1 %v11534_v53 }
 0x510   : > { %9954 = vmatpush3.msra.mxu1 %v11534_v53  ;;  %v4056_v53 = vld [vmem:[%s11076_s24 + $0x8] sm:$0xff] }
 0x511   : > { %9955 = vmatprep.subr.mxu1 %v11540_v54  ;;  %3076 = vperm.xlu1 %10890, %v3068_v51  }
 0x512   : > { %9956 = vmatpush3.msra.mxu1 %v11540_v54  ;;  %v4058_v54 = vld [vmem:[%s11076_s24 + $0x18] sm:$0xff] }
 0x513   : > { %9957 = vmatprep.subr.mxu1 %v11545_v57 }
 0x514   : > { %9958 = vmatpush3.msra.mxu1 %v11545_v57  ;;  %v4886_v57 = vld [vmem:[%s13795_s6 + $0x10] sm:$0xff] }
 0x515   : > { %9959 = vmatprep.subr.mxu1 %v11584_v13  ;;  %4066 = vperm.xlu1 %10890, %v4056_v53  }
 0x516   : > { %9960 = vmatpush3.msra.mxu1 %v11584_v13  ;;  %v4884_v13 = vld [vmem:[%s13795_s6] sm:$0xff]  ;;  %s13862_s6 = smov 17  }
 0x517   : > { %9961 = vmatprep.subr.mxu1 %v11594_v21 }
 0x518   : > { %9962 = vmatpush3.msra.mxu1 %v11594_v21 }
 0x519   : > { %9966 = vmatprep.subr.mxu1 %v11610_v27  ;;  %4076 = vperm.xlu1 %10890, %v4058_v54  }
 0x51d   : > { %4900 = vperm.xlu1 %10890, %v4886_v57  }
 0x521   : > { %4890 = vperm.xlu1 %10890, %v4884_v13  }
 0x586   : > { %v1803_v2 = vpop.f32.mrf.mxu1  ;;  %v1961_v19 = vpop.f32.mrf.mxu0 }
 0x588   : > { %v9792_v21 = vpop.f32.mrf.mxu1  ;;  %v9830_v24 = vpop.f32.mrf.mxu0 }
 0x597   : > { %v1882_v44 = vpop.f32.mrf.mxu1 }
 0x598   : > { %v2119_v46 = vpop.f32.mrf.mxu0 }
 0x599   : > { %v9811_v7 = vpop.f32.mrf.mxu1 }
 0x59a   : > { %v9868_v37 = vpop.f32.mrf.mxu0  ;;  %v2361_v7 = vld [vmem:[%s11051_s29 + $0x8] sm:$0xff] }
 0x5a9   : > { %v2040_v20 = vpop.f32.mrf.mxu1 }
 0x5aa   : > { %v2277_v45 = vpop.f32.mrf.mxu0 }
 0x5ab   : > { %v9849_v28 = vpop.f32.mrf.mxu1 }
 0x5ac   : > { %v9906_v51 = vpop.f32.mrf.mxu0 }
 0x5ad   : > { %v3330_v51 = vld [vmem:[%s13792_s9 + $0x8] sm:$0xff] }
 0x5b9   : > { %v2198_v38 = vpop.f32.mrf.mxu1 }
 0x5bb   : > { %v9887_v53 = vpop.f32.mrf.mxu1 }
 0x5bc   : > { %v3329_v53 = vld [vmem:[%s13792_s9] sm:$0xff] }
 0x5c9   : > { %v2356_v43 = vpop.f32.mrf.mxu1 }
 0x5ca   : > { %9926 = vmatprep.subr.mxu0 %v2356_v43 }
 0x5cb   : > { %v9925_v54 = vpop.f32.mrf.mxu1  ;;  %9927 = vmatpush3.msra.mxu0 %v2356_v43  ;;  %v13838_v43 = vld [vmem:[#allocation58_spill] sm:$0xff] }
 0x5cc   : > { %9928 = vmatprep.subr.mxu0 %v2277_v45 }
 0x5cd   : > { %9929 = vmatpush3.msra.mxu0 %v2277_v45  ;;  %v3331_v45 = vld [vmem:[%s13792_s9 + $0x10] sm:$0xff] }
 0x5ce   : > { %9930 = vmatprep.subr.mxu0 %v2198_v38 }
 0x5cf   : > { %9931 = vmatpush3.msra.mxu0 %v2198_v38 }
 0x5d0   : > { %9932 = vmatprep.subr.mxu0 %v2119_v46 }
 0x5d1   : > { %9933 = vmatpush3.msra.mxu0 %v2119_v46 }
 0x5d2   : > { %9934 = vmatprep.subr.mxu0 %v11607_v26 }
 0x5d3   : > { %9935 = vmatpush3.msra.mxu0 %v11607_v26 }
 0x5d4   : > { %9936 = vmatprep.subr.mxu0 %v2040_v20 }
 0x5d5   : > { %9937 = vmatpush3.msra.mxu0 %v2040_v20  ;;  %v2367_v20 = vpop.permute.xlu0 %2366 }
 0x5d6   : > { %9938 = vmatprep.subr.mxu0 %v1961_v19 }
 0x5d7   : > { %9939 = vmatpush3.msra.mxu0 %v1961_v19  ;;  %v2372_v19 = vpop.permute.xlu1 %2371 }
 0x5d8   : > { %9940 = vmatprep.subr.mxu0 %v1882_v44 }
 0x5d9   : > { %9941 = vmatpush3.msra.mxu0 %v1882_v44 }
 0x5da   : > { %9942 = vmatprep.subr.mxu0 %v1803_v2 }
 0x5db   : > { %9943 = vmatpush3.msra.mxu0 %v1803_v2 }
 0x5dc   : > { %9945 = vmatmul.mubr.msk.f32.vlgmr.msra.gmra.mxu0 %vm1383_vm8, %v2361_v7  ;;  %9985 = vmatprep.subr.mxu0 %v11554_v4 }
 0x5dd   : > { %9986 = vmatpush3.msra.mxu0 %v11554_v4  ;;  %v13839_v4 = vld [vmem:[#allocation59_spill] sm:$0xff] }
 0x5de   : > { %9987 = vmatprep.subr.mxu0 %v11557_v5 }
 0x5df   : > { %9988 = vmatpush3.msra.mxu0 %v11557_v5  ;;  %v13840_v5 = vld [vmem:[#allocation60_spill] sm:$0xff] }
 0x5e0   : > { %9989 = vmatprep.subr.mxu0 %v11562_v6 }
 0x5e1   : > { %9990 = vmatpush3.msra.mxu0 %v11562_v6  ;;  %v13841_v6 = vld [vmem:[#allocation61_spill] sm:$0xff] }
 0x5e2   : > { %9991 = vmatprep.subr.mxu0 %v11567_v10 }
 0x5e3   : > { %9992 = vmatpush3.msra.mxu0 %v11567_v10  ;;  %v3064_v10 = vld [vmem:[%s13793_s8 + $0x8] sm:$0xff] }
 0x5e4   : > { %9993 = vmatprep.subr.mxu0 %v11572_v11 }
 0x5e5   : > { %9994 = vmatpush3.msra.mxu0 %v11572_v11 }
 0x5e6   : > { %9995 = vmatprep.subr.mxu0 %v11577_v12 }
 0x5e7   : > { %9996 = vmatpush3.msra.mxu0 %v11577_v12 }
 0x5e8   : > { %9997 = vmatprep.subr.mxu0 %v11587_v18 }
 0x5e9   : > { %9998 = vmatpush3.msra.mxu0 %v11587_v18 }
 0x5ea   : > { %9999 = vmatprep.subr.mxu0 %v11597_v22 }
 0x5eb   : > { %10000 = vmatpush3.msra.mxu0 %v11597_v22 }
 0x5ec   : > { %10023 = vmatprep.subr.mxu0 %v11613_v8 }
 0x69c   : > { %v9946_v2 = vpop.f32.mrf.mxu0 }
 0x69d   : > { %v2452_v24 = vadd.f32 %v9946_v2, %v2372_v19 }
 0x69e   : > { %v2446_v28 = vpop.f32.mrf.mxu0 }
 0x69f   : > { %v2447_v38 = vadd.f32 %v2446_v28, %v2367_v20  ;;  %v11923_v46 = vmax.f32 %v2452_v24, 0.0  ;;  %v12138_v20 = vld [vmem:[%s13842_s18 + $0x8] sm:$0xff]  ;;  %v12148_v28 = vld [vmem:[%s13842_s18] sm:$0xff] }
 0x6a0   : > { %v12141_v24 = vld [vmem:[%s13842_s18 + $0x28] sm:$0xff] }
 0x6a1   : > { %v11921_v44 = vmax.f32 %v2447_v38, 0.0  ;;  %v12151_v38 = vld [vmem:[%s13842_s18 + $0x20] sm:$0xff] }
 0x6a3   : > { %9963 = vmatprep.mubr.msk.f32.mxu1 %vm1733_vm10, %v11921_v44  ;;  %10001 = vmatprep.mubr.msk.f32.mxu0 %vm1733_vm10, %v11921_v44 }
 0x6a4   : > { %9964 = vmatmul.mubr.msk.f32.vlgmr.msra.gmra.mxu1 %vm1733_vm10, %v11923_v46  ;;  %10002 = vmatmul.mubr.msk.f32.vlgmr.msra.gmra.mxu0 %vm1733_vm10, %v11923_v46 }
 0x6a5   : > { %9967 = vmatpush3.msra.mxu1 %v11610_v27  ;;  %10024 = vmatpush3.msra.mxu0 %v11613_v8 }
 0x6a6   : > { %9968 = vmatprep.subr.mxu1 %v11620_v9  ;;  %9982 = vmatprep.mubr.msk.f32.mxu1 %vm1733_vm10, %v11921_v44 }
 0x6a7   : > { %10025 = vmatprep.subr.mxu0 %v11623_v29  ;;  %10039 = vmatprep.mubr.msk.f32.mxu0 %vm1733_vm10, %v11921_v44 }
 0x6a8   : > { %9969 = vmatpush3.msra.mxu1 %v11620_v9  ;;  %10026 = vmatpush3.msra.mxu0 %v11623_v29 }
 0x6a9   : > { %9970 = vmatprep.subr.mxu1 %v11630_v30  ;;  %10027 = vmatprep.subr.mxu0 %v11633_v31 }
 0x6aa   : > { %9971 = vmatpush3.msra.mxu1 %v11630_v30  ;;  %10028 = vmatpush3.msra.mxu0 %v11633_v31 }
 0x6ab   : > { %9972 = vmatprep.subr.mxu1 %v11640_v32  ;;  %10029 = vmatprep.subr.mxu0 %v11643_v33 }
 0x6ac   : > { %9973 = vmatpush3.msra.mxu1 %v11640_v32  ;;  %10030 = vmatpush3.msra.mxu0 %v11643_v33 }
 0x6ad   : > { %9974 = vmatprep.subr.mxu1 %v11650_v34  ;;  %10031 = vmatprep.subr.mxu0 %v11653_v35 }
 0x6ae   : > { %9975 = vmatpush3.msra.mxu1 %v11650_v34  ;;  %10032 = vmatpush3.msra.mxu0 %v11653_v35 }
 0x6af   : > { %9976 = vmatprep.subr.mxu1 %v11660_v36  ;;  %10033 = vmatprep.subr.mxu0 %v11663_v40 }
 0x6b0   : > { %9977 = vmatpush3.msra.mxu1 %v11660_v36  ;;  %10034 = vmatpush3.msra.mxu0 %v11663_v40  ;;  %v3063_v36 = vld [vmem:[%s13793_s8] sm:$0xff] }
 0x6b1   : > { %9978 = vmatprep.subr.mxu1 %v11670_v41  ;;  %10035 = vmatprep.subr.mxu0 %v11673_v49 }
 0x6b2   : > { %9979 = vmatpush3.msra.mxu1 %v11670_v41  ;;  %10036 = vmatpush3.msra.mxu0 %v11673_v49  ;;  %v3066_v41 = vld [vmem:[%s13793_s8 + $0x18] sm:$0xff] }
 0x6b3   : > { %9980 = vmatprep.subr.mxu1 %v11680_v50  ;;  %10037 = vmatprep.subr.mxu0 %v11685_v52 }
 0x6b4   : > { %9981 = vmatpush3.msra.mxu1 %v11680_v50  ;;  %10038 = vmatpush3.msra.mxu0 %v11685_v52  ;;  %v3072_v50 = vpop.permute.xlu0 %3071 }
 0x6b5   : > { %9983 = vmatmul.mubr.msk.f32.vlgmr.msra.gmra.mxu1 %vm1733_vm10, %v11923_v46  ;;  %10004 = vmatprep.subr.mxu1 %v11696_v58 }
 0x6b6   : > { %10040 = vmatmul.mubr.msk.f32.vlgmr.msra.gmra.mxu0 %vm1733_vm10, %v11923_v46  ;;  %10061 = vmatprep.subr.mxu0 %v11699_v59 }
 0x6b7   : > { %10005 = vmatpush3.msra.mxu1 %v11696_v58  ;;  %10020 = vmatprep.mubr.msk.f32.mxu1 %vm1733_vm10, %v11921_v44 }
 0x6b8   : > { %10062 = vmatpush3.msra.mxu0 %v11699_v59  ;;  %10077 = vmatprep.mubr.msk.f32.mxu0 %vm1733_vm10, %v11921_v44 }
 0x6b9   : > { %10006 = vmatprep.subr.mxu1 %v11708_v60  ;;  %10063 = vmatprep.subr.mxu0 %v11711_v61 }
 0x6ba   : > { %10007 = vmatpush3.msra.mxu1 %v11708_v60  ;;  %10064 = vmatpush3.msra.mxu0 %v11711_v61 }
 0x6bb   : > { %10008 = vmatprep.subr.mxu1 %v11718_v62  ;;  %10065 = vmatprep.subr.mxu0 %v11721_v63 }
 0x6bc   : > { %10009 = vmatpush3.msra.mxu1 %v11718_v62  ;;  %10066 = vmatpush3.msra.mxu0 %v11721_v63 }
 0x6bd   : > { %10010 = vmatprep.subr.mxu1 %v11728_v1  ;;  %10067 = vmatprep.subr.mxu0 %v11731_v23 }
 0x6be   : > { %10011 = vmatpush3.msra.mxu1 %v11728_v1  ;;  %10068 = vmatpush3.msra.mxu0 %v11731_v23  ;;  %v3077_v1 = vpop.permute.xlu1 %3076 }
 0x6bf   : > { %10012 = vmatprep.subr.mxu1 %v11738_v25  ;;  %10069 = vmatprep.subr.mxu0 %v11741_v16 }
 0x6c0   : > { %10013 = vmatpush3.msra.mxu1 %v11738_v25  ;;  %10070 = vmatpush3.msra.mxu0 %v11741_v16 }
 0x6c1   : > { %10014 = vmatprep.subr.mxu1 %v11748_v15  ;;  %10071 = vmatprep.subr.mxu0 %v11751_v14 }
 0x6c2   : > { %10015 = vmatpush3.msra.mxu1 %v11748_v15  ;;  %10072 = vmatpush3.msra.mxu0 %v11751_v14  ;;  %v13830_v15 = vmov 0.0  }
 0x6c3   : > { %10016 = vmatprep.subr.mxu1 %v11758_v17  ;;  %10073 = vmatprep.subr.mxu0 %v11761_v3 }
 0x6c4   : > { %10017 = vmatpush3.msra.mxu1 %v11758_v17  ;;  %10074 = vmatpush3.msra.mxu0 %v11761_v3  ;;  %v13836_v17 = vld [vmem:[#allocation56_spill] sm:$0xff] }
 0x6c5   : > { %10018 = vmatprep.subr.mxu1 %v11768_v0  ;;  %10075 = vmatprep.subr.mxu0 %v11773_v55 }
 0x6c6   : > { %10019 = vmatpush3.msra.mxu1 %v11768_v0  ;;  %10076 = vmatpush3.msra.mxu0 %v11773_v55  ;;  %v13832_v0 = vld [vmem:[#allocation52_spill] sm:$0xff] }
 0x6c7   : > { %10021 = vmatmul.mubr.msk.f32.vlgmr.msra.gmra.mxu1 %vm1733_vm10, %v11923_v46  ;;  %10042 = vmatprep.subr.mxu1 %v11781_v56 }
 0x6c8   : > { %10078 = vmatmul.mubr.msk.f32.vlgmr.msra.gmra.mxu0 %vm1733_vm10, %v11923_v46  ;;  %10043 = vmatpush3.msra.mxu1 %v11781_v56  ;;  %v13831_v56 = vld [vmem:[#allocation51_spill] sm:$0xff] }
 0x6c9   : > { %10058 = vmatprep.mubr.msk.f32.mxu1 %vm1733_vm10, %v11921_v44  ;;  %10044 = vmatprep.subr.mxu1 %v11790_v48 }
 0x6ca   : > { %10045 = vmatpush3.msra.mxu1 %v11790_v48  ;;  %3086 = vmatprep.subr.mxu0 %v13830_v15  ;;  %v13833_v48 = vld [vmem:[#allocation53_spill] sm:$0xff] }
 0x6cb   : > { %10046 = vmatprep.subr.mxu1 %v11797_v47  ;;  %8879 = vmatprep.mubr.msk.f32.mxu0 %vm3079_vm11, %v3064_v10  ;;  %v12241_v10 = vld [vmem:[%s13842_s18 + $0x80] sm:$0xff] }
 0x6cc   : > { %10047 = vmatpush3.msra.mxu1 %v11797_v47  ;;  %v13834_v47 = vld [vmem:[#allocation54_spill] sm:$0xff] }
 0x6cd   : > { %10048 = vmatprep.subr.mxu1 %v11804_v42 }
 0x6ce   : > { %10049 = vmatpush3.msra.mxu1 %v11804_v42  ;;  %v13837_v42 = vld [vmem:[#allocation57_spill] sm:$0xff] }
 0x6cf   : > { %10050 = vmatprep.subr.mxu1 %v11809_v39 }
 0x6d0   : > { %10051 = vmatpush3.msra.mxu1 %v11809_v39  ;;  %v13835_v39 = vld [vmem:[#allocation55_spill] sm:$0xff] }
 0x6d1   : > { %10052 = vmatprep.subr.mxu1 %v13831_v56 }
 0x6d2   : > { %10053 = vmatpush3.msra.mxu1 %v13831_v56 }
 0x6d3   : > { %10054 = vmatprep.subr.mxu1 %v13832_v0 }
 0x6d4   : > { %10055 = vmatpush3.msra.mxu1 %v13832_v0 }
 0x6d5   : > { %10056 = vmatprep.subr.mxu1 %v13833_v48 }
 0x6d6   : > { %10057 = vmatpush3.msra.mxu1 %v13833_v48  ;;  %v12178_v48 = vld [vmem:[%s13842_s18 + $0x10] sm:$0xff] }
 0x6d7   : > { %10059 = vmatmul.mubr.msk.f32.vlgmr.msra.gmra.mxu1 %vm1733_vm10, %v11923_v46  ;;  %10080 = vmatprep.subr.mxu1 %v13834_v47 }
 0x6d8   : > { %10081 = vmatpush3.msra.mxu1 %v13834_v47  ;;  %10096 = vmatprep.mubr.msk.f32.mxu1 %vm1733_vm10, %v11921_v44  ;;  %v12181_v47 = vld [vmem:[%s13842_s18 + $0x50] sm:$0xff] }
 0x6d9   : > { %10082 = vmatprep.subr.mxu1 %v13835_v39 }
 0x6da   : > { %10083 = vmatpush3.msra.mxu1 %v13835_v39  ;;  %v12190_v39 = vld [vmem:[%s13842_s18 + $0x38] sm:$0xff] }
 0x6db   : > { %10084 = vmatprep.subr.mxu1 %v13836_v17 }
 0x6dc   : > { %10085 = vmatpush3.msra.mxu1 %v13836_v17  ;;  %v12195_v17 = vld [vmem:[%s13842_s18 + $0x78] sm:$0xff] }
 0x6dd   : > { %10086 = vmatprep.subr.mxu1 %v13837_v42 }
 0x6de   : > { %10087 = vmatpush3.msra.mxu1 %v13837_v42  ;;  %v12206_v42 = vld [vmem:[%s13842_s18 + $0x30] sm:$0xff] }
 0x6df   : > { %10088 = vmatprep.subr.mxu1 %v13838_v43 }
 0x6e0   : > { %10089 = vmatpush3.msra.mxu1 %v13838_v43  ;;  %v12209_v43 = vld [vmem:[%s13842_s18 + $0x70] sm:$0xff] }
 0x6e1   : > { %10090 = vmatprep.subr.mxu1 %v13839_v4 }
 0x6e2   : > { %10091 = vmatpush3.msra.mxu1 %v13839_v4  ;;  %v12218_v4 = vld [vmem:[%s13842_s18 + $0x68] sm:$0xff] }
 0x6e3   : > { %10092 = vmatprep.subr.mxu1 %v13840_v5 }
 0x6e4   : > { %10093 = vmatpush3.msra.mxu1 %v13840_v5  ;;  %v12225_v5 = vld [vmem:[%s13842_s18 + $0x60] sm:$0xff] }
 0x6e5   : > { %10094 = vmatprep.subr.mxu1 %v13841_v6 }
 0x6e6   : > { %10095 = vmatpush3.msra.mxu1 %v13841_v6  ;;  %v12234_v6 = vld [vmem:[%s13842_s18 + $0x88] sm:$0xff] }
 0x6e7   : > { %10097 = vmatmul.mubr.msk.f32.vlgmr.msra.gmra.mxu1 %vm1733_vm10, %v11923_v46  ;;  %10099 = vmatprep.subr.mxu1 %v11613_v8 }
 0x6e8   : > { %10100 = vmatpush3.msra.mxu1 %v11613_v8 }
 0x6e9   : > { %10101 = vmatprep.subr.mxu1 %v11623_v29 }
 0x6ea   : > { %10102 = vmatpush3.msra.mxu1 %v11623_v29 }
 0x6eb   : > { %10103 = vmatprep.subr.mxu1 %v11633_v31 }
 0x6ec   : > { %10104 = vmatpush3.msra.mxu1 %v11633_v31 }
 0x6ed   : > { %10105 = vmatprep.subr.mxu1 %v11643_v33 }
 0x6ee   : > { %10106 = vmatpush3.msra.mxu1 %v11643_v33 }
 0x6ef   : > { %10107 = vmatprep.subr.mxu1 %v11653_v35 }
 0x6f0   : > { %10108 = vmatpush3.msra.mxu1 %v11653_v35 }
 0x6f1   : > { %10109 = vmatprep.subr.mxu1 %v11663_v40 }
 0x6f2   : > { %10110 = vmatpush3.msra.mxu1 %v11663_v40 }
 0x6f3   : > { %10111 = vmatprep.subr.mxu1 %v11673_v49 }
 0x6f4   : > { %10112 = vmatpush3.msra.mxu1 %v11673_v49  ;;  %v3065_v49 = vld [vmem:[%s13793_s8 + $0x10] sm:$0xff]  ;;  %s13957_s8 = sld [smem:[#allocation22_spill]] }
 0x6f5   : > { %10113 = vmatprep.subr.mxu1 %v11685_v52 }
 0x6f6   : > { %10114 = vmatpush3.msra.mxu1 %v11685_v52 }
 0x6f7   : > { %10118 = vmatprep.subr.mxu1 %v11699_v59 }
 0x764   : > { %v10003_v11 = vpop.f32.mrf.mxu0  ;;  %v9965_v22 = vpop.f32.mrf.mxu1 }
 0x766   : > { %v2679_v12 = vpop.f32.mrf.mxu0  ;;  %v2529_v8 = vpop.f32.mrf.mxu1 }
 0x775   : > { %v9984_v29 = vpop.f32.mrf.mxu1 }
 0x776   : > { %v10041_v18 = vpop.f32.mrf.mxu0 }
 0x777   : > { %v2604_v30 = vpop.f32.mrf.mxu1 }
 0x778   : > { %v2829_v26 = vpop.f32.mrf.mxu0 }
 0x787   : > { %v10022_v31 = vpop.f32.mrf.mxu1 }
 0x788   : > { %v10079_v27 = vpop.f32.mrf.mxu0 }
 0x789   : > { %3087 = vmatpush1.msra.mxu0 %v10079_v27  ;;  %v2754_v32 = vpop.f32.mrf.mxu1 }
 0x78a   : > { %v2979_v9 = vpop.f32.mrf.mxu0  ;;  %3088 = vmatprep.subr.mxu0 %v13830_v15 }
 0x78b   : > { %3089 = vmatpush1.msra.mxu0 %v2979_v9 }
 0x78c   : > { %3090 = vmatprep.subr.mxu0 %v13830_v15 }
 0x797   : > { %v10060_v33 = vpop.f32.mrf.mxu1 }
 0x798   : > { %3091 = vmatpush1.msra.mxu0 %v10060_v33 }
 0x799   : > { %v2904_v34 = vpop.f32.mrf.mxu1  ;;  %3092 = vmatprep.subr.mxu0 %v13830_v15 }
 0x79a   : > { %3093 = vmatpush1.msra.mxu0 %v2904_v34 }
 0x79b   : > { %3094 = vmatprep.subr.mxu0 %v13830_v15 }
 0x79c   : > { %3095 = vmatpush1.msra.mxu0 %v10041_v18 }
 0x79d   : > { %3096 = vmatprep.subr.mxu0 %v13830_v15 }
 0x79e   : > { %3097 = vmatpush1.msra.mxu0 %v2829_v26 }
 0x79f   : > { %3098 = vmatprep.subr.mxu0 %v13830_v15 }
 0x7a0   : > { %3099 = vmatpush1.msra.mxu0 %v11923_v46  ;;  %v12161_v46 = vld [vmem:[%s13842_s18 + $0x58] sm:$0xff] }
 0x7a1   : > { %3100 = vmatprep.subr.mxu0 %v13830_v15 }
 0x7a2   : > { %3101 = vmatpush1.msra.mxu0 %v11921_v44  ;;  %v12158_v44 = vld [vmem:[%s13842_s18 + $0x18] sm:$0xff] }
 0x7a3   : > { %3102 = vmatprep.subr.mxu0 %v13830_v15 }
 0x7a4   : > { %3103 = vmatpush1.msra.mxu0 %v10022_v31 }
 0x7a5   : > { %3104 = vmatprep.subr.mxu0 %v13830_v15 }
 0x7a6   : > { %3105 = vmatpush1.msra.mxu0 %v2754_v32 }
 0x7a7   : > { %3106 = vmatprep.subr.mxu0 %v13830_v15  ;;  %v10098_v35 = vpop.f32.mrf.mxu1 }
 0x7a8   : > { %3107 = vmatpush1.msra.mxu0 %v10003_v11  ;;  %v4048_v11 = vld [vmem:[%s13843_s0 + $0x8] sm:$0xff] }
 0x7a9   : > { %3108 = vmatprep.subr.mxu0 %v13830_v15  ;;  %v3054_v40 = vpop.f32.mrf.mxu1 }
 0x7aa   : > { %3109 = vmatpush1.msra.mxu0 %v2679_v12 }
 0x7ab   : > { %3110 = vmatprep.subr.mxu0 %v13830_v15 }
 0x7ac   : > { %3111 = vmatpush1.msra.mxu0 %v9984_v29 }
 0x7ad   : > { %3112 = vmatprep.subr.mxu0 %v13830_v15 }
 0x7ae   : > { %3113 = vmatpush1.msra.mxu0 %v2604_v30 }
 0x7af   : > { %3114 = vmatprep.subr.mxu0 %v13830_v15 }
 0x7b0   : > { %3115 = vmatpush1.msra.mxu0 %v9965_v22 }
 0x7b1   : > { %3116 = vmatprep.subr.mxu0 %v13830_v15 }
 0x7b2   : > { %3117 = vmatpush1.msra.mxu0 %v2529_v8 }
 0x7b3   : > { %3146 = vmatprep.subr.mxu0 %v13830_v15 }
 0x7b4   : > { %3147 = vmatpush2.msra.mxu0 %v10098_v35 }
 0x7b5   : > { %3148 = vmatprep.subr.mxu0 %v13830_v15 }
 0x7b6   : > { %3149 = vmatpush2.msra.mxu0 %v3054_v40  ;;  %v4047_v40 = vld [vmem:[%s13843_s0] sm:$0xff] }
 0x7b7   : > { %3151 = vmatmul.mubr.f32.vlgmr.msra.gmra.mxu0 %v3063_v36 }
 0x7b8   : > { %8880 = vmatprep.mubr.msk.f32.mxu0 %vm3079_vm11, %v3066_v41 }
 0x7bb   : > { %3156 = vmatmul.mubr.f32.gmra.mxu0 %v3065_v49  ;;  %v4050_v49 = vld [vmem:[%s13843_s0 + $0x18] sm:$0xff] }
 0x877   : > { %v3152_v52 = vpop.f32.mrf.mxu0 }
 0x878   : > { %v3153_v58 = vadd.f32 %v3152_v52, %v3072_v50  ;;  %v4049_v50 = vld [vmem:[%s13843_s0 + $0x10] sm:$0xff]  ;;  %v4052_v52 = vld [vmem:[%s13843_s0 + $0x28] sm:$0xff] }
 0x879   : > { %v3154_v60 = vpop.f32.mrf.mxu0 }
 0x87a   : > { %v12094_v62 = vmax.f32 %v3153_v58, 0.0  ;;  %v4051_v58 = vld [vmem:[%s13843_s0 + $0x20] sm:$0xff]  ;;  %v4054_v60 = vld [vmem:[%s13843_s0 + $0x38] sm:$0xff] }
 0x87b   : > { %v3157_v25 = vpop.f32.mrf.mxu0 }
 0x87c   : > { %v3158_v57 = vadd.f32 %v3157_v25, %v3077_v1  ;;  %10115 = vmatprep.mubr.msk.f32.mxu1 %vm1733_vm10, %v12094_v62  ;;  %v4053_v1 = vld [vmem:[%s13843_s0 + $0x30] sm:$0xff]  ;;  %v4062_v25 = vpop.permute.xlu0 %4061  ;;  %s13854_s0 = sld [smem:[#allocation20_spill]] }
 0x87d   : > { %v3159_v13 = vpop.f32.mrf.mxu0 }
 0x87e   : > { %v12098_v21 = vmax.f32 %v3158_v57, 0.0 }
 0x880   : > { %10116 = vmatmul.mubr.msk.f32.vlgmr.msra.gmra.mxu1 %vm1733_vm10, %v12098_v21 }
 0x881   : > { %10119 = vmatpush3.msra.mxu1 %v11699_v59  ;;  %v3336_v59 = vld [vmem:[%s13792_s9 + $0x38] sm:$0xff] }
 0x882   : > { %10120 = vmatprep.subr.mxu1 %v11711_v61  ;;  %10137 = vmatprep.subr.mxu0 %v3336_v59 }
 0x883   : > { %10121 = vmatpush3.msra.mxu1 %v11711_v61  ;;  %v3335_v61 = vld [vmem:[%s13792_s9 + $0x30] sm:$0xff]  ;;  %10138 = vmatpush3.msra.mxu0 %v3336_v59 }
 0x884   : > { %10122 = vmatprep.subr.mxu1 %v11721_v63  ;;  %10139 = vmatprep.subr.mxu0 %v3335_v61 }
 0x885   : > { %10123 = vmatpush3.msra.mxu1 %v11721_v63  ;;  %v3334_v63 = vld [vmem:[%s13792_s9 + $0x28] sm:$0xff]  ;;  %10140 = vmatpush3.msra.mxu0 %v3335_v61 }
 0x886   : > { %10124 = vmatprep.subr.mxu1 %v11731_v23  ;;  %10141 = vmatprep.subr.mxu0 %v3334_v63 }
 0x887   : > { %10125 = vmatpush3.msra.mxu1 %v11731_v23  ;;  %10142 = vmatpush3.msra.mxu0 %v3334_v63  ;;  %v4067_v63 = vpop.permute.xlu1 %4066 }
 0x888   : > { %10126 = vmatprep.subr.mxu1 %v11741_v16 }
 0x889   : > { %10127 = vmatpush3.msra.mxu1 %v11741_v16  ;;  %v3333_v16 = vld [vmem:[%s13792_s9 + $0x20] sm:$0xff] }
 0x88a   : > { %10128 = vmatprep.subr.mxu1 %v11751_v14  ;;  %10143 = vmatprep.subr.mxu0 %v3333_v16 }
 0x88b   : > { %10129 = vmatpush3.msra.mxu1 %v11751_v14  ;;  %v3332_v14 = vld [vmem:[%s13792_s9 + $0x18] sm:$0xff]  ;;  %10144 = vmatpush3.msra.mxu0 %v3333_v16  ;;  %s13958_s9 = smov 111  }
 0x88c   : > { %10130 = vmatprep.subr.mxu1 %v11761_v3  ;;  %10145 = vmatprep.subr.mxu0 %v3332_v14 }
 0x88d   : > { %10131 = vmatpush3.msra.mxu1 %v11761_v3  ;;  %10146 = vmatpush3.msra.mxu0 %v3332_v14 }
 0x88e   : > { %10132 = vmatprep.subr.mxu1 %v11773_v55  ;;  %10147 = vmatprep.subr.mxu0 %v3331_v45 }
 0x88f   : > { %10133 = vmatpush3.msra.mxu1 %v11773_v55  ;;  %10148 = vmatpush3.msra.mxu0 %v3331_v45  ;;  %v4072_v45 = vpop.permute.xlu0 %4071 }
 0x890   : > { %10149 = vmatprep.subr.mxu0 %v3330_v51  ;;  %10156 = vmatprep.subr.mxu1 %v12138_v20 }
 0x891   : > { %10150 = vmatpush3.msra.mxu0 %v3330_v51 }
 0x892   : > { %10151 = vmatprep.subr.mxu0 %v3329_v53 }
 0x893   : > { %10152 = vmatpush3.msra.mxu0 %v3329_v53 }
 0x894   : > { %10170 = vmatprep.subr.mxu0 %v12141_v24 }
 0x940   : > { %v12122_v3 = vpop.f32.mrf.mxu1 }
 0x941   : > { %v3245_v37 = vmax.f32 %v12098_v21, %v12122_v3 }
 0x942   : > { %v12124_v55 = vpop.f32.mrf.mxu1 }
 0x943   : > { %v3244_v23 = vmax.f32 %v12094_v62, %v12124_v55 }
 0x945   : > { %10134 = vmatprep.mubr.msk.f32.mxu1 %vm1733_vm10, %v3244_v23 }
 0x946   : > { %10135 = vmatmul.mubr.msk.f32.vlgmr.msra.gmra.mxu1 %vm1733_vm10, %v3245_v37 }
 0x947   : > { %10157 = vmatpush3.msra.mxu1 %v12138_v20 }
 0x948   : > { %10158 = vmatprep.subr.mxu1 %v12148_v28 }
 0x949   : > { %10159 = vmatpush3.msra.mxu1 %v12148_v28 }
 0x94a   : > { %10163 = vmatprep.subr.mxu1 %v12158_v44 }
 0xa06   : > { %v10136_v54 = vpop.f32.mrf.mxu1 }
 0xa07   : > { %v3328_v19 = vmax.f32 %v3245_v37, %v10136_v54 }
 0xa08   : > { %v3318_v7 = vpop.f32.mrf.mxu1 }
 0xa09   : > { %v3327_v2 = vmax.f32 %v3244_v23, %v3318_v7 }
 0xa0b   : > { %10153 = vmatprep.mubr.msk.f32.mxu0 %vm1733_vm10, %v3327_v2  ;;  %v4077_v2 = vpop.permute.xlu1 %4076 }
 0xa0c   : > { %10154 = vmatmul.mubr.msk.f32.vlgmr.msra.gmra.mxu0 %vm1733_vm10, %v3328_v19 }
 0xa0d   : > { %10171 = vmatpush3.msra.mxu0 %v12141_v24 }
 0xa0e   : > { %10172 = vmatprep.subr.mxu0 %v12151_v38 }
 0xa0f   : > { %10173 = vmatpush3.msra.mxu0 %v12151_v38 }
 0xa10   : > { %10184 = vmatprep.subr.mxu0 %v12161_v46 }
 0xacc   : > { %v12165_v56 = vpop.f32.mrf.mxu0 }
 0xace   : > { %v12167_v0 = vpop.f32.mrf.mxu0 }
 0xacf   : > { %10160 = vmatprep.mubr.msk.f32.mxu1 %vm3079_vm11, %v12167_v0  ;;  %10174 = vmatprep.mubr.msk.f32.mxu0 %vm3079_vm11, %v12167_v0 }
 0xad0   : > { %10161 = vmatmul.mubr.msk.f32.vlgmr.msra.gmra.mxu1 %vm3079_vm11, %v12165_v56  ;;  %10175 = vmatmul.mubr.msk.f32.vlgmr.msra.gmra.mxu0 %vm3079_vm11, %v12165_v56 }
 0xad1   : > { %10164 = vmatpush3.msra.mxu1 %v12158_v44  ;;  %10167 = vmatprep.mubr.msk.f32.mxu1 %vm3079_vm11, %v12167_v0 }
 0xad2   : > { %10185 = vmatpush3.msra.mxu0 %v12161_v46  ;;  %10188 = vmatprep.mubr.msk.f32.mxu0 %vm3079_vm11, %v12167_v0 }
 0xad3   : > { %10165 = vmatprep.subr.mxu1 %v12178_v48  ;;  %10186 = vmatprep.subr.mxu0 %v12181_v47 }
 0xad4   : > { %10166 = vmatpush3.msra.mxu1 %v12178_v48  ;;  %10187 = vmatpush3.msra.mxu0 %v12181_v47 }
 0xad5   : > { %10168 = vmatmul.mubr.msk.f32.vlgmr.msra.gmra.mxu1 %vm3079_vm11, %v12165_v56  ;;  %10177 = vmatprep.subr.mxu1 %v12190_v39 }
 0xad6   : > { %10189 = vmatmul.mubr.msk.f32.vlgmr.msra.gmra.mxu0 %vm3079_vm11, %v12165_v56  ;;  %10198 = vmatprep.subr.mxu0 %v12195_v17 }
 0xad7   : > { %10178 = vmatpush3.msra.mxu1 %v12190_v39  ;;  %10181 = vmatprep.mubr.msk.f32.mxu1 %vm3079_vm11, %v12167_v0 }
 0xad8   : > { %10199 = vmatpush3.msra.mxu0 %v12195_v17  ;;  %10202 = vmatprep.mubr.msk.f32.mxu0 %vm3079_vm11, %v12167_v0 }
 0xad9   : > { %10179 = vmatprep.subr.mxu1 %v12206_v42  ;;  %10200 = vmatprep.subr.mxu0 %v12209_v43 }
 0xada   : > { %10180 = vmatpush3.msra.mxu1 %v12206_v42  ;;  %10201 = vmatpush3.msra.mxu0 %v12209_v43 }
 0xadb   : > { %10182 = vmatmul.mubr.msk.f32.vlgmr.msra.gmra.mxu1 %vm3079_vm11, %v12165_v56  ;;  %10191 = vmatprep.subr.mxu1 %v12218_v4 }
 0xadc   : > { %10203 = vmatmul.mubr.msk.f32.vlgmr.msra.gmra.mxu0 %vm3079_vm11, %v12165_v56  ;;  %10192 = vmatpush3.msra.mxu1 %v12218_v4 }
 0xadd   : > { %10195 = vmatprep.mubr.msk.f32.mxu1 %vm3079_vm11, %v12167_v0  ;;  %10193 = vmatprep.subr.mxu1 %v12225_v5 }
 0xade   : > { %10194 = vmatpush3.msra.mxu1 %v12225_v5  ;;  %4091 = vmatprep.subr.mxu0 %v13830_v15 }
 0xadf   : > { %10196 = vmatmul.mubr.msk.f32.vlgmr.msra.gmra.mxu1 %vm3079_vm11, %v12165_v56  ;;  %10205 = vmatprep.subr.mxu1 %v12234_v6 }
 0xae0   : > { %10206 = vmatpush3.msra.mxu1 %v12234_v6  ;;  %10209 = vmatprep.mubr.msk.f32.mxu1 %vm3079_vm11, %v12167_v0 }
 0xae1   : > { %10207 = vmatprep.subr.mxu1 %v12241_v10  ;;  %8917 = vmatprep.mubr.msk.f32.mxu0 %vm3079_vm11, %v4048_v11 }
 0xae2   : > { %10208 = vmatpush3.msra.mxu1 %v12241_v10 }
 0xae3   : > { %10210 = vmatmul.mubr.msk.f32.vlgmr.msra.gmra.mxu1 %vm3079_vm11, %v12165_v56  ;;  %10212 = vmatprep.subr.mxu1 %v12138_v20 }
 0xae4   : > { %10213 = vmatpush3.msra.mxu1 %v12138_v20 }
 0xae5   : > { %10214 = vmatprep.subr.mxu1 %v12148_v28 }
 0xae6   : > { %10215 = vmatpush3.msra.mxu1 %v12148_v28 }
 0xae7   : > { %10222 = vmatprep.subr.mxu1 %v12158_v44 }
 0xb90   : > { %v10162_v12 = vpop.f32.mrf.mxu1  ;;  %v10176_v18 = vpop.f32.mrf.mxu0 }
 0xb92   : > { %v3492_v22 = vpop.f32.mrf.mxu1  ;;  %v3648_v26 = vpop.f32.mrf.mxu0 }
 0xb95   : > { %v10169_v27 = vpop.f32.mrf.mxu1 }
 0xb96   : > { %v10190_v8 = vpop.f32.mrf.mxu0 }
 0xb97   : > { %v3570_v9 = vpop.f32.mrf.mxu1 }
 0xb98   : > { %v3804_v29 = vpop.f32.mrf.mxu0 }
 0xb9b   : > { %v10183_v30 = vpop.f32.mrf.mxu1 }
 0xb9c   : > { %v10204_v31 = vpop.f32.mrf.mxu0 }
 0xb9d   : > { %4092 = vmatpush1.msra.mxu0 %v10204_v31  ;;  %v3726_v32 = vpop.f32.mrf.mxu1 }
 0xb9e   : > { %v3960_v33 = vpop.f32.mrf.mxu0  ;;  %4093 = vmatprep.subr.mxu0 %v13830_v15 }
 0xb9f   : > { %4094 = vmatpush1.msra.mxu0 %v3960_v33  ;;  %v10197_v34 = vpop.f32.mrf.mxu1 }
 0xba0   : > { %4095 = vmatprep.subr.mxu0 %v13830_v15 }
 0xba1   : > { %4096 = vmatpush1.msra.mxu0 %v10197_v34  ;;  %v3882_v35 = vpop.f32.mrf.mxu1 }
 0xba2   : > { %4097 = vmatprep.subr.mxu0 %v13830_v15 }
 0xba3   : > { %4098 = vmatpush1.msra.mxu0 %v3882_v35  ;;  %v10211_v36 = vpop.f32.mrf.mxu1 }
 0xba4   : > { %4099 = vmatprep.subr.mxu0 %v13830_v15 }
 0xba5   : > { %4100 = vmatpush1.msra.mxu0 %v10190_v8  ;;  %v4038_v41 = vpop.f32.mrf.mxu1 }
 0xba6   : > { %4101 = vmatprep.subr.mxu0 %v13830_v15 }
 0xba7   : > { %4102 = vmatpush1.msra.mxu0 %v3804_v29 }
 0xba8   : > { %4103 = vmatprep.subr.mxu0 %v13830_v15 }
 0xba9   : > { %4104 = vmatpush1.msra.mxu0 %v12165_v56 }
 0xbaa   : > { %4105 = vmatprep.subr.mxu0 %v13830_v15 }
 0xbab   : > { %4106 = vmatpush1.msra.mxu0 %v12167_v0 }
 0xbac   : > { %4107 = vmatprep.subr.mxu0 %v13830_v15 }
 0xbad   : > { %4108 = vmatpush1.msra.mxu0 %v10183_v30 }
 0xbae   : > { %4109 = vmatprep.subr.mxu0 %v13830_v15 }
 0xbaf   : > { %4110 = vmatpush1.msra.mxu0 %v3726_v32 }
 0xbb0   : > { %4111 = vmatprep.subr.mxu0 %v13830_v15 }
 0xbb1   : > { %4112 = vmatpush1.msra.mxu0 %v10176_v18 }
 0xbb2   : > { %4113 = vmatprep.subr.mxu0 %v13830_v15 }
 0xbb3   : > { %4114 = vmatpush1.msra.mxu0 %v3648_v26 }
 0xbb4   : > { %4115 = vmatprep.subr.mxu0 %v13830_v15 }
 0xbb5   : > { %4116 = vmatpush1.msra.mxu0 %v10169_v27 }
 0xbb6   : > { %4117 = vmatprep.subr.mxu0 %v13830_v15 }
 0xbb7   : > { %4118 = vmatpush1.msra.mxu0 %v3570_v9 }
 0xbb8   : > { %4119 = vmatprep.subr.mxu0 %v13830_v15 }
 0xbb9   : > { %4120 = vmatpush1.msra.mxu0 %v10162_v12 }
 0xbba   : > { %4121 = vmatprep.subr.mxu0 %v13830_v15 }
 0xbbb   : > { %4122 = vmatpush1.msra.mxu0 %v3492_v22 }
 0xbbc   : > { %4151 = vmatprep.subr.mxu0 %v13830_v15 }
 0xbbd   : > { %4152 = vmatpush2.msra.mxu0 %v10211_v36  ;;  %v8957_v36 = vld [vmem:[%s1191_s15] ss:$0 sm:$0xff]  ;;  %s13849_s15 = sld [smem:[#allocation12_spill]] }
 0xbbe   : > { %4153 = vmatprep.subr.mxu0 %v13830_v15  ;;  %v12857_v15 = vld [vmem:[%s13794_s4 + $0x220] sm:$0xff] }
 0xbbf   : > { %4154 = vmatpush2.msra.mxu0 %v4038_v41  ;;  %13897 = vst [vmem:[#allocation84_spill] sm:$0xff] %v12857_v15 }
 0xbc0   : > { %4156 = vmatmul.mubr.f32.vlgmr.msra.gmra.mxu0 %v4047_v40  ;;  %10272 = vmatprep.subr.mxu0 %v12195_v17  ;;  %v5099_v40 = vld [vmem:[%s13846_s7 + $0x18] sm:$0xff] }
 0xbc1   : > { %8918 = vmatprep.mubr.msk.f32.mxu0 %vm3079_vm11, %v4050_v49  ;;  %10273 = vmatpush3.msra.mxu0 %v12195_v17  ;;  %v5098_v49 = vld [vmem:[%s13846_s7 + $0x10] sm:$0xff] }
 0xbc2   : > { %10274 = vmatprep.subr.mxu0 %v12209_v43 }
 0xbc3   : > { %10275 = vmatpush3.msra.mxu0 %v12209_v43 }
 0xbc4   : > { %4161 = vmatmul.mubr.f32.gmra.mxu0 %v4049_v50 }
 0xbc5   : > { %8919 = vmatprep.mubr.msk.f32.mxu0 %vm3079_vm11, %v4052_v52  ;;  %v5109_v52 = vmul.f32 %v8957_v36, %v5099_v40  ;;  %v7659_v40 = vld [vmem:[%s13853_s28 + $0x8] sm:$0xff] }
 0xbc8   : > { %4166 = vmatmul.mubr.f32.gmra.mxu0 %v4051_v58  ;;  %v5113_v58 = vld [vmem:[%s13847_s16 + $0x18] sm:$0xff] }
 0xbc9   : > { %8920 = vmatprep.mubr.msk.f32.mxu0 %vm3079_vm11, %v4054_v60 }
 0xbcc   : > { %4171 = vmatmul.mubr.f32.gmra.mxu0 %v4053_v1  ;;  %v5108_v1 = vmul.f32 %v8957_v36, %v5098_v49  ;;  %v8221_v49 = vld [vmem:[%s13854_s0] sm:$0xff]  ;;  %s13860_s0 = smov 15  }
 0xc80   : > { %v4157_v57 = vpop.f32.mrf.mxu0 }
 0xc81   : > { %v4158_v13 = vadd.f32 %v4157_v57, %v4062_v25  ;;  %v5097_v25 = vld [vmem:[%s13846_s7 + $0x8] sm:$0xff]  ;;  %v5112_v57 = vld [vmem:[%s13847_s16 + $0x10] sm:$0xff] }
 0xc82   : > { %v4159_v59 = vpop.f32.mrf.mxu0 }
 0xc83   : > { %v12294_v61 = vmax.f32 %v4158_v13, 0.0  ;;  %v5117_v59 = vadd.f32 %v5113_v58, %v5109_v52  ;;  %v13857_v52 = vld [vmem:[#allocation48_spill] sm:$0xff] }
 0xc84   : > { %v4162_v16 = vpop.f32.mrf.mxu0 }
 0xc85   : > { %v4163_v14 = vadd.f32 %v4162_v16, %v4067_v63  ;;  %10216 = vmatprep.mubr.msk.f32.mxu1 %vm3079_vm11, %v12294_v61  ;;  %10276 = vmatprep.mubr.msk.f32.mxu0 %vm3079_vm11, %v12294_v61  ;;  %v5096_v63 = vld [vmem:[%s13846_s7] sm:$0xff]  ;;  %v5107_v16 = vmul.f32 %v8957_v36, %v5097_v25  ;;  %s13956_s7 = smov 127  }
 0xc86   : > { %v4164_v23 = vpop.f32.mrf.mxu0 }
 0xc87   : > { %v12300_v37 = vmax.f32 %v4163_v14, 0.0  ;;  %v5116_v14 = vadd.f32 %v5112_v57, %v5108_v1  ;;  %v5111_v23 = vld [vmem:[%s13847_s16 + $0x8] sm:$0xff] }
 0xc88   : > { %v4167_v51 = vpop.f32.mrf.mxu0 }
 0xc89   : > { %v4168_v53 = vadd.f32 %v4167_v51, %v4072_v45  ;;  %10217 = vmatmul.mubr.msk.f32.vlgmr.msra.gmra.mxu1 %vm3079_vm11, %v12300_v37  ;;  %10277 = vmatmul.mubr.msk.f32.vlgmr.msra.gmra.mxu0 %vm3079_vm11, %v12300_v37  ;;  %v5106_v45 = vmul.f32 %v8957_v36, %v5096_v63  ;;  %v4877_v51 = vld [vmem:[%s13844_s26 + $0x28] sm:$0xff] }
 0xc8a   : > { %v4169_v54 = vpop.f32.mrf.mxu0  ;;  %10223 = vmatpush3.msra.mxu1 %v12158_v44  ;;  %v6879_v36 = vld [vmem:[%s13852_s2 + $0x8] sm:$0xff] }
 0xc8b   : > { %v12307_v7 = vmax.f32 %v4168_v53, 0.0  ;;  %10224 = vmatprep.subr.mxu1 %v12178_v48  ;;  %v5121_v53 = vmax.f32 %v5117_v59, 0.0  ;;  %v5110_v54 = vld [vmem:[%s13847_s16] sm:$0xff] }
 0xc8c   : > { %v4172_v19 = vpop.f32.mrf.mxu0  ;;  %10225 = vmatpush3.msra.mxu1 %v12178_v48 }
 0xc8d   : > { %v4173_v20 = vadd.f32 %v4172_v19, %v4077_v2  ;;  %10219 = vmatprep.mubr.msk.f32.mxu1 %vm3079_vm11, %v12307_v7  ;;  %10279 = vmatprep.mubr.msk.f32.mxu0 %vm3079_vm11, %v12307_v7  ;;  %v5115_v2 = vadd.f32 %v5111_v23, %v5107_v16  ;;  %v5120_v19 = vmax.f32 %v5116_v14, 0.0  ;;  %v4906_v14 = vpop.permute.xlu0 %4905 }
 0xc8e   : > { %v4174_v28 = vpop.f32.mrf.mxu0  ;;  %10232 = vmatprep.subr.mxu1 %v12141_v24 }
 0xc8f   : > { %v12316_v56 = vmax.f32 %v4173_v20, 0.0  ;;  %v5114_v20 = vadd.f32 %v5110_v54, %v5106_v45  ;;  %v4880_v28 = vld [vmem:[%s13844_s26 + $0x40] sm:$0xff]  ;;  %v4901_v45 = vpop.permute.xlu1 %4900 }
 0xc91   : > { %10220 = vmatmul.mubr.msk.f32.gmra.mxu1 %vm3079_vm11, %v12316_v56  ;;  %10280 = vmatmul.mubr.msk.f32.gmra.mxu0 %vm3079_vm11, %v12316_v56 }
 0xc92   : > { %10226 = vmatprep.mubr.msk.f32.mxu1 %vm3079_vm11, %v12294_v61 }
 0xc95   : > { %10227 = vmatmul.mubr.msk.f32.vlgmr.msra.gmra.mxu1 %vm3079_vm11, %v12300_v37 }
 0xc96   : > { %10229 = vmatprep.mubr.msk.f32.mxu1 %vm3079_vm11, %v12307_v7  ;;  %10233 = vmatpush3.msra.mxu1 %v12141_v24  ;;  %v4874_v24 = vld [vmem:[%s13844_s26 + $0x10] sm:$0xff] }
 0xc97   : > { %10234 = vmatprep.subr.mxu1 %v12151_v38 }
 0xc98   : > { %10235 = vmatpush3.msra.mxu1 %v12151_v38  ;;  %v4873_v38 = vld [vmem:[%s13844_s26 + $0x8] sm:$0xff] }
 0xc99   : > { %10230 = vmatmul.mubr.msk.f32.gmra.mxu1 %vm3079_vm11, %v12316_v56  ;;  %10242 = vmatprep.subr.mxu1 %v12190_v39 }
 0xc9a   : > { %10236 = vmatprep.mubr.msk.f32.mxu1 %vm3079_vm11, %v12294_v61  ;;  %4985 = vmatprep.mubr.f32.mxu0 %v4873_v38  ;;  %v5119_v38 = vmax.f32 %v5115_v2, 0.0 }
 0xc9d   : > { %10237 = vmatmul.mubr.msk.f32.vlgmr.msra.gmra.mxu1 %vm3079_vm11, %v12300_v37 }
 0xc9e   : > { %10239 = vmatprep.mubr.msk.f32.mxu1 %vm3079_vm11, %v12307_v7  ;;  %10243 = vmatpush3.msra.mxu1 %v12190_v39 }
 0xc9f   : > { %10244 = vmatprep.subr.mxu1 %v12206_v42 }
 0xca0   : > { %10245 = vmatpush3.msra.mxu1 %v12206_v42 }
 0xca1   : > { %10240 = vmatmul.mubr.msk.f32.gmra.mxu1 %vm3079_vm11, %v12316_v56  ;;  %10252 = vmatprep.subr.mxu1 %v12161_v46 }
 0xca2   : > { %10246 = vmatprep.mubr.msk.f32.mxu1 %vm3079_vm11, %v12294_v61 }
 0xca5   : > { %10247 = vmatmul.mubr.msk.f32.vlgmr.msra.gmra.mxu1 %vm3079_vm11, %v12300_v37 }
 0xca6   : > { %10249 = vmatprep.mubr.msk.f32.mxu1 %vm3079_vm11, %v12307_v7  ;;  %10253 = vmatpush3.msra.mxu1 %v12161_v46 }
 0xca7   : > { %10254 = vmatprep.subr.mxu1 %v12181_v47 }
 0xca8   : > { %10255 = vmatpush3.msra.mxu1 %v12181_v47 }
 0xca9   : > { %10250 = vmatmul.mubr.msk.f32.gmra.mxu1 %vm3079_vm11, %v12316_v56  ;;  %10262 = vmatprep.subr.mxu1 %v12218_v4 }
 0xcaa   : > { %10256 = vmatprep.mubr.msk.f32.mxu1 %vm3079_vm11, %v12294_v61 }
 0xcad   : > { %10257 = vmatmul.mubr.msk.f32.vlgmr.msra.gmra.mxu1 %vm3079_vm11, %v12300_v37 }
 0xcae   : > { %10259 = vmatprep.mubr.msk.f32.mxu1 %vm3079_vm11, %v12307_v7  ;;  %10263 = vmatpush3.msra.mxu1 %v12218_v4 }
 0xcaf   : > { %10264 = vmatprep.subr.mxu1 %v12225_v5 }
 0xcb0   : > { %10265 = vmatpush3.msra.mxu1 %v12225_v5 }
 0xcb1   : > { %10260 = vmatmul.mubr.msk.f32.gmra.mxu1 %vm3079_vm11, %v12316_v56  ;;  %10282 = vmatprep.subr.mxu1 %v12234_v6 }
 0xcb2   : > { %10266 = vmatprep.mubr.msk.f32.mxu1 %vm3079_vm11, %v12294_v61 }
 0xcb5   : > { %10267 = vmatmul.mubr.msk.f32.vlgmr.msra.gmra.mxu1 %vm3079_vm11, %v12300_v37 }
 0xcb6   : > { %10269 = vmatprep.mubr.msk.f32.mxu1 %vm3079_vm11, %v12307_v7  ;;  %10283 = vmatpush3.msra.mxu1 %v12234_v6 }
 0xcb7   : > { %10284 = vmatprep.subr.mxu1 %v12241_v10 }
 0xcb8   : > { %10285 = vmatpush3.msra.mxu1 %v12241_v10 }
 0xcb9   : > { %10270 = vmatmul.mubr.msk.f32.gmra.mxu1 %vm3079_vm11, %v12316_v56 }
 0xcba   : > { %10286 = vmatprep.mubr.msk.f32.mxu1 %vm3079_vm11, %v12294_v61 }
 0xcbd   : > { %10287 = vmatmul.mubr.msk.f32.vlgmr.msra.gmra.mxu1 %vm3079_vm11, %v12300_v37 }
 0xcbe   : > { %10289 = vmatprep.mubr.msk.f32.mxu1 %vm3079_vm11, %v12307_v7 }
 0xcc1   : > { %10290 = vmatmul.mubr.msk.f32.gmra.mxu1 %vm3079_vm11, %v12316_v56 }
 0xcc2   : > { %10300 = vmatprep.mubr.msk.f32.mxu1 %vm4908_vm12, %v4874_v24  ;;  %v4883_v24 = vld [vmem:[%s13844_s26 + $0x58] sm:$0xff] }
 0xd49   : > { %v12392_v44 = vpop.f32.mrf.mxu1  ;;  %v10278_v46 = vpop.f32.mrf.mxu0 }
 0xd4b   : > { %v12394_v0 = vpop.f32.mrf.mxu1  ;;  %v4768_v48 = vpop.f32.mrf.mxu0 }
 0xd51   : > { %v12396_v47 = vpop.f32.mrf.mxu1  ;;  %v10281_v39 = vpop.f32.mrf.mxu0 }
 0xd52   : > { %9406 = vmatprep.subr.mxu0 %v10281_v39  ;;  %v4879_v39 = vld [vmem:[%s13844_s26 + $0x38] sm:$0xff] }
 0xd53   : > { %v12398_v17 = vpop.f32.mrf.mxu1  ;;  %v4778_v27 = vpop.f32.mrf.mxu0 }
 0xd55   : > { %v12400_v42 = vpop.f32.mrf.mxu1 }
 0xd57   : > { %v12402_v43 = vpop.f32.mrf.mxu1 }
 0xd59   : > { %v10231_v4 = vpop.f32.mrf.mxu1 }
 0xd5b   : > { %v4353_v5 = vpop.f32.mrf.mxu1 }
 0xd5d   : > { %v10238_v6 = vpop.f32.mrf.mxu1 }
 0xd5f   : > { %v4428_v10 = vpop.f32.mrf.mxu1 }
 0xd61   : > { %v10241_v11 = vpop.f32.mrf.mxu1 }
 0xd63   : > { %v4438_v12 = vpop.f32.mrf.mxu1 }
 0xd65   : > { %v10248_v18 = vpop.f32.mrf.mxu1 }
 0xd67   : > { %v4513_v22 = vpop.f32.mrf.mxu1 }
 0xd69   : > { %v10251_v26 = vpop.f32.mrf.mxu1 }
 0xd6a   : > { %9407 = vmatpush3.msra.mxu0 %v10251_v26 }
 0xd6b   : > { %v4523_v8 = vpop.f32.mrf.mxu1  ;;  %9408 = vmatprep.subr.mxu0 %v4778_v27  ;;  %v5127_v27 = vld [vmem:[%s13849_s15 + $0x8] sm:$0xff] }
 0xd6c   : > { %9409 = vmatpush3.msra.mxu0 %v4523_v8 }
 0xd6d   : > { %v10258_v9 = vpop.f32.mrf.mxu1  ;;  %9410 = vmatprep.subr.mxu0 %v10278_v46  ;;  %v4872_v46 = vld [vmem:[%s13844_s26] sm:$0xff] }
 0xd6e   : > { %9411 = vmatpush3.msra.mxu0 %v10248_v18 }
 0xd6f   : > { %v4598_v29 = vpop.f32.mrf.mxu1  ;;  %9412 = vmatprep.subr.mxu0 %v4768_v48  ;;  %v5123_v48 = vld [vmem:[%s13848_s1 + $0x8] sm:$0xff] }
 0xd70   : > { %9413 = vmatpush3.msra.mxu0 %v4513_v22  ;;  %v5128_v22 = vld [vmem:[%s13849_s15 + $0x10] sm:$0xff] }
 0xd71   : > { %v10261_v30 = vpop.f32.mrf.mxu1 }
 0xd73   : > { %v4608_v31 = vpop.f32.mrf.mxu1 }
 0xd75   : > { %v10268_v32 = vpop.f32.mrf.mxu1 }
 0xd77   : > { %v4683_v33 = vpop.f32.mrf.mxu1 }
 0xd79   : > { %v10271_v34 = vpop.f32.mrf.mxu1 }
 0xd7a   : > { %9414 = vmatprep.subr.mxu0 %v10271_v34  ;;  %v5728_v34 = vld [vmem:[%s13851_s10 + $0x8] sm:$0xff] }
 0xd7b   : > { %v4693_v35 = vpop.f32.mrf.mxu1  ;;  %9415 = vmatpush3.msra.mxu0 %v10241_v11 }
 0xd7c   : > { %9416 = vmatprep.subr.mxu0 %v4693_v35  ;;  %v6878_v35 = vld [vmem:[%s13852_s2] sm:$0xff]  ;;  %s13859_s2 = smov 1  }
 0xd7d   : > { %v10288_v41 = vpop.f32.mrf.mxu1  ;;  %9417 = vmatpush3.msra.mxu0 %v4438_v12  ;;  %v5129_v12 = vld [vmem:[%s13849_s15 + $0x18] sm:$0xff] }
 0xd7e   : > { %9418 = vmatprep.subr.mxu0 %v10268_v32  ;;  %v5251_v32 = vld [vmem:[%s13850_s11] sm:$0xff] }
 0xd7f   : > { %v4853_v50 = vpop.f32.mrf.mxu1  ;;  %9419 = vmatpush3.msra.mxu0 %v10238_v6 }
 0xd80   : > { %9420 = vmatprep.subr.mxu0 %v4683_v33  ;;  %v5727_v33 = vld [vmem:[%s13851_s10] sm:$0xff]  ;;  %s13978_s10 = sld [smem:[#allocation26_spill]] }
 0xd81   : > { %v10291_v60 = vpop.f32.mrf.mxu1  ;;  %9421 = vmatpush3.msra.mxu0 %v4428_v10 }
 0xd82   : > { %9422 = vmatprep.subr.mxu0 %v10261_v30  ;;  %10292 = vmatprep.subr.mxu1 %v10291_v60 }
 0xd83   : > { %v4863_v13 = vpop.f32.mrf.mxu1  ;;  %9423 = vmatpush3.msra.mxu0 %v10231_v4  ;;  %10293 = vmatpush3.msra.mxu1 %v10291_v60 }
 0xd84   : > { %9424 = vmatprep.subr.mxu0 %v4608_v31  ;;  %10294 = vmatprep.subr.mxu1 %v4863_v13 }
 0xd85   : > { %9425 = vmatpush3.msra.mxu0 %v4353_v5  ;;  %10295 = vmatpush3.msra.mxu1 %v4863_v13 }
 0xd86   : > { %9426 = vmatprep.subr.mxu0 %v10258_v9  ;;  %10296 = vmatprep.subr.mxu1 %v10288_v41 }
 0xd87   : > { %9427 = vmatpush3.msra.mxu0 %v12400_v42  ;;  %10297 = vmatpush3.msra.mxu1 %v10288_v41  ;;  %v4881_v42 = vld [vmem:[%s13844_s26 + $0x48] sm:$0xff]  ;;  %v7658_v41 = vld [vmem:[%s13853_s28] sm:$0xff] }
 0xd88   : > { %9428 = vmatprep.subr.mxu0 %v4598_v29  ;;  %10298 = vmatprep.subr.mxu1 %v4853_v50  ;;  %v5126_v29 = vld [vmem:[%s13849_s15] sm:$0xff] }
 0xd89   : > { %9429 = vmatpush3.msra.mxu0 %v12402_v43  ;;  %10299 = vmatpush3.msra.mxu1 %v4853_v50  ;;  %v13856_v50 = vld [vmem:[#allocation47_spill] sm:$0xff] }
 0xd8a   : > { %9430 = vmatprep.subr.mxu0 %v12316_v56  ;;  %10301 = vmatmul.mubr.msk.f32.vlgmr.msra.gmra.mxu1 %vm4908_vm12, %v4877_v51  ;;  %v5118_v56 = vmax.f32 %v5114_v20, 0.0 }
 0xd8b   : > { %10306 = vmatprep.subr.mxu1 %v5121_v53  ;;  %9431 = vmatpush3.msra.mxu0 %v12396_v47  ;;  %v5124_v47 = vld [vmem:[%s13848_s1 + $0x10] sm:$0xff] }
 0xd8c   : > { %10307 = vmatpush3.msra.mxu1 %v5121_v53  ;;  %9432 = vmatprep.subr.mxu0 %v12307_v7  ;;  %v5122_v7 = vld [vmem:[%s13848_s1] sm:$0xff] }
 0xd8d   : > { %10308 = vmatprep.subr.mxu1 %v5120_v19  ;;  %9433 = vmatpush3.msra.mxu0 %v12398_v17  ;;  %v4882_v17 = vld [vmem:[%s13844_s26 + $0x50] sm:$0xff] }
 0xd8e   : > { %10303 = vmatprep.mubr.msk.f32.mxu1 %vm4908_vm12, %v4880_v28  ;;  %10309 = vmatpush3.msra.mxu1 %v5120_v19  ;;  %v4896_v19 = vpop.permute.xlu0 %4895 }
 0xd8f   : > { %9434 = vmatprep.subr.mxu0 %v12300_v37  ;;  %10304 = vmatmul.mubr.msk.f32.gmra.mxu1 %vm4908_vm12, %v4883_v24  ;;  %v4876_v37 = vld [vmem:[%s13844_s26 + $0x20] sm:$0xff]  ;;  %v4891_v24 = vpop.permute.xlu1 %4890 }
 0xd90   : > { %10310 = vmatprep.subr.mxu1 %v5119_v38  ;;  %9435 = vmatpush3.msra.mxu0 %v12392_v44  ;;  %v5125_v44 = vld [vmem:[%s13848_s1 + $0x18] sm:$0xff]  ;;  %s13855_s1 = smov 112  }
 0xd91   : > { %10311 = vmatpush3.msra.mxu1 %v5119_v38  ;;  %9436 = vmatprep.subr.mxu0 %v12294_v61  ;;  %v4875_v61 = vld [vmem:[%s13844_s26 + $0x18] sm:$0xff] }
 0xd92   : > { %10312 = vmatprep.subr.mxu1 %v5118_v56  ;;  %9437 = vmatpush3.msra.mxu0 %v12394_v0  ;;  %v4878_v0 = vld [vmem:[%s13844_s26 + $0x30] sm:$0xff] }
 0xd93   : > { %10313 = vmatpush3.msra.mxu1 %v5118_v56  ;;  %10314 = vmatprep.mubr.msk.f32.mxu1 %vm4908_vm12, %v5122_v7 }
 0xd94   : > { %4986 = vmatmul.mubr.f32.vlgmr.msra.gmra.mxu0 %v4872_v46  ;;  %10315 = vmatmul.mubr.msk.f32.vlgmr.msra.gmra.mxu1 %vm4908_vm12, %v5123_v48 }
 0xd95   : > { %4990 = vmatprep.mubr.f32.mxu0 %v4876_v37  ;;  %10317 = vmatprep.mubr.msk.f32.mxu1 %vm4908_vm12, %v5124_v47 }
 0xd98   : > { %4991 = vmatmul.mubr.f32.gmra.mxu0 %v4875_v61  ;;  %10318 = vmatmul.mubr.msk.f32.gmra.mxu1 %vm4908_vm12, %v5125_v44 }
 0xd99   : > { %4995 = vmatprep.mubr.f32.mxu0 %v4879_v39  ;;  %10328 = vmatprep.mubr.msk.f32.mxu1 %vm4908_vm12, %v5251_v32 }
 0xd9c   : > { %4996 = vmatmul.mubr.f32.gmra.mxu0 %v4878_v0 }
 0xd9d   : > { %5000 = vmatprep.mubr.f32.mxu0 %v4882_v17 }
 0xda0   : > { %5001 = vmatmul.mubr.f32.gmra.mxu0 %v4881_v42 }
 0xe4a   : > { %v12445_v43 = vpop.f32.mrf.mxu1 }
 0xe4c   : > { %v12447_v4 = vpop.f32.mrf.mxu1 }
 0xe4f   : > { %v12449_v5 = vpop.f32.mrf.mxu1 }
 0xe51   : > { %v12451_v6 = vpop.f32.mrf.mxu1 }
 0xe54   : > { %v10316_v10 = vpop.f32.mrf.mxu1  ;;  %v9438_v58 = vpop.f32.mrf.mxu0 }
 0xe55   : > { %v5214_v30 = vadd.f32 %v10316_v10, %v5127_v27  ;;  %v5255_v27 = vld [vmem:[%s13850_s11 + $0x20] sm:$0xff] }
 0xe56   : > { %v5208_v11 = vpop.f32.mrf.mxu1  ;;  %v9439_v60 = vpop.f32.mrf.mxu0 }
 0xe57   : > { %v5209_v31 = vadd.f32 %v5208_v11, %v5126_v29  ;;  %v9440_v54 = vadd.f32 %v9439_v60, %v9438_v58  ;;  %v8971_v11 = vld [vmem:[%s11206_s30 + $0x18] sm:$0xff]  ;;  %v5256_v29 = vld [vmem:[%s13850_s11 + $0x28] sm:$0xff]  ;;  %v8976_v60 = vld [vmem:[%s11206_s30 + $0x20] sm:$0xff] }
 0xe58   : > { %v10319_v18 = vpop.f32.mrf.mxu1  ;;  %v9441_v1 = vpop.f32.mrf.mxu0  ;;  %v5389_v58 = vld [vmem:[%s11206_s30 + $0x8] sm:$0xff] }
 0xe59   : > { %v5224_v26 = vadd.f32 %v10319_v18, %v5129_v12  ;;  %v4988_v38 = vadd.f32 %v9440_v54, %v4891_v24  ;;  %v5253_v12 = vld [vmem:[%s13850_s11 + $0x10] sm:$0xff]  ;;  %v12578_v24 = vld [vmem:[%s13794_s4 + $0x68] sm:$0xff] }
 0xe5a   : > { %v5218_v8 = vpop.f32.mrf.mxu1  ;;  %v9442_v25 = vpop.f32.mrf.mxu0  ;;  %v12552_v54 = vld [vmem:[%s13794_s4 + $0x30] sm:$0xff] }
 0xe5b   : > { %v5219_v9 = vadd.f32 %v5218_v8, %v5128_v22  ;;  %5244 = vperm.xlu0 %10884, %v5224_v26   ;;  %v9443_v51 = vadd.f32 %v9442_v25, %v9441_v1  ;;  %v5073_v61 = vadd.f32 %v12447_v4, %v4988_v38  ;;  %v5252_v4 = vld [vmem:[%s13850_s11 + $0x8] sm:$0xff]  ;;  %v5254_v26 = vld [vmem:[%s13850_s11 + $0x18] sm:$0xff] }
 0xe5c   : > { %v9444_v57 = vpop.f32.mrf.mxu0  ;;  %v12538_v1 = vld [vmem:[%s13794_s4 + $0x38] sm:$0xff] }
 0xe5d   : > { %5239 = vperm.xlu1 %10890, %v5219_v9   ;;  %v4993_v20 = vadd.f32 %v9443_v51, %v4896_v19  ;;  %v8980_v51 = vld [vmem:[%s11206_s30 + $0x30] sm:$0xff]  ;;  %v12564_v19 = vld [vmem:[%s13794_s4 + $0x28] sm:$0xff]  ;;  %v12584_v38 = vld [vmem:[%s13794_s4 + $0x18] sm:$0xff] }
 0xe5e   : > { %v9445_v13 = vpop.f32.mrf.mxu0 }
 0xe5f   : > { %5234 = vperm.xlu0 %10884, %v5214_v30   ;;  %v9446_v23 = vadd.f32 %v9445_v13, %v9444_v57  ;;  %v5078_v46 = vadd.f32 %v12445_v43, %v4993_v20  ;;  %v5257_v30 = vld [vmem:[%s13850_s11 + $0x30] sm:$0xff] }
 0xe60   : > { %v9447_v59 = vpop.f32.mrf.mxu0  ;;  %v12568_v20 = vld [vmem:[%s13794_s4 + $0x70] sm:$0xff] }
 0xe61   : > { %5229 = vperm.xlu1 %10890, %v5209_v31   ;;  %v4998_v2 = vadd.f32 %v9446_v23, %v4901_v45  ;;  %v5092_v0 = vmax.f32 %v5078_v46, 0.0  ;;  %v8981_v23 = vld [vmem:[%s11206_s30 + $0x38] sm:$0xff] }
 0xe62   : > { %v9448_v63 = vpop.f32.mrf.mxu0  ;;  %v12598_v46 = vld [vmem:[%s13794_s4 + $0x58] sm:$0xff] }
 0xe63   : > { %5731 = vperm.xlu0 %10884, %v5727_v33   ;;  %v9449_v16 = vadd.f32 %v9448_v63, %v9447_v59  ;;  %v5083_v56 = vadd.f32 %v12451_v6, %v4998_v2  ;;  %v5258_v33 = vld [vmem:[%s13850_s11 + $0x38] sm:$0xff]  ;;  %v5388_v63 = vld [vmem:[%s11206_s30] sm:$0xff] }
 0xe64   : > { %v12559_v2 = vld [vmem:[%s13794_s4 + $0x78] sm:$0xff] }
 0xe65   : > { %5736 = vperm.xlu1 %10890, %v5728_v34   ;;  %v5003_v53 = vadd.f32 %v9449_v16, %v4906_v14  ;;  %v5093_v47 = vmax.f32 %v5083_v56, 0.0  ;;  %v12588_v56 = vld [vmem:[%s13794_s4 + $0x60] sm:$0xff] }
 0xe67   : > { %6882 = vperm.xlu0 %10884, %v6878_v35   ;;  %v5088_v28 = vadd.f32 %v12449_v5, %v5003_v53  ;;  %v5091_v5 = vmax.f32 %v5073_v61, 0.0  ;;  %v12618_v61 = vld [vmem:[%s13794_s4 + $0x48] sm:$0xff] }
 0xe69   : > { %6887 = vperm.xlu1 %10890, %v6879_v36   ;;  %v5094_v7 = vmax.f32 %v5088_v28, 0.0  ;;  %v12574_v28 = vld [vmem:[%s13794_s4 + $0x20] sm:$0xff]  ;;  %v12843_v36 = vld [vmem:[%s13794_s4 + $0x1e8] sm:$0xff] }
 0xe6a   : > { %13894 = vst [vmem:[#allocation81_spill] sm:$0xff] %v12843_v36 }
 0xe6b   : > { %7667 = vperm.xlu0 %10884, %v7659_v40  }
 0xe6d   : > { %7662 = vperm.xlu1 %10890, %v7658_v41   ;;  %v8977_v41 = vld [vmem:[%s11206_s30 + $0x28] sm:$0xff] }
 0xe6e   : > { %10354 = vmatprep.subr.mxu0 %v8977_v41 }
 0xe6f   : > { %8224 = vperm.xlu0 %10884, %v8221_v49   ;;  %10355 = vmatpush3.msra.mxu0 %v8977_v41  ;;  %v8970_v49 = vld [vmem:[%s11206_s30 + $0x10] sm:$0xff] }
 0xe70   : > { %10356 = vmatprep.subr.mxu0 %v8976_v60 }
 0xe71   : > { %8335 = vrot.lane.b32.xlu1 %v13856_v50, %s13855_s1  ;;  %10357 = vmatpush3.msra.mxu0 %v8976_v60  ;;  %v12667_v60 = vld [vmem:[%s13794_s4 + $0xa8] sm:$0xff] }
 0xe72   : > { %10368 = vmatprep.subr.mxu0 %v12538_v1 }
 0xe73   : > { %8337 = vrot.lane.b32.xlu0 %v13857_v52, %s13855_s1 }
 0xe75   : > { %8327 = vrot.lane.b32.xlu1 %v13856_v50, %s13858_s3 }
 0xe77   : > { %8329 = vrot.lane.b32.xlu0 %v13857_v52, %s13858_s3 }
 0xe79   : > { %8317 = vrot.lane.b32.xlu1 %v13856_v50, %s13859_s2 }
 0xe7b   : > { %8319 = vrot.lane.b32.xlu0 %v13857_v52, %s13859_s2 }
 0xe7d   : > { %8309 = vrot.lane.b32.xlu1 %v13856_v50, %s13860_s0 }
 0xe7f   : > { %8311 = vrot.lane.b32.xlu0 %v13857_v52, %s13860_s0 }
 0xe81   : > { %8301 = vrot.lane.b32.xlu1 %v13856_v50, %s13861_s5 }
 0xe83   : > { %8303 = vrot.lane.b32.xlu0 %v13857_v52, %s13861_s5 }
 0xe85   : > { %8293 = vrot.lane.b32.xlu1 %v13856_v50, %s13862_s6  ;;  %v12809_v50 = vld [vmem:[%s13794_s4 + $0x180] sm:$0xff] }
 0xe86   : > { %13889 = vst [vmem:[#allocation76_spill] sm:$0xff] %v12809_v50 }
 0xe87   : > { %8295 = vrot.lane.b32.xlu0 %v13857_v52, %s13862_s6  ;;  %v12805_v52 = vld [vmem:[%s13794_s4 + $0x140] sm:$0xff] }
 0xe88   : > { %13888 = vst [vmem:[#allocation75_spill] sm:$0xff] %v12805_v52 }
 0xed6   : > { %v5245_v48 = vpop.permute.xlu0 %5244 }
 0xed7   : > { %v5250_v37 = vadd.f32 %v5245_v48, %v5094_v7  ;;  %v12594_v7 = vld [vmem:[%s13794_s4 + $0x10] sm:$0xff]  ;;  %v12604_v48 = vld [vmem:[%s13794_s4 + $0x8] sm:$0xff] }
 0xed8   : > { %v5240_v44 = vpop.permute.xlu1 %5239 }
 0xed9   : > { %v5249_v39 = vadd.f32 %v5240_v44, %v5093_v47  ;;  %10320 = vmatprep.subr.mxu1 %v5250_v37  ;;  %v12614_v47 = vld [vmem:[%s13794_s4] sm:$0xff]  ;;  %v12624_v44 = vld [vmem:[%s13794_s4 + $0xb8] sm:$0xff] }
 0xeda   : > { %10321 = vmatpush3.msra.mxu1 %v5250_v37  ;;  %v5235_v17 = vpop.permute.xlu0 %5234  ;;  %v12608_v37 = vld [vmem:[%s13794_s4 + $0x50] sm:$0xff] }
 0xedb   : > { %v5248_v42 = vadd.f32 %v5235_v17, %v5092_v0  ;;  %10322 = vmatprep.subr.mxu1 %v5249_v39  ;;  %v12633_v0 = vld [vmem:[%s13794_s4 + $0xf8] sm:$0xff] }
 0xedc   : > { %v5230_v6 = vpop.permute.xlu1 %5229  ;;  %10323 = vmatpush3.msra.mxu1 %v5249_v39  ;;  %v12628_v39 = vld [vmem:[%s13794_s4 + $0x40] sm:$0xff] }
 0xedd   : > { %v5247_v43 = vadd.f32 %v5230_v6, %v5091_v5  ;;  %10324 = vmatprep.subr.mxu1 %v5248_v42 }
 0xede   : > { %v12494_v10 = vpop.permute.xlu0 %5731  ;;  %10325 = vmatpush3.msra.mxu1 %v5248_v42 }
 0xedf   : > { %10326 = vmatprep.subr.mxu1 %v5247_v43 }
 0xee0   : > { %v12499_v18 = vpop.permute.xlu1 %5736  ;;  %10327 = vmatpush3.msra.mxu1 %v5247_v43 }
 0xee1   : > { %10329 = vmatmul.mubr.msk.f32.vlgmr.msra.gmra.mxu1 %vm4908_vm12, %v5252_v4  ;;  %10340 = vmatprep.subr.mxu1 %v8971_v11 }
 0xee2   : > { %v12502_v22 = vpop.permute.xlu0 %6882  ;;  %10331 = vmatprep.mubr.msk.f32.mxu1 %vm4908_vm12, %v5253_v12  ;;  %10341 = vmatpush3.msra.mxu1 %v8971_v11 }
 0xee3   : > { %10342 = vmatprep.subr.mxu1 %v8970_v49 }
 0xee4   : > { %v12507_v8 = vpop.permute.xlu1 %6887  ;;  %10343 = vmatpush3.msra.mxu1 %v8970_v49 }
 0xee5   : > { %10332 = vmatmul.mubr.msk.f32.gmra.mxu1 %vm4908_vm12, %v5254_v26  ;;  %10347 = vmatprep.subr.mxu1 %v5389_v58 }
 0xee6   : > { %v12510_v9 = vpop.permute.xlu0 %7667  ;;  %10334 = vmatprep.mubr.msk.f32.mxu1 %vm4908_vm12, %v5255_v27 }
 0xee7   : > { %13863 = vst [vmem:[#allocation51_spill] sm:$0xff] %v12510_v9  ;;  %v12833_v9 = vld [vmem:[%s13794_s4 + $0x1f0] sm:$0xff] }
 0xee8   : > { %v12515_v31 = vpop.permute.xlu1 %7662  ;;  %13892 = vst [vmem:[#allocation79_spill] sm:$0xff] %v12833_v9 }
 0xee9   : > { %13864 = vst [vmem:[#allocation52_spill] sm:$0xff] %v12515_v31  ;;  %10335 = vmatmul.mubr.msk.f32.gmra.mxu1 %vm4908_vm12, %v5256_v29  ;;  %v12837_v31 = vld [vmem:[%s13794_s4 + $0x230] sm:$0xff] }
 0xeea   : > { %v12518_v32 = vpop.permute.xlu0 %8224  ;;  %10337 = vmatprep.mubr.msk.f32.mxu1 %vm4908_vm12, %v5257_v30  ;;  %13893 = vst [vmem:[#allocation80_spill] sm:$0xff] %v12837_v31 }
 0xeeb   : > { %13865 = vst [vmem:[#allocation53_spill] sm:$0xff] %v12518_v32  ;;  %v12819_v32 = vld [vmem:[%s13794_s4 + $0x1f8] sm:$0xff] }
 0xeec   : > { %v12523_v34 = vpop.permute.xlu1 %8335  ;;  %13890 = vst [vmem:[#allocation77_spill] sm:$0xff] %v12819_v32 }
 0xeed   : > { %10338 = vmatmul.mubr.msk.f32.gmra.mxu1 %vm4908_vm12, %v5258_v33  ;;  %13866 = vst [vmem:[#allocation54_spill] sm:$0xff] %v12523_v34 }
 0xeee   : > { %v12525_v35 = vpop.permute.xlu0 %8337 }
 0xeef   : > { %13867 = vst [vmem:[#allocation55_spill] sm:$0xff] %v12525_v35  ;;  %v12531_v40 = vsel %vm1340_vm0, %v12523_v34, %v12525_v35  ;;  %v12847_v35 = vld [vmem:[%s13794_s4 + $0x228] sm:$0xff]  ;;  %v12853_v34 = vld [vmem:[%s13794_s4 + $0x1e0] sm:$0xff] }
 0xef0   : > { %13869 = vst [vmem:[#allocation56_spill] sm:$0xff] %v12531_v40  ;;  %v12823_v40 = vld [vmem:[%s13794_s4 + $0x238] sm:$0xff]  ;;  %13895 = vst [vmem:[#allocation82_spill] sm:$0xff] %v12847_v35 }
 0xef1   : > { %13891 = vst [vmem:[#allocation78_spill] sm:$0xff] %v12823_v40  ;;  %13896 = vst [vmem:[#allocation83_spill] sm:$0xff] %v12853_v34 }
 0xfa1   : > { %v10330_v25 = vpop.f32.mrf.mxu1 }
 0xfa3   : > { %v5349_v57 = vpop.f32.mrf.mxu1 }
 0xfa5   : > { %v10333_v13 = vpop.f32.mrf.mxu1 }
 0xfa7   : > { %v5359_v59 = vpop.f32.mrf.mxu1 }
 0xfa8   : > { %10344 = vmatprep.mubr.msk.f32.mxu1 %vm3079_vm11, %v5359_v59  ;;  %v12687_v59 = vld [vmem:[%s13794_s4 + $0x98] sm:$0xff] }
 0xfa9   : > { %v10336_v16 = vpop.f32.mrf.mxu1  ;;  %10345 = vmatmul.mubr.msk.f32.vlgmr.msra.gmra.mxu1 %vm3079_vm11, %v10333_v13  ;;  %v12681_v13 = vld [vmem:[%s13794_s4 + $0xe0] sm:$0xff] }
 0xfaa   : > { %10348 = vmatpush3.msra.mxu1 %v5389_v58  ;;  %10351 = vmatprep.mubr.msk.f32.mxu1 %vm3079_vm11, %v5349_v57  ;;  %v12677_v57 = vld [vmem:[%s13794_s4 + $0xa0] sm:$0xff] }
 0xfab   : > { %v5369_v14 = vpop.f32.mrf.mxu1  ;;  %10349 = vmatprep.subr.mxu1 %v5388_v63 }
 0xfac   : > { %10350 = vmatpush3.msra.mxu1 %v5388_v63  ;;  %10358 = vmatprep.mubr.msk.f32.mxu0 %vm3079_vm11, %v5369_v14  ;;  %v12691_v63 = vld [vmem:[%s13794_s4 + $0xd8] sm:$0xff]  ;;  %v12701_v14 = vld [vmem:[%s13794_s4 + $0xd0] sm:$0xff] }
 0xfad   : > { %v10339_v45 = vpop.f32.mrf.mxu1  ;;  %10352 = vmatmul.mubr.msk.f32.vlgmr.msra.gmra.mxu1 %vm3079_vm11, %v10330_v25  ;;  %10359 = vmatmul.mubr.msk.f32.vlgmr.msra.gmra.mxu0 %vm3079_vm11, %v10336_v16  ;;  %v12671_v25 = vld [vmem:[%s13794_s4 + $0xe8] sm:$0xff]  ;;  %v12697_v16 = vld [vmem:[%s13794_s4 + $0x90] sm:$0xff] }
 0xfae   : > { %10361 = vmatprep.subr.mxu1 %v8981_v23  ;;  %10369 = vmatpush3.msra.mxu0 %v12538_v1 }
 0xfaf   : > { %10362 = vmatpush3.msra.mxu1 %v8981_v23  ;;  %v5379_v53 = vpop.f32.mrf.mxu1  ;;  %10370 = vmatprep.subr.mxu0 %v12552_v54  ;;  %v12707_v23 = vld [vmem:[%s13794_s4 + $0x88] sm:$0xff] }
 0xfb0   : > { %10363 = vmatprep.subr.mxu1 %v8980_v51  ;;  %10365 = vmatprep.mubr.msk.f32.mxu1 %vm3079_vm11, %v5379_v53  ;;  %13870 = vst [vmem:[#allocation57_spill] sm:$0xff] %v12707_v23  ;;  %v12721_v53 = vld [vmem:[%s13794_s4 + $0xc0] sm:$0xff] }
 0xfb1   : > { %10364 = vmatpush3.msra.mxu1 %v8980_v51  ;;  %10371 = vmatpush3.msra.mxu0 %v12552_v54  ;;  %v12717_v51 = vld [vmem:[%s13794_s4 + $0x80] sm:$0xff]  ;;  %13873 = vst [vmem:[#allocation60_spill] sm:$0xff] %v12721_v53 }
 0xfb2   : > { %10366 = vmatmul.mubr.msk.f32.vlgmr.msra.gmra.mxu1 %vm3079_vm11, %v10339_v45  ;;  %10387 = vmatprep.subr.mxu1 %v12559_v2  ;;  %v12711_v45 = vld [vmem:[%s13794_s4 + $0xc8] sm:$0xff]  ;;  %13872 = vst [vmem:[#allocation59_spill] sm:$0xff] %v12717_v51 }
 0xfb3   : > { %10388 = vmatpush3.msra.mxu1 %v12559_v2  ;;  %10372 = vmatprep.subr.mxu0 %v12564_v19  ;;  %13871 = vst [vmem:[#allocation58_spill] sm:$0xff] %v12711_v45 }
 0xfb4   : > { %10389 = vmatprep.subr.mxu1 %v12568_v20  ;;  %10373 = vmatpush3.msra.mxu0 %v12564_v19 }
 0xfb5   : > { %10390 = vmatpush3.msra.mxu1 %v12568_v20  ;;  %10374 = vmatprep.subr.mxu0 %v12574_v28 }
 0xfb6   : > { %10391 = vmatprep.subr.mxu1 %v12578_v24  ;;  %10375 = vmatpush3.msra.mxu0 %v12574_v28 }
 0xfb7   : > { %10392 = vmatpush3.msra.mxu1 %v12578_v24  ;;  %10376 = vmatprep.subr.mxu0 %v12584_v38 }
 0xfb8   : > { %10393 = vmatprep.subr.mxu1 %v12588_v56  ;;  %10377 = vmatpush3.msra.mxu0 %v12584_v38 }
 0xfb9   : > { %10394 = vmatpush3.msra.mxu1 %v12588_v56  ;;  %10378 = vmatprep.subr.mxu0 %v12594_v7 }
 0xfba   : > { %10395 = vmatprep.subr.mxu1 %v12598_v46  ;;  %10379 = vmatpush3.msra.mxu0 %v12594_v7 }
 0xfbb   : > { %10396 = vmatpush3.msra.mxu1 %v12598_v46  ;;  %10380 = vmatprep.subr.mxu0 %v12604_v48 }
 0xfbc   : > { %10397 = vmatprep.subr.mxu1 %v12608_v37  ;;  %10381 = vmatpush3.msra.mxu0 %v12604_v48 }
 0xfbd   : > { %10398 = vmatpush3.msra.mxu1 %v12608_v37  ;;  %10382 = vmatprep.subr.mxu0 %v12614_v47 }
 0xfbe   : > { %10399 = vmatprep.subr.mxu1 %v12618_v61  ;;  %10383 = vmatpush3.msra.mxu0 %v12614_v47 }
 0xfbf   : > { %10400 = vmatpush3.msra.mxu1 %v12618_v61  ;;  %10406 = vmatprep.subr.mxu0 %v12624_v44 }
 0xfc0   : > { %10401 = vmatprep.subr.mxu1 %v12628_v39 }
 0xfc1   : > { %10402 = vmatpush3.msra.mxu1 %v12628_v39 }
 0xfc2   : > { %10425 = vmatprep.subr.mxu1 %v12633_v0 }
0x1069   : > { %v10346_v17 = vpop.f32.mrf.mxu1 }
0x106b   : > { %v5465_v42 = vpop.f32.mrf.mxu1 }
0x106d   : > { %v10353_v5 = vpop.f32.mrf.mxu1  ;;  %v10360_v6 = vpop.f32.mrf.mxu0 }
0x106e   : > { %v5552_v43 = vadd.f32 %v10353_v5, %v10346_v17  ;;  %v12731_v17 = vld [vmem:[%s13794_s4 + $0x178] sm:$0xff]  ;;  %v12745_v5 = vld [vmem:[%s13794_s4 + $0x170] sm:$0xff] }
0x106f   : > { %v5546_v4 = vpop.f32.mrf.mxu1  ;;  %v5630_v26 = vpop.f32.mrf.mxu0  ;;  %13874 = vst [vmem:[#allocation61_spill] sm:$0xff] %v12731_v17  ;;  %13876 = vst [vmem:[#allocation63_spill] sm:$0xff] %v12745_v5 }
0x1070   : > { %v5640_v11 = vadd.f32 %v10360_v6, %v5552_v43  ;;  %v5547_v12 = vadd.f32 %v5546_v4, %v5465_v42  ;;  %v12735_v42 = vld [vmem:[%s13794_s4 + $0x1b8] sm:$0xff]  ;;  %v12749_v6 = vld [vmem:[%s13794_s4 + $0x1b0] sm:$0xff]  ;;  %v12755_v43 = vld [vmem:[%s13794_s4 + $0x168] sm:$0xff] }
0x1071   : > { %13875 = vst [vmem:[#allocation62_spill] sm:$0xff] %v12735_v42  ;;  %13877 = vst [vmem:[#allocation64_spill] sm:$0xff] %v12749_v6  ;;  %v12759_v4 = vld [vmem:[%s13794_s4 + $0x1a8] sm:$0xff] }
0x1072   : > { %v5639_v27 = vadd.f32 %v5630_v26, %v5547_v12  ;;  %v10367_v29 = vpop.f32.mrf.mxu1  ;;  %13878 = vst [vmem:[#allocation65_spill] sm:$0xff] %v12755_v43  ;;  %13879 = vst [vmem:[#allocation66_spill] sm:$0xff] %v12759_v4  ;;  %v12769_v12 = vld [vmem:[%s13794_s4 + $0x1a0] sm:$0xff]  ;;  %v12775_v26 = vld [vmem:[%s13794_s4 + $0x158] sm:$0xff] }
0x1073   : > { %v5726_v30 = vadd.f32 %v10367_v29, %v5640_v11  ;;  %v12765_v11 = vld [vmem:[%s13794_s4 + $0x160] sm:$0xff]  ;;  %13881 = vst [vmem:[#allocation68_spill] sm:$0xff] %v12769_v12  ;;  %13882 = vst [vmem:[#allocation69_spill] sm:$0xff] %v12775_v26  ;;  %v12785_v29 = vld [vmem:[%s13794_s4 + $0x150] sm:$0xff] }
0x1074   : > { %v5716_v33 = vpop.f32.mrf.mxu1  ;;  %13880 = vst [vmem:[#allocation67_spill] sm:$0xff] %v12765_v11  ;;  %13884 = vst [vmem:[#allocation71_spill] sm:$0xff] %v12785_v29 }
0x1075   : > { %v5725_v41 = vadd.f32 %v5716_v33, %v5639_v27  ;;  %v12640_v58 = vadd.f32 %v12499_v18, %v5726_v30  ;;  %v12659_v18 = vld [vmem:[%s13794_s4 + $0xf0] sm:$0xff]  ;;  %v12779_v27 = vld [vmem:[%s13794_s4 + $0x198] sm:$0xff]  ;;  %v12795_v33 = vld [vmem:[%s13794_s4 + $0x148] sm:$0xff] }
0x1076   : > { %13883 = vst [vmem:[#allocation70_spill] sm:$0xff] %v12779_v27  ;;  %v12789_v30 = vld [vmem:[%s13794_s4 + $0x190] sm:$0xff]  ;;  %13886 = vst [vmem:[#allocation73_spill] sm:$0xff] %v12795_v33 }
0x1077   : > { %v12637_v49 = vadd.f32 %v12494_v10, %v5725_v41  ;;  %v12653_v10 = vld [vmem:[%s13794_s4 + $0xb0] sm:$0xff]  ;;  %13885 = vst [vmem:[#allocation72_spill] sm:$0xff] %v12789_v30  ;;  %v12799_v41 = vld [vmem:[%s13794_s4 + $0x188] sm:$0xff] }
0x1078   : > { %13887 = vst [vmem:[#allocation74_spill] sm:$0xff] %v12799_v41 }
0x1079   : > { %10384 = vmatprep.mubr.msk.f32.mxu0 %vm1733_vm10, %v12637_v49  ;;  %10403 = vmatprep.mubr.msk.f32.mxu1 %vm1733_vm10, %v12637_v49 }
0x107a   : > { %10385 = vmatmul.mubr.msk.f32.vlgmr.msra.gmra.mxu0 %vm1733_vm10, %v12640_v58  ;;  %10404 = vmatmul.mubr.msk.f32.vlgmr.msra.gmra.mxu1 %vm1733_vm10, %v12640_v58 }
0x107b   : > { %10407 = vmatpush3.msra.mxu0 %v12624_v44  ;;  %10426 = vmatpush3.msra.mxu1 %v12633_v0 }
0x107c   : > { %10408 = vmatprep.subr.mxu0 %v12653_v10  ;;  %10422 = vmatprep.mubr.msk.f32.mxu0 %vm1733_vm10, %v12637_v49 }
0x107d   : > { %10427 = vmatprep.subr.mxu1 %v12659_v18  ;;  %10441 = vmatprep.mubr.msk.f32.mxu1 %vm1733_vm10, %v12637_v49 }
0x107e   : > { %10409 = vmatpush3.msra.mxu0 %v12653_v10  ;;  %10428 = vmatpush3.msra.mxu1 %v12659_v18 }
0x107f   : > { %10410 = vmatprep.subr.mxu0 %v12667_v60  ;;  %10429 = vmatprep.subr.mxu1 %v12671_v25 }
0x1080   : > { %10411 = vmatpush3.msra.mxu0 %v12667_v60  ;;  %10430 = vmatpush3.msra.mxu1 %v12671_v25 }
0x1081   : > { %10412 = vmatprep.subr.mxu0 %v12677_v57  ;;  %10431 = vmatprep.subr.mxu1 %v12681_v13 }
0x1082   : > { %10413 = vmatpush3.msra.mxu0 %v12677_v57  ;;  %10432 = vmatpush3.msra.mxu1 %v12681_v13 }
0x1083   : > { %10414 = vmatprep.subr.mxu0 %v12687_v59  ;;  %10433 = vmatprep.subr.mxu1 %v12691_v63 }
0x1084   : > { %10415 = vmatpush3.msra.mxu0 %v12687_v59  ;;  %10434 = vmatpush3.msra.mxu1 %v12691_v63 }
0x1085   : > { %10416 = vmatprep.subr.mxu0 %v12697_v16  ;;  %10435 = vmatprep.subr.mxu1 %v12701_v14 }
0x1086   : > { %10417 = vmatpush3.msra.mxu0 %v12697_v16  ;;  %10436 = vmatpush3.msra.mxu1 %v12701_v14 }
0x1087   : > { %10418 = vmatprep.subr.mxu0 %v12707_v23  ;;  %10437 = vmatprep.subr.mxu1 %v12711_v45 }
0x1088   : > { %10419 = vmatpush3.msra.mxu0 %v12707_v23  ;;  %10438 = vmatpush3.msra.mxu1 %v12711_v45 }
0x1089   : > { %10420 = vmatprep.subr.mxu0 %v12717_v51  ;;  %10439 = vmatprep.subr.mxu1 %v12721_v53 }
0x108a   : > { %10421 = vmatpush3.msra.mxu0 %v12717_v51  ;;  %10440 = vmatpush3.msra.mxu1 %v12721_v53 }
0x108b   : > { %10423 = vmatmul.mubr.msk.f32.vlgmr.msra.gmra.mxu0 %vm1733_vm10, %v12640_v58  ;;  %10442 = vmatmul.mubr.msk.f32.vlgmr.msra.gmra.mxu1 %vm1733_vm10, %v12640_v58 }
0x108c   : > { %10444 = vmatprep.subr.mxu0 %v12731_v17  ;;  %10463 = vmatprep.subr.mxu1 %v12735_v42 }
0x108d   : > { %10445 = vmatpush3.msra.mxu0 %v12731_v17  ;;  %10460 = vmatprep.mubr.msk.f32.mxu0 %vm1733_vm10, %v12637_v49  ;;  %v12897_v17 = vld [vmem:[%s13794_s4 + $0x200] sm:$0xff] }
0x108e   : > { %10464 = vmatpush3.msra.mxu1 %v12735_v42  ;;  %10479 = vmatprep.mubr.msk.f32.mxu1 %vm1733_vm10, %v12637_v49  ;;  %13905 = vst [vmem:[#allocation92_spill] sm:$0xff] %v12897_v17 }
0x108f   : > { %10446 = vmatprep.subr.mxu0 %v12745_v5  ;;  %10465 = vmatprep.subr.mxu1 %v12749_v6 }
0x1090   : > { %10447 = vmatpush3.msra.mxu0 %v12745_v5  ;;  %10466 = vmatpush3.msra.mxu1 %v12749_v6  ;;  %v12893_v5 = vld [vmem:[%s13794_s4 + $0x1c0] sm:$0xff] }
0x1091   : > { %10448 = vmatprep.subr.mxu0 %v12755_v43  ;;  %10467 = vmatprep.subr.mxu1 %v12759_v4  ;;  %13904 = vst [vmem:[#allocation91_spill] sm:$0xff] %v12893_v5 }
0x1092   : > { %10449 = vmatpush3.msra.mxu0 %v12755_v43  ;;  %10468 = vmatpush3.msra.mxu1 %v12759_v4  ;;  %v12887_v43 = vld [vmem:[%s13794_s4 + $0x208] sm:$0xff] }
0x1093   : > { %10450 = vmatprep.subr.mxu0 %v12765_v11  ;;  %10469 = vmatprep.subr.mxu1 %v12769_v12  ;;  %13903 = vst [vmem:[#allocation90_spill] sm:$0xff] %v12887_v43 }
0x1094   : > { %10451 = vmatpush3.msra.mxu0 %v12765_v11  ;;  %10470 = vmatpush3.msra.mxu1 %v12769_v12  ;;  %v12883_v11 = vld [vmem:[%s13794_s4 + $0x1c8] sm:$0xff] }
0x1095   : > { %10452 = vmatprep.subr.mxu0 %v12775_v26  ;;  %10471 = vmatprep.subr.mxu1 %v12779_v27  ;;  %13902 = vst [vmem:[#allocation89_spill] sm:$0xff] %v12883_v11 }
0x1096   : > { %10453 = vmatpush3.msra.mxu0 %v12775_v26  ;;  %10472 = vmatpush3.msra.mxu1 %v12779_v27  ;;  %v12877_v26 = vld [vmem:[%s13794_s4 + $0x210] sm:$0xff] }
0x1097   : > { %10454 = vmatprep.subr.mxu0 %v12785_v29  ;;  %10473 = vmatprep.subr.mxu1 %v12789_v30  ;;  %13901 = vst [vmem:[#allocation88_spill] sm:$0xff] %v12877_v26 }
0x1098   : > { %10455 = vmatpush3.msra.mxu0 %v12785_v29  ;;  %10474 = vmatpush3.msra.mxu1 %v12789_v30  ;;  %v12873_v29 = vld [vmem:[%s13794_s4 + $0x1d0] sm:$0xff] }
0x1099   : > { %10456 = vmatprep.subr.mxu0 %v12795_v33  ;;  %10475 = vmatprep.subr.mxu1 %v12799_v41  ;;  %13900 = vst [vmem:[#allocation87_spill] sm:$0xff] %v12873_v29 }
0x109a   : > { %10457 = vmatpush3.msra.mxu0 %v12795_v33  ;;  %10476 = vmatpush3.msra.mxu1 %v12799_v41  ;;  %v12867_v33 = vld [vmem:[%s13794_s4 + $0x218] sm:$0xff] }
0x109b   : > { %10458 = vmatprep.subr.mxu0 %v12805_v52  ;;  %10477 = vmatprep.subr.mxu1 %v12809_v50  ;;  %13899 = vst [vmem:[#allocation86_spill] sm:$0xff] %v12867_v33 }
0x109c   : > { %10459 = vmatpush3.msra.mxu0 %v12805_v52  ;;  %10478 = vmatpush3.msra.mxu1 %v12809_v50  ;;  %v12863_v52 = vld [vmem:[%s13794_s4 + $0x1d8] sm:$0xff]  ;;  %s13906_s4 = sld [smem:[#allocation15_spill]] }
0x109d   : > { %10461 = vmatmul.mubr.msk.f32.vlgmr.msra.gmra.mxu0 %vm1733_vm10, %v12640_v58  ;;  %10480 = vmatmul.mubr.msk.f32.vlgmr.msra.gmra.mxu1 %vm1733_vm10, %v12640_v58  ;;  %13898 = vst [vmem:[#allocation85_spill] sm:$0xff] %v12863_v52 }
0x109e   : > { %10482 = vmatprep.subr.mxu0 %v12819_v32  ;;  %10501 = vmatprep.subr.mxu1 %v12823_v40 }
0x109f   : > { %10483 = vmatpush3.msra.mxu0 %v12819_v32  ;;  %10498 = vmatprep.mubr.msk.f32.mxu0 %vm1733_vm10, %v12637_v49 }
0x10a0   : > { %10502 = vmatpush3.msra.mxu1 %v12823_v40  ;;  %10517 = vmatprep.mubr.msk.f32.mxu1 %vm1733_vm10, %v12637_v49 }
0x10a1   : > { %10484 = vmatprep.subr.mxu0 %v12833_v9  ;;  %10503 = vmatprep.subr.mxu1 %v12837_v31 }
0x10a2   : > { %10485 = vmatpush3.msra.mxu0 %v12833_v9  ;;  %10504 = vmatpush3.msra.mxu1 %v12837_v31 }
0x10a3   : > { %10486 = vmatprep.subr.mxu0 %v12843_v36  ;;  %10505 = vmatprep.subr.mxu1 %v12847_v35 }
0x10a4   : > { %10487 = vmatpush3.msra.mxu0 %v12843_v36  ;;  %10506 = vmatpush3.msra.mxu1 %v12847_v35 }
0x10a5   : > { %10488 = vmatprep.subr.mxu0 %v12853_v34  ;;  %10507 = vmatprep.subr.mxu1 %v12857_v15 }
0x10a6   : > { %10489 = vmatpush3.msra.mxu0 %v12853_v34  ;;  %10508 = vmatpush3.msra.mxu1 %v12857_v15 }
0x10a7   : > { %10490 = vmatprep.subr.mxu0 %v12863_v52  ;;  %10509 = vmatprep.subr.mxu1 %v12867_v33 }
0x10a8   : > { %10491 = vmatpush3.msra.mxu0 %v12863_v52  ;;  %10510 = vmatpush3.msra.mxu1 %v12867_v33 }
0x10a9   : > { %10492 = vmatprep.subr.mxu0 %v12873_v29  ;;  %10511 = vmatprep.subr.mxu1 %v12877_v26 }
0x10aa   : > { %10493 = vmatpush3.msra.mxu0 %v12873_v29  ;;  %10512 = vmatpush3.msra.mxu1 %v12877_v26 }
0x10ab   : > { %10494 = vmatprep.subr.mxu0 %v12883_v11  ;;  %10513 = vmatprep.subr.mxu1 %v12887_v43 }
0x10ac   : > { %10495 = vmatpush3.msra.mxu0 %v12883_v11  ;;  %10514 = vmatpush3.msra.mxu1 %v12887_v43 }
0x10ad   : > { %10496 = vmatprep.subr.mxu0 %v12893_v5  ;;  %10515 = vmatprep.subr.mxu1 %v12897_v17 }
0x10ae   : > { %10497 = vmatpush3.msra.mxu0 %v12893_v5  ;;  %10516 = vmatpush3.msra.mxu1 %v12897_v17 }
0x10af   : > { %10499 = vmatmul.mubr.msk.f32.vlgmr.msra.gmra.mxu0 %vm1733_vm10, %v12640_v58  ;;  %10518 = vmatmul.mubr.msk.f32.vlgmr.msra.gmra.mxu1 %vm1733_vm10, %v12640_v58 }
0x10b0   : > { %10520 = vmatprep.subr.mxu0 %v12538_v1  ;;  %10539 = vmatprep.subr.mxu1 %v12559_v2 }
0x10b1   : > { %10521 = vmatpush3.msra.mxu0 %v12538_v1  ;;  %10536 = vmatprep.mubr.msk.f32.mxu0 %vm1733_vm10, %v12094_v62 }
0x10b2   : > { %10540 = vmatpush3.msra.mxu1 %v12559_v2  ;;  %10555 = vmatprep.mubr.msk.f32.mxu1 %vm1733_vm10, %v12094_v62 }
0x10b3   : > { %10522 = vmatprep.subr.mxu0 %v12552_v54  ;;  %10541 = vmatprep.subr.mxu1 %v12568_v20 }
0x10b4   : > { %10523 = vmatpush3.msra.mxu0 %v12552_v54  ;;  %10542 = vmatpush3.msra.mxu1 %v12568_v20 }
0x10b5   : > { %10524 = vmatprep.subr.mxu0 %v12564_v19  ;;  %10543 = vmatprep.subr.mxu1 %v12578_v24 }
0x10b6   : > { %10525 = vmatpush3.msra.mxu0 %v12564_v19  ;;  %10544 = vmatpush3.msra.mxu1 %v12578_v24 }
0x10b7   : > { %10526 = vmatprep.subr.mxu0 %v12574_v28  ;;  %10545 = vmatprep.subr.mxu1 %v12588_v56 }
0x10b8   : > { %10527 = vmatpush3.msra.mxu0 %v12574_v28  ;;  %10546 = vmatpush3.msra.mxu1 %v12588_v56 }
0x10b9   : > { %10528 = vmatprep.subr.mxu0 %v12584_v38  ;;  %10547 = vmatprep.subr.mxu1 %v12598_v46 }
0x10ba   : > { %10529 = vmatpush3.msra.mxu0 %v12584_v38  ;;  %10548 = vmatpush3.msra.mxu1 %v12598_v46 }
0x10bb   : > { %10530 = vmatprep.subr.mxu0 %v12594_v7  ;;  %10549 = vmatprep.subr.mxu1 %v12608_v37 }
0x10bc   : > { %10531 = vmatpush3.msra.mxu0 %v12594_v7  ;;  %10550 = vmatpush3.msra.mxu1 %v12608_v37 }
0x10bd   : > { %10532 = vmatprep.subr.mxu0 %v12604_v48  ;;  %10551 = vmatprep.subr.mxu1 %v12618_v61 }
0x10be   : > { %10533 = vmatpush3.msra.mxu0 %v12604_v48  ;;  %10552 = vmatpush3.msra.mxu1 %v12618_v61 }
0x10bf   : > { %10534 = vmatprep.subr.mxu0 %v12614_v47  ;;  %10553 = vmatprep.subr.mxu1 %v12628_v39 }
0x10c0   : > { %10535 = vmatpush3.msra.mxu0 %v12614_v47  ;;  %10554 = vmatpush3.msra.mxu1 %v12628_v39 }
0x10c1   : > { %10537 = vmatmul.mubr.msk.f32.vlgmr.msra.gmra.mxu0 %vm1733_vm10, %v12098_v21  ;;  %10556 = vmatmul.mubr.msk.f32.vlgmr.msra.gmra.mxu1 %vm1733_vm10, %v12098_v21 }
0x10c2   : > { %10558 = vmatprep.subr.mxu0 %v12624_v44  ;;  %10577 = vmatprep.subr.mxu1 %v12633_v0 }
0x10c3   : > { %10559 = vmatpush3.msra.mxu0 %v12624_v44  ;;  %10574 = vmatprep.mubr.msk.f32.mxu0 %vm1733_vm10, %v12094_v62 }
0x10c4   : > { %10578 = vmatpush3.msra.mxu1 %v12633_v0  ;;  %10593 = vmatprep.mubr.msk.f32.mxu1 %vm1733_vm10, %v12094_v62 }
0x10c5   : > { %10560 = vmatprep.subr.mxu0 %v12653_v10  ;;  %10579 = vmatprep.subr.mxu1 %v12659_v18 }
0x10c6   : > { %10561 = vmatpush3.msra.mxu0 %v12653_v10  ;;  %10580 = vmatpush3.msra.mxu1 %v12659_v18 }
0x10c7   : > { %10562 = vmatprep.subr.mxu0 %v12667_v60  ;;  %10581 = vmatprep.subr.mxu1 %v12671_v25 }
0x10c8   : > { %10563 = vmatpush3.msra.mxu0 %v12667_v60  ;;  %10582 = vmatpush3.msra.mxu1 %v12671_v25 }
0x10c9   : > { %10564 = vmatprep.subr.mxu0 %v12677_v57  ;;  %10583 = vmatprep.subr.mxu1 %v12681_v13 }
0x10ca   : > { %10565 = vmatpush3.msra.mxu0 %v12677_v57  ;;  %10584 = vmatpush3.msra.mxu1 %v12681_v13 }
0x10cb   : > { %10566 = vmatprep.subr.mxu0 %v12687_v59  ;;  %10585 = vmatprep.subr.mxu1 %v12691_v63 }
0x10cc   : > { %10567 = vmatpush3.msra.mxu0 %v12687_v59  ;;  %10586 = vmatpush3.msra.mxu1 %v12691_v63 }
0x10cd   : > { %10568 = vmatprep.subr.mxu0 %v12697_v16  ;;  %10587 = vmatprep.subr.mxu1 %v12701_v14 }
0x10ce   : > { %10569 = vmatpush3.msra.mxu0 %v12697_v16  ;;  %10588 = vmatpush3.msra.mxu1 %v12701_v14 }
0x10cf   : > { %10570 = vmatprep.subr.mxu0 %v12707_v23  ;;  %10589 = vmatprep.subr.mxu1 %v12711_v45 }
0x10d0   : > { %10571 = vmatpush3.msra.mxu0 %v12707_v23  ;;  %10590 = vmatpush3.msra.mxu1 %v12711_v45 }
0x10d1   : > { %10572 = vmatprep.subr.mxu0 %v12717_v51  ;;  %10591 = vmatprep.subr.mxu1 %v12721_v53 }
0x10d2   : > { %10573 = vmatpush3.msra.mxu0 %v12717_v51  ;;  %10592 = vmatpush3.msra.mxu1 %v12721_v53 }
0x10d3   : > { %10575 = vmatmul.mubr.msk.f32.vlgmr.msra.gmra.mxu0 %vm1733_vm10, %v12098_v21  ;;  %10594 = vmatmul.mubr.msk.f32.vlgmr.msra.gmra.mxu1 %vm1733_vm10, %v12098_v21 }
0x10d4   : > { %10596 = vmatprep.subr.mxu0 %v12735_v42  ;;  %10615 = vmatprep.subr.mxu1 %v12819_v32 }
0x10d5   : > { %10597 = vmatpush3.msra.mxu0 %v12735_v42  ;;  %10612 = vmatprep.mubr.msk.f32.mxu0 %vm1733_vm10, %v12094_v62 }
0x10d6   : > { %10616 = vmatpush3.msra.mxu1 %v12819_v32  ;;  %10631 = vmatprep.mubr.msk.f32.mxu1 %vm1733_vm10, %v12094_v62 }
0x10d7   : > { %10598 = vmatprep.subr.mxu0 %v12749_v6  ;;  %10617 = vmatprep.subr.mxu1 %v12833_v9 }
0x10d8   : > { %10599 = vmatpush3.msra.mxu0 %v12749_v6  ;;  %10618 = vmatpush3.msra.mxu1 %v12833_v9 }
0x10d9   : > { %10600 = vmatprep.subr.mxu0 %v12759_v4  ;;  %10619 = vmatprep.subr.mxu1 %v12843_v36 }
0x10da   : > { %10601 = vmatpush3.msra.mxu0 %v12759_v4  ;;  %10620 = vmatpush3.msra.mxu1 %v12843_v36 }
0x10db   : > { %10602 = vmatprep.subr.mxu0 %v12769_v12  ;;  %10621 = vmatprep.subr.mxu1 %v12853_v34 }
0x10dc   : > { %10603 = vmatpush3.msra.mxu0 %v12769_v12  ;;  %10622 = vmatpush3.msra.mxu1 %v12853_v34 }
0x10dd   : > { %10604 = vmatprep.subr.mxu0 %v12779_v27  ;;  %10623 = vmatprep.subr.mxu1 %v12863_v52 }
0x10de   : > { %10605 = vmatpush3.msra.mxu0 %v12779_v27  ;;  %10624 = vmatpush3.msra.mxu1 %v12863_v52 }
0x10df   : > { %10606 = vmatprep.subr.mxu0 %v12789_v30  ;;  %10625 = vmatprep.subr.mxu1 %v12873_v29 }
0x10e0   : > { %10607 = vmatpush3.msra.mxu0 %v12789_v30  ;;  %10626 = vmatpush3.msra.mxu1 %v12873_v29 }
0x10e1   : > { %10608 = vmatprep.subr.mxu0 %v12799_v41  ;;  %10627 = vmatprep.subr.mxu1 %v12883_v11 }
0x10e2   : > { %10609 = vmatpush3.msra.mxu0 %v12799_v41  ;;  %10628 = vmatpush3.msra.mxu1 %v12883_v11  ;;  %v6874_v11 = vld [vmem:[%s13906_s4 + $0x10] sm:$0xff] }
0x10e3   : > { %10610 = vmatprep.subr.mxu0 %v12809_v50  ;;  %10629 = vmatprep.subr.mxu1 %v12893_v5 }
0x10e4   : > { %10611 = vmatpush3.msra.mxu0 %v12809_v50  ;;  %10630 = vmatpush3.msra.mxu1 %v12893_v5  ;;  %v6873_v5 = vld [vmem:[%s13906_s4 + $0x8] sm:$0xff] }
0x10e5   : > { %10613 = vmatmul.mubr.msk.f32.vlgmr.msra.gmra.mxu0 %vm1733_vm10, %v12098_v21  ;;  %10632 = vmatmul.mubr.msk.f32.vlgmr.msra.gmra.mxu1 %vm1733_vm10, %v12098_v21 }
0x10e6   : > { %10634 = vmatprep.subr.mxu0 %v12823_v40  ;;  %10650 = vmatprep.mubr.msk.f32.mxu0 %vm1733_vm10, %v12094_v62 }
0x10e7   : > { %10635 = vmatpush3.msra.mxu0 %v12823_v40  ;;  %6960 = vmatprep.mubr.f32.mxu1 %v6873_v5 }
0x10e8   : > { %10636 = vmatprep.subr.mxu0 %v12837_v31 }
0x10e9   : > { %10637 = vmatpush3.msra.mxu0 %v12837_v31 }
0x10ea   : > { %10638 = vmatprep.subr.mxu0 %v12847_v35 }
0x10eb   : > { %10639 = vmatpush3.msra.mxu0 %v12847_v35 }
0x10ec   : > { %10640 = vmatprep.subr.mxu0 %v12857_v15 }
0x10ed   : > { %10641 = vmatpush3.msra.mxu0 %v12857_v15 }
0x10ee   : > { %10642 = vmatprep.subr.mxu0 %v12867_v33 }
0x10ef   : > { %10643 = vmatpush3.msra.mxu0 %v12867_v33 }
0x10f0   : > { %10644 = vmatprep.subr.mxu0 %v12877_v26 }
0x10f1   : > { %10645 = vmatpush3.msra.mxu0 %v12877_v26 }
0x10f2   : > { %10646 = vmatprep.subr.mxu0 %v12887_v43 }
0x10f3   : > { %10647 = vmatpush3.msra.mxu0 %v12887_v43 }
0x10f4   : > { %10648 = vmatprep.subr.mxu0 %v12897_v17 }
0x10f5   : > { %10649 = vmatpush3.msra.mxu0 %v12897_v17 }
0x10f6   : > { %10651 = vmatmul.mubr.msk.f32.vlgmr.msra.gmra.mxu0 %vm1733_vm10, %v12098_v21 }
0x10f7   : > { %10661 = vmatprep.mubr.msk.f32.mxu0 %vm4908_vm12, %v6874_v11 }
0x113a   : > { %v10405_v29 = vpop.f32.mrf.mxu1  ;;  %v13049_v52 = vpop.f32.mrf.mxu0 }
0x113c   : > { %v5888_v33 = vpop.f32.mrf.mxu1  ;;  %v13051_v15 = vpop.f32.mrf.mxu0 }
0x114b   : > { %v10443_v26 = vpop.f32.mrf.mxu1  ;;  %v10424_v34 = vpop.f32.mrf.mxu0 }
0x114d   : > { %v6038_v43 = vpop.f32.mrf.mxu1  ;;  %v5963_v36 = vpop.f32.mrf.mxu0 }
0x115d   : > { %v10481_v35 = vpop.f32.mrf.mxu1  ;;  %v10462_v31 = vpop.f32.mrf.mxu0 }
0x115f   : > { %v6188_v17 = vpop.f32.mrf.mxu1  ;;  %v6113_v40 = vpop.f32.mrf.mxu0 }
0x116f   : > { %v10519_v9 = vpop.f32.mrf.mxu1  ;;  %v10500_v5 = vpop.f32.mrf.mxu0 }
0x1171   : > { %v6338_v32 = vpop.f32.mrf.mxu1  ;;  %v6263_v41 = vpop.f32.mrf.mxu0 }
0x1181   : > { %v10557_v50 = vpop.f32.mrf.mxu1  ;;  %v10538_v30 = vpop.f32.mrf.mxu0 }
0x1183   : > { %v6488_v11 = vpop.f32.mrf.mxu1  ;;  %v6413_v12 = vpop.f32.mrf.mxu0 }
0x1193   : > { %v10595_v27 = vpop.f32.mrf.mxu1  ;;  %v10576_v6 = vpop.f32.mrf.mxu0 }
0x1195   : > { %v6638_v4 = vpop.f32.mrf.mxu1  ;;  %v6563_v51 = vpop.f32.mrf.mxu0 }
0x11a5   : > { %v10633_v42 = vpop.f32.mrf.mxu1  ;;  %v10614_v45 = vpop.f32.mrf.mxu0 }
0x11a6   : > { %9644 = vmatprep.subr.mxu1 %v10633_v42 }
0x11a7   : > { %v6788_v53 = vpop.f32.mrf.mxu1  ;;  %9645 = vmatpush3.msra.mxu1 %v10595_v27  ;;  %v6713_v23 = vpop.f32.mrf.mxu0 }
0x11a8   : > { %9646 = vmatprep.subr.mxu1 %v6788_v53 }
0x11a9   : > { %9647 = vmatpush3.msra.mxu1 %v6638_v4  ;;  %v13942_v4 = vld [vmem:[#allocation91_spill] sm:$0xff] }
0x11aa   : > { %9648 = vmatprep.subr.mxu1 %v10500_v5 }
0x11ab   : > { %9649 = vmatpush3.msra.mxu1 %v10443_v26  ;;  %v13944_v26 = vmov 0.0  }
0x11ac   : > { %9650 = vmatprep.subr.mxu1 %v6263_v41 }
0x11ad   : > { %9651 = vmatpush3.msra.mxu1 %v6038_v43  ;;  %v13941_v43 = vld [vmem:[#allocation90_spill] sm:$0xff] }
0x11ae   : > { %9652 = vmatprep.subr.mxu1 %v10614_v45  ;;  %v13936_v45 = vld [vmem:[#allocation86_spill] sm:$0xff] }
0x11af   : > { %9653 = vmatpush3.msra.mxu1 %v10576_v6  ;;  %v13940_v6 = vld [vmem:[#allocation89_spill] sm:$0xff] }
0x11b0   : > { %9654 = vmatprep.subr.mxu1 %v6713_v23  ;;  %v13935_v23 = vld [vmem:[#allocation85_spill] sm:$0xff] }
0x11b1   : > { %9655 = vmatpush3.msra.mxu1 %v6563_v51  ;;  %v13937_v51 = vld [vmem:[#allocation87_spill] sm:$0xff] }
0x11b2   : > { %9656 = vmatprep.subr.mxu1 %v10481_v35 }
0x11b3   : > { %9657 = vmatpush3.msra.mxu1 %v10424_v34  ;;  %v6877_v34 = vld [vmem:[%s13906_s4 + $0x28] sm:$0xff] }
0x11b4   : > { %9658 = vmatprep.subr.mxu1 %v6188_v17  ;;  %v13939_v17 = vld [vmem:[#allocation88_spill] sm:$0xff] }
0x11b5   : > { %9659 = vmatpush3.msra.mxu1 %v5963_v36 }
0x11b6   : > { %v10652_v42 = vpop.f32.mrf.mxu0  ;;  %9660 = vmatprep.subr.mxu1 %v12122_v3  ;;  %v6872_v3 = vld [vmem:[%s13906_s4] sm:$0xff] }
0x11b7   : > { %10653 = vmatprep.subr.mxu0 %v10652_v42  ;;  %9661 = vmatpush3.msra.mxu1 %v10557_v50 }
0x11b8   : > { %v6863_v53 = vpop.f32.mrf.mxu0  ;;  %10654 = vmatpush3.msra.mxu0 %v10652_v42  ;;  %9662 = vmatprep.subr.mxu1 %v12124_v55 }
0x11b9   : > { %10655 = vmatprep.subr.mxu0 %v6863_v53  ;;  %9663 = vmatpush3.msra.mxu1 %v6488_v11 }
0x11ba   : > { %10656 = vmatpush3.msra.mxu0 %v6863_v53  ;;  %9664 = vmatprep.subr.mxu1 %v10462_v31 }
0x11bb   : > { %10657 = vmatprep.subr.mxu0 %v10519_v9  ;;  %9665 = vmatpush3.msra.mxu1 %v10405_v29 }
0x11bc   : > { %10658 = vmatpush3.msra.mxu0 %v10519_v9  ;;  %9666 = vmatprep.subr.mxu1 %v6113_v40 }
0x11bd   : > { %10659 = vmatprep.subr.mxu0 %v6338_v32  ;;  %9667 = vmatpush3.msra.mxu1 %v5888_v33 }
0x11be   : > { %10660 = vmatpush3.msra.mxu0 %v6338_v32  ;;  %9668 = vmatprep.subr.mxu1 %v12098_v21  ;;  %v6876_v21 = vld [vmem:[%s13906_s4 + $0x20] sm:$0xff] }
0x11bf   : > { %9669 = vmatpush3.msra.mxu1 %v10538_v30  ;;  %10662 = vmatmul.mubr.msk.f32.vlgmr.msra.gmra.mxu0 %vm4908_vm12, %v6877_v34 }
0x11c0   : > { %9670 = vmatprep.subr.mxu1 %v12094_v62  ;;  %10664 = vmatprep.subr.mxu0 %v12538_v1  ;;  %v6875_v62 = vld [vmem:[%s13906_s4 + $0x18] sm:$0xff]  ;;  %s13938_s4 = sld [smem:[#allocation17_spill]] }
0x11c1   : > { %9671 = vmatpush3.msra.mxu1 %v6413_v12  ;;  %10665 = vmatpush3.msra.mxu0 %v12538_v1  ;;  %v13943_v12 = vld [vmem:[#allocation92_spill] sm:$0xff] }
0x11c2   : > { %9672 = vmatprep.subr.mxu1 %v12640_v58  ;;  %10666 = vmatprep.subr.mxu0 %v12552_v54  ;;  %v13924_v58 = vld [vmem:[#allocation74_spill] sm:$0xff] }
0x11c3   : > { %9673 = vmatpush3.msra.mxu1 %v13049_v52  ;;  %10667 = vmatpush3.msra.mxu0 %v12552_v54 }
0x11c4   : > { %9674 = vmatprep.subr.mxu1 %v12637_v49  ;;  %10668 = vmatprep.subr.mxu0 %v12564_v19  ;;  %v13923_v49 = vld [vmem:[#allocation73_spill] sm:$0xff] }
0x11c5   : > { %9675 = vmatpush3.msra.mxu1 %v13051_v15  ;;  %10669 = vmatpush3.msra.mxu0 %v12564_v19 }
0x11c6   : > { %6961 = vmatmul.mubr.f32.vlgmr.msra.gmra.mxu1 %v6872_v3  ;;  %10683 = vmatprep.subr.mxu1 %v12559_v2  ;;  %v7655_v27 = vld [vmem:[%s13938_s4 + $0x8] sm:$0xff] }
0x11c7   : > { %6965 = vmatprep.mubr.f32.mxu1 %v6876_v21  ;;  %10684 = vmatpush3.msra.mxu1 %v12559_v2 }
0x11c8   : > { %10685 = vmatprep.subr.mxu1 %v12568_v20  ;;  %10670 = vmatprep.subr.mxu0 %v12574_v28 }
0x11c9   : > { %10686 = vmatpush3.msra.mxu1 %v12568_v20  ;;  %10671 = vmatpush3.msra.mxu0 %v12574_v28  ;;  %v13909_v20 = vld [vmem:[#allocation59_spill] sm:$0xff]  ;;  %v13910_v28 = vld [vmem:[#allocation60_spill] sm:$0xff] }
0x11ca   : > { %6966 = vmatmul.mubr.f32.gmra.mxu1 %v6875_v62  ;;  %10687 = vmatprep.subr.mxu1 %v12578_v24 }
0x11cb   : > { %10688 = vmatpush3.msra.mxu1 %v12578_v24  ;;  %10672 = vmatprep.subr.mxu0 %v12584_v38  ;;  %v13911_v24 = vld [vmem:[#allocation61_spill] sm:$0xff] }
0x11cc   : > { %10689 = vmatprep.subr.mxu1 %v12588_v56  ;;  %10673 = vmatpush3.msra.mxu0 %v12584_v38  ;;  %v13912_v38 = vld [vmem:[#allocation62_spill] sm:$0xff] }
0x11cd   : > { %10690 = vmatpush3.msra.mxu1 %v12588_v56  ;;  %10674 = vmatprep.subr.mxu0 %v12594_v7  ;;  %v13913_v56 = vld [vmem:[#allocation63_spill] sm:$0xff] }
0x11ce   : > { %10691 = vmatprep.subr.mxu1 %v12598_v46  ;;  %10675 = vmatpush3.msra.mxu0 %v12594_v7  ;;  %v13914_v7 = vld [vmem:[#allocation64_spill] sm:$0xff] }
0x11cf   : > { %10692 = vmatpush3.msra.mxu1 %v12598_v46  ;;  %10676 = vmatprep.subr.mxu0 %v12604_v48  ;;  %v13915_v46 = vld [vmem:[#allocation65_spill] sm:$0xff] }
0x11d0   : > { %10693 = vmatprep.subr.mxu1 %v12608_v37  ;;  %10677 = vmatpush3.msra.mxu0 %v12604_v48  ;;  %v13916_v48 = vld [vmem:[#allocation66_spill] sm:$0xff] }
0x11d1   : > { %10694 = vmatpush3.msra.mxu1 %v12608_v37  ;;  %10678 = vmatprep.subr.mxu0 %v12614_v47  ;;  %v13917_v37 = vld [vmem:[#allocation67_spill] sm:$0xff] }
0x11d2   : > { %10695 = vmatprep.subr.mxu1 %v12618_v61  ;;  %10679 = vmatpush3.msra.mxu0 %v12614_v47  ;;  %v13918_v47 = vld [vmem:[#allocation68_spill] sm:$0xff] }
0x11d3   : > { %10696 = vmatpush3.msra.mxu1 %v12618_v61  ;;  %10702 = vmatprep.subr.mxu0 %v12624_v44  ;;  %v13919_v61 = vld [vmem:[#allocation69_spill] sm:$0xff] }
0x11d4   : > { %10697 = vmatprep.subr.mxu1 %v12628_v39 }
0x11d5   : > { %10698 = vmatpush3.msra.mxu1 %v12628_v39  ;;  %v13921_v39 = vld [vmem:[#allocation71_spill] sm:$0xff] }
0x11d6   : > { %10721 = vmatprep.subr.mxu1 %v12633_v0 }
0x127f   : > { %v10663_v55 = vpop.f32.mrf.mxu0 }
0x1281   : > { %v7037_v31 = vpop.f32.mrf.mxu0 }
0x1286   : > { %v9676_v15 = vpop.f32.mrf.mxu1 }
0x1288   : > { %v9677_v50 = vpop.f32.mrf.mxu1 }
0x1289   : > { %v9678_v52 = vadd.f32 %v9677_v50, %v9676_v15 }
0x128a   : > { %v9679_v9 = vpop.f32.mrf.mxu1 }
0x128b   : > { %v6963_v32 = vadd.f32 %v9678_v52, %v12502_v22  ;;  %v13907_v22 = vld [vmem:[#allocation57_spill] sm:$0xff]  ;;  %v7654_v52 = vld [vmem:[%s13938_s4] sm:$0xff] }
0x128c   : > { %v9680_v35 = vpop.f32.mrf.mxu1 }
0x128d   : > { %v9681_v36 = vadd.f32 %v9680_v35, %v9679_v9  ;;  %v7038_v40 = vadd.f32 %v7037_v31, %v6963_v32  ;;  %v9071_v9 = vld [vmem:[%s11211_s19 + $0x178] sm:$0xff]  ;;  %v9070_v32 = vld [vmem:[%s11211_s19 + $0x170] sm:$0xff] }
0x128e   : > { %v7657_v35 = vld [vmem:[%s13938_s4 + $0x18] sm:$0xff] }
0x128f   : > { %v6968_v1 = vadd.f32 %v9681_v36, %v12507_v8  ;;  %v13102_v54 = vmax.f32 %v7038_v40, 0.0  ;;  %v13908_v8 = vld [vmem:[#allocation58_spill] sm:$0xff]  ;;  %v9069_v36 = vld [vmem:[%s11211_s19 + $0x168] sm:$0xff] }
0x1290   : > { %v9068_v40 = vld [vmem:[%s11211_s19 + $0x160] sm:$0xff] }
0x1291   : > { %v7043_v2 = vadd.f32 %v10663_v55, %v6968_v1  ;;  %10680 = vmatprep.mubr.msk.f32.mxu0 %vm1733_vm10, %v13102_v54  ;;  %10699 = vmatprep.mubr.msk.f32.mxu1 %vm1733_vm10, %v13102_v54  ;;  %v7656_v1 = vld [vmem:[%s13938_s4 + $0x10] sm:$0xff]  ;;  %s13945_s4 = sld [smem:[#allocation19_spill]] }
0x1293   : > { %v13108_v19 = vmax.f32 %v7043_v2, 0.0  ;;  %v9066_v2 = vld [vmem:[%s11211_s19 + $0x150] sm:$0xff] }
0x1295   : > { %10681 = vmatmul.mubr.msk.f32.vlgmr.msra.gmra.mxu0 %vm1733_vm10, %v13108_v19  ;;  %10700 = vmatmul.mubr.msk.f32.vlgmr.msra.gmra.mxu1 %vm1733_vm10, %v13108_v19 }
0x1296   : > { %10703 = vmatpush3.msra.mxu0 %v12624_v44  ;;  %10722 = vmatpush3.msra.mxu1 %v12633_v0  ;;  %v13920_v44 = vld [vmem:[#allocation70_spill] sm:$0xff]  ;;  %v13922_v0 = vld [vmem:[#allocation72_spill] sm:$0xff] }
0x1297   : > { %10704 = vmatprep.subr.mxu0 %v12653_v10  ;;  %10718 = vmatprep.mubr.msk.f32.mxu0 %vm1733_vm10, %v13102_v54 }
0x1298   : > { %10723 = vmatprep.subr.mxu1 %v12659_v18  ;;  %10737 = vmatprep.mubr.msk.f32.mxu1 %vm1733_vm10, %v13102_v54 }
0x1299   : > { %10705 = vmatpush3.msra.mxu0 %v12653_v10  ;;  %10724 = vmatpush3.msra.mxu1 %v12659_v18  ;;  %v13925_v10 = vld [vmem:[#allocation75_spill] sm:$0xff]  ;;  %v13926_v18 = vld [vmem:[#allocation76_spill] sm:$0xff] }
0x129a   : > { %10706 = vmatprep.subr.mxu0 %v12667_v60  ;;  %10725 = vmatprep.subr.mxu1 %v12671_v25 }
0x129b   : > { %10707 = vmatpush3.msra.mxu0 %v12667_v60  ;;  %10726 = vmatpush3.msra.mxu1 %v12671_v25  ;;  %v13927_v60 = vld [vmem:[#allocation77_spill] sm:$0xff]  ;;  %v13928_v25 = vld [vmem:[#allocation78_spill] sm:$0xff] }
0x129c   : > { %10708 = vmatprep.subr.mxu0 %v12677_v57  ;;  %10727 = vmatprep.subr.mxu1 %v12681_v13 }
0x129d   : > { %10709 = vmatpush3.msra.mxu0 %v12677_v57  ;;  %10728 = vmatpush3.msra.mxu1 %v12681_v13  ;;  %v13929_v57 = vld [vmem:[#allocation79_spill] sm:$0xff]  ;;  %v13930_v13 = vld [vmem:[#allocation80_spill] sm:$0xff] }
0x129e   : > { %10710 = vmatprep.subr.mxu0 %v12687_v59  ;;  %10729 = vmatprep.subr.mxu1 %v12691_v63 }
0x129f   : > { %10711 = vmatpush3.msra.mxu0 %v12687_v59  ;;  %10730 = vmatpush3.msra.mxu1 %v12691_v63  ;;  %v13931_v59 = vld [vmem:[#allocation81_spill] sm:$0xff]  ;;  %v13932_v63 = vld [vmem:[#allocation82_spill] sm:$0xff] }
0x12a0   : > { %10712 = vmatprep.subr.mxu0 %v12697_v16  ;;  %10731 = vmatprep.subr.mxu1 %v12701_v14 }
0x12a1   : > { %10713 = vmatpush3.msra.mxu0 %v12697_v16  ;;  %10732 = vmatpush3.msra.mxu1 %v12701_v14  ;;  %v13933_v16 = vld [vmem:[#allocation83_spill] sm:$0xff]  ;;  %v13934_v14 = vld [vmem:[#allocation84_spill] sm:$0xff] }
0x12a2   : > { %10714 = vmatprep.subr.mxu0 %v13907_v22  ;;  %10733 = vmatprep.subr.mxu1 %v13908_v8 }
0x12a3   : > { %10715 = vmatpush3.msra.mxu0 %v13907_v22  ;;  %10734 = vmatpush3.msra.mxu1 %v13908_v8  ;;  %v9064_v22 = vld [vmem:[%s11211_s19 + $0x140] sm:$0xff]  ;;  %v9063_v8 = vld [vmem:[%s11211_s19 + $0x138] sm:$0xff] }
0x12a4   : > { %10716 = vmatprep.subr.mxu0 %v13909_v20  ;;  %10735 = vmatprep.subr.mxu1 %v13910_v28 }
0x12a5   : > { %10717 = vmatpush3.msra.mxu0 %v13909_v20  ;;  %10736 = vmatpush3.msra.mxu1 %v13910_v28  ;;  %v9062_v20 = vld [vmem:[%s11211_s19 + $0x130] sm:$0xff]  ;;  %v9061_v28 = vld [vmem:[%s11211_s19 + $0x128] sm:$0xff] }
0x12a6   : > { %10719 = vmatmul.mubr.msk.f32.vlgmr.msra.gmra.mxu0 %vm1733_vm10, %v13108_v19  ;;  %10738 = vmatmul.mubr.msk.f32.vlgmr.msra.gmra.mxu1 %vm1733_vm10, %v13108_v19 }
0x12a7   : > { %10740 = vmatprep.subr.mxu0 %v13911_v24  ;;  %10759 = vmatprep.subr.mxu1 %v13912_v38 }
0x12a8   : > { %10741 = vmatpush3.msra.mxu0 %v13911_v24  ;;  %10756 = vmatprep.mubr.msk.f32.mxu0 %vm1733_vm10, %v13102_v54  ;;  %v9060_v24 = vld [vmem:[%s11211_s19 + $0x120] sm:$0xff] }
0x12a9   : > { %10760 = vmatpush3.msra.mxu1 %v13912_v38  ;;  %10775 = vmatprep.mubr.msk.f32.mxu1 %vm1733_vm10, %v13102_v54  ;;  %v9059_v38 = vld [vmem:[%s11211_s19 + $0x118] sm:$0xff] }
0x12aa   : > { %10742 = vmatprep.subr.mxu0 %v13913_v56  ;;  %10761 = vmatprep.subr.mxu1 %v13914_v7 }
0x12ab   : > { %10743 = vmatpush3.msra.mxu0 %v13913_v56  ;;  %10762 = vmatpush3.msra.mxu1 %v13914_v7  ;;  %v9058_v56 = vld [vmem:[%s11211_s19 + $0x110] sm:$0xff]  ;;  %v13946_v7 = vld [vmem:[#allocation54_spill] sm:$0xff] }
0x12ac   : > { %10744 = vmatprep.subr.mxu0 %v13915_v46  ;;  %10763 = vmatprep.subr.mxu1 %v13916_v48 }
0x12ad   : > { %10745 = vmatpush3.msra.mxu0 %v13915_v46  ;;  %10764 = vmatpush3.msra.mxu1 %v13916_v48  ;;  %v13947_v46 = vld [vmem:[#allocation55_spill] sm:$0xff] }
0x12ae   : > { %10746 = vmatprep.subr.mxu0 %v13917_v37  ;;  %10765 = vmatprep.subr.mxu1 %v13918_v47 }
0x12af   : > { %10747 = vmatpush3.msra.mxu0 %v13917_v37  ;;  %10766 = vmatpush3.msra.mxu1 %v13918_v47  ;;  %v8340_v37 = vsel %vm1340_vm0, %v13947_v46, %v13946_v7  ;;  %v9057_v47 = vld [vmem:[%s11211_s19 + $0x108] sm:$0xff]  ;;  %v9085_v46 = vld [vmem:[%s11211_s19 + $0x1e0] sm:$0xff] }
0x12b0   : > { %10748 = vmatprep.subr.mxu0 %v13919_v61  ;;  %10767 = vmatprep.subr.mxu1 %v13920_v44  ;;  %v9086_v7 = vld [vmem:[%s11211_s19 + $0x1e8] sm:$0xff] }
0x12b1   : > { %10749 = vmatpush3.msra.mxu0 %v13919_v61  ;;  %10768 = vmatpush3.msra.mxu1 %v13920_v44  ;;  %v9056_v61 = vld [vmem:[%s11211_s19 + $0x100] sm:$0xff]  ;;  %v13949_v44 = vld [vmem:[#allocation33_spill] sm:$0xff] }
0x12b2   : > { %10750 = vmatprep.subr.mxu0 %v13921_v39  ;;  %10769 = vmatprep.subr.mxu1 %v13922_v0 }
0x12b3   : > { %10751 = vmatpush3.msra.mxu0 %v13921_v39  ;;  %10770 = vmatpush3.msra.mxu1 %v13922_v0  ;;  %v8342_v39 = vmul.f32 %v8340_v37, %v13949_v44  ;;  %v7753_v0 = vld [vmem:[%s13945_s4] sm:$0xff]  ;;  %v9084_v37 = vld [vmem:[%s11211_s19 + $0x1d8] sm:$0xff] }
0x12b4   : > { %10752 = vmatprep.subr.mxu0 %v13923_v49  ;;  %10771 = vmatprep.subr.mxu1 %v13924_v58 }
0x12b5   : > { %10753 = vmatpush3.msra.mxu0 %v13923_v49  ;;  %10772 = vmatpush3.msra.mxu1 %v13924_v58 }
0x12b6   : > { %10754 = vmatprep.subr.mxu0 %v13925_v10  ;;  %10773 = vmatprep.subr.mxu1 %v13926_v18 }
0x12b7   : > { %10755 = vmatpush3.msra.mxu0 %v13925_v10  ;;  %10774 = vmatpush3.msra.mxu1 %v13926_v18  ;;  %v13950_v18 = vld [vmem:[#allocation52_spill] sm:$0xff] }
0x12b8   : > { %10757 = vmatmul.mubr.msk.f32.vlgmr.msra.gmra.mxu0 %vm1733_vm10, %v13108_v19  ;;  %10776 = vmatmul.mubr.msk.f32.vlgmr.msra.gmra.mxu1 %vm1733_vm10, %v13108_v19 }
0x12b9   : > { %10778 = vmatprep.subr.mxu0 %v13927_v60  ;;  %10797 = vmatprep.subr.mxu1 %v13928_v25 }
0x12ba   : > { %10779 = vmatpush3.msra.mxu0 %v13927_v60  ;;  %10794 = vmatprep.mubr.msk.f32.mxu0 %vm1733_vm10, %v13102_v54 }
0x12bb   : > { %10798 = vmatpush3.msra.mxu1 %v13928_v25  ;;  %10813 = vmatprep.mubr.msk.f32.mxu1 %vm1733_vm10, %v13102_v54  ;;  %v13951_v25 = vld [vmem:[#allocation51_spill] sm:$0xff] }
0x12bc   : > { %10780 = vmatprep.subr.mxu0 %v13929_v57  ;;  %10799 = vmatprep.subr.mxu1 %v13930_v13 }
0x12bd   : > { %10781 = vmatpush3.msra.mxu0 %v13929_v57  ;;  %10800 = vmatpush3.msra.mxu1 %v13930_v13 }
0x12be   : > { %10782 = vmatprep.subr.mxu0 %v13931_v59  ;;  %10801 = vmatprep.subr.mxu1 %v13932_v63 }
0x12bf   : > { %10783 = vmatpush3.msra.mxu0 %v13931_v59  ;;  %10802 = vmatpush3.msra.mxu1 %v13932_v63 }
0x12c0   : > { %10784 = vmatprep.subr.mxu0 %v13933_v16  ;;  %10803 = vmatprep.subr.mxu1 %v13934_v14 }
0x12c1   : > { %10785 = vmatpush3.msra.mxu0 %v13933_v16  ;;  %10804 = vmatpush3.msra.mxu1 %v13934_v14  ;;  %v7754_v16 = vld [vmem:[%s13945_s4 + $0x8] sm:$0xff]  ;;  %v9053_v14 = vld [vmem:[%s11211_s19 + $0xf8] sm:$0xff] }
0x12c2   : > { %10786 = vmatprep.subr.mxu0 %v13935_v23  ;;  %10805 = vmatprep.subr.mxu1 %v13936_v45 }
0x12c3   : > { %10787 = vmatpush3.msra.mxu0 %v13935_v23  ;;  %10806 = vmatpush3.msra.mxu1 %v13936_v45  ;;  %v7755_v23 = vld [vmem:[%s13945_s4 + $0x10] sm:$0xff] }
0x12c4   : > { %10788 = vmatprep.subr.mxu0 %v13937_v51  ;;  %10807 = vmatprep.subr.mxu1 %v13939_v17  ;;  %v9052_v45 = vld [vmem:[%s11211_s19 + $0xf0] sm:$0xff] }
0x12c5   : > { %10789 = vmatpush3.msra.mxu0 %v13937_v51  ;;  %10808 = vmatpush3.msra.mxu1 %v13939_v17  ;;  %v9051_v51 = vld [vmem:[%s11211_s19 + $0xe8] sm:$0xff]  ;;  %v9050_v17 = vld [vmem:[%s11211_s19 + $0xe0] sm:$0xff] }
0x12c6   : > { %10790 = vmatprep.subr.mxu0 %v13940_v6  ;;  %10809 = vmatprep.subr.mxu1 %v13941_v43 }
0x12c7   : > { %10791 = vmatpush3.msra.mxu0 %v13940_v6  ;;  %10810 = vmatpush3.msra.mxu1 %v13941_v43  ;;  %v7756_v6 = vld [vmem:[%s13945_s4 + $0x18] sm:$0xff]  ;;  %s13955_s4 = sld [smem:[#allocation21_spill]] }
0x12c8   : > { %10792 = vmatprep.subr.mxu0 %v13942_v4  ;;  %10811 = vmatprep.subr.mxu1 %v13943_v12  ;;  %v9049_v43 = vld [vmem:[%s11211_s19 + $0xd8] sm:$0xff] }
0x12c9   : > { %10793 = vmatpush3.msra.mxu0 %v13942_v4  ;;  %10812 = vmatpush3.msra.mxu1 %v13943_v12  ;;  %v9048_v4 = vld [vmem:[%s11211_s19 + $0xd0] sm:$0xff]  ;;  %v9047_v12 = vld [vmem:[%s11211_s19 + $0xc8] sm:$0xff] }
0x12ca   : > { %10795 = vmatmul.mubr.msk.f32.vlgmr.msra.gmra.mxu0 %vm1733_vm10, %v13108_v19  ;;  %10814 = vmatmul.mubr.msk.f32.vlgmr.msra.gmra.mxu1 %vm1733_vm10, %v13108_v19 }
0x12cb   : > { %7676 = vmatprep.subr.mxu0 %v13944_v26  ;;  %9032 = vmatprep.mubr.msk.f32.mxu0 %vm3079_vm11, %v7655_v27  ;;  %v9046_v27 = vld [vmem:[%s11211_s19 + $0xc0] sm:$0xff] }
0x12cc   : > { %10820 = vmatprep.mubr.msk.f32.mxu1 %vm3079_vm11, %v7753_v0  ;;  %v9080_v0 = vld [vmem:[%s11211_s19 + $0x1b8] sm:$0xff] }
0x1355   : > { %v10682_v29 = vpop.f32.mrf.mxu0  ;;  %v10701_v41 = vpop.f32.mrf.mxu1 }
0x1357   : > { %v7120_v30 = vpop.f32.mrf.mxu0  ;;  %v7195_v11 = vpop.f32.mrf.mxu1 }
0x1366   : > { %v10720_v33 = vpop.f32.mrf.mxu0  ;;  %v10739_v53 = vpop.f32.mrf.mxu1 }
0x1368   : > { %v7270_v5 = vpop.f32.mrf.mxu0  ;;  %v7345_v3 = vpop.f32.mrf.mxu1 }
0x1378   : > { %v10758_v42 = vpop.f32.mrf.mxu0  ;;  %v10777_v62 = vpop.f32.mrf.mxu1 }
0x137a   : > { %v7420_v34 = vpop.f32.mrf.mxu0  ;;  %v7495_v55 = vpop.f32.mrf.mxu1 }
0x138a   : > { %v10796_v21 = vpop.f32.mrf.mxu0  ;;  %v10815_v50 = vpop.f32.mrf.mxu1 }
0x138b   : > { %7677 = vmatpush1.msra.mxu0 %v10796_v21 }
0x138c   : > { %v7570_v15 = vpop.f32.mrf.mxu0  ;;  %7678 = vmatprep.subr.mxu0 %v13944_v26  ;;  %v7645_v31 = vpop.f32.mrf.mxu1 }
0x138d   : > { %7679 = vmatpush1.msra.mxu0 %v7570_v15  ;;  %v7866_v15 = vld [vmem:[%s11211_s19 + $0x60] sm:$0xff] }
0x138e   : > { %7680 = vmatprep.subr.mxu0 %v13944_v26 }
0x138f   : > { %7681 = vmatpush1.msra.mxu0 %v10777_v62  ;;  %v7867_v62 = vld [vmem:[%s11211_s19 + $0x68] sm:$0xff] }
0x1390   : > { %7682 = vmatprep.subr.mxu0 %v13944_v26 }
0x1391   : > { %7683 = vmatpush1.msra.mxu0 %v7495_v55 }
0x1392   : > { %7684 = vmatprep.subr.mxu0 %v13944_v26 }
0x1393   : > { %7685 = vmatpush1.msra.mxu0 %v10758_v42  ;;  %v9039_v42 = vld [vmem:[%s11211_s19 + $0x88] sm:$0xff] }
0x1394   : > { %7686 = vmatprep.subr.mxu0 %v13944_v26 }
0x1395   : > { %7687 = vmatpush1.msra.mxu0 %v7420_v34  ;;  %v7869_v34 = vld [vmem:[%s11211_s19 + $0x78] sm:$0xff] }
0x1396   : > { %7688 = vmatprep.subr.mxu0 %v13944_v26 }
0x1397   : > { %7689 = vmatpush1.msra.mxu0 %v13108_v19  ;;  %v9065_v19 = vld [vmem:[%s11211_s19 + $0x148] sm:$0xff] }
0x1398   : > { %7690 = vmatprep.subr.mxu0 %v13944_v26 }
0x1399   : > { %7691 = vmatpush1.msra.mxu0 %v13102_v54  ;;  %v9067_v54 = vld [vmem:[%s11211_s19 + $0x158] sm:$0xff] }
0x139a   : > { %7692 = vmatprep.subr.mxu0 %v13944_v26 }
0x139b   : > { %7693 = vmatpush1.msra.mxu0 %v10739_v53  ;;  %v9038_v53 = vld [vmem:[%s11211_s19 + $0x80] sm:$0xff] }
0x139c   : > { %7694 = vmatprep.subr.mxu0 %v13944_v26 }
0x139d   : > { %7695 = vmatpush1.msra.mxu0 %v7345_v3  ;;  %v7868_v3 = vld [vmem:[%s11211_s19 + $0x70] sm:$0xff] }
0x139e   : > { %7696 = vmatprep.subr.mxu0 %v13944_v26 }
0x139f   : > { %7697 = vmatpush1.msra.mxu0 %v10720_v33  ;;  %v9043_v33 = vld [vmem:[%s11211_s19 + $0xa8] sm:$0xff] }
0x13a0   : > { %7698 = vmatprep.subr.mxu0 %v13944_v26 }
0x13a1   : > { %7699 = vmatpush1.msra.mxu0 %v7270_v5  ;;  %v9041_v5 = vld [vmem:[%s11211_s19 + $0x98] sm:$0xff] }
0x13a2   : > { %7700 = vmatprep.subr.mxu0 %v13944_v26 }
0x13a3   : > { %7701 = vmatpush1.msra.mxu0 %v10701_v41  ;;  %v9042_v41 = vld [vmem:[%s11211_s19 + $0xa0] sm:$0xff] }
0x13a4   : > { %7702 = vmatprep.subr.mxu0 %v13944_v26 }
0x13a5   : > { %7703 = vmatpush1.msra.mxu0 %v7195_v11  ;;  %v9040_v11 = vld [vmem:[%s11211_s19 + $0x90] sm:$0xff] }
0x13a6   : > { %7704 = vmatprep.subr.mxu0 %v13944_v26 }
0x13a7   : > { %7705 = vmatpush1.msra.mxu0 %v10682_v29  ;;  %v9045_v29 = vld [vmem:[%s11211_s19 + $0xb8] sm:$0xff] }
0x13a8   : > { %7706 = vmatprep.subr.mxu0 %v13944_v26 }
0x13a9   : > { %7707 = vmatpush1.msra.mxu0 %v7120_v30  ;;  %v9044_v30 = vld [vmem:[%s11211_s19 + $0xb0] sm:$0xff] }
0x13aa   : > { %7736 = vmatprep.subr.mxu0 %v13944_v26 }
0x13ab   : > { %7737 = vmatpush2.msra.mxu0 %v10815_v50  ;;  %v7865_v50 = vld [vmem:[%s11211_s19 + $0x58] sm:$0xff] }
0x13ac   : > { %7738 = vmatprep.subr.mxu0 %v13944_v26 }
0x13ad   : > { %7739 = vmatpush2.msra.mxu0 %v7645_v31  ;;  %v7863_v31 = vld [vmem:[%s11211_s19 + $0x48] sm:$0xff] }
0x13ae   : > { %7741 = vmatmul.mubr.f32.vlgmr.msra.gmra.mxu0 %v7654_v52  ;;  %8071 = vmatprep.subr.mxu0 %v9071_v9  ;;  %v7864_v52 = vld [vmem:[%s11211_s19 + $0x50] sm:$0xff] }
0x13af   : > { %8072 = vmatpush1.msra.mxu0 %v9070_v32  ;;  %9033 = vmatprep.mubr.msk.f32.mxu0 %vm3079_vm11, %v7657_v35  ;;  %v7862_v32 = vld [vmem:[%s11211_s19 + $0x40] sm:$0xff]  ;;  %v13952_v35 = vld [vmem:[#allocation35_spill] sm:$0xff] }
0x13b0   : > { %8073 = vmatprep.subr.mxu0 %v9069_v36  ;;  %v13953_v36 = vld [vmem:[#allocation56_spill] sm:$0xff] }
0x13b1   : > { %8074 = vmatpush1.msra.mxu0 %v9068_v40  ;;  %v8341_v40 = vmul.f32 %v13953_v36, %v13952_v35 }
0x13b2   : > { %7746 = vmatmul.mubr.f32.gmra.mxu0 %v7656_v1  ;;  %8075 = vmatprep.subr.mxu0 %v9067_v54  ;;  %v7861_v54 = vld [vmem:[%s11211_s19 + $0x38] sm:$0xff] }
0x13b3   : > { %8076 = vmatpush1.msra.mxu0 %v9066_v2  ;;  %8119 = vmatprep.mubr.f32.mxu0 %v13944_v26  ;;  %v7860_v2 = vld [vmem:[%s11211_s19 + $0x30] sm:$0xff] }
0x13b4   : > { %8077 = vmatprep.subr.mxu0 %v9065_v19  ;;  %v7859_v19 = vld [vmem:[%s11211_s19 + $0x28] sm:$0xff] }
0x13b5   : > { %8078 = vmatpush1.msra.mxu0 %v9064_v22  ;;  %v7858_v22 = vld [vmem:[%s11211_s19 + $0x20] sm:$0xff] }
0x13b6   : > { %8079 = vmatprep.subr.mxu0 %v9063_v8  ;;  %v7857_v8 = vld [vmem:[%s11211_s19 + $0x18] sm:$0xff] }
0x13b7   : > { %8080 = vmatpush1.msra.mxu0 %v9062_v20  ;;  %v7856_v20 = vld [vmem:[%s11211_s19 + $0x10] sm:$0xff] }
0x13b8   : > { %8081 = vmatprep.subr.mxu0 %v9061_v28  ;;  %v7855_v28 = vld [vmem:[%s11211_s19 + $0x8] sm:$0xff] }
0x13b9   : > { %8082 = vmatpush1.msra.mxu0 %v9060_v24  ;;  %v7854_v24 = vld [vmem:[%s11211_s19] sm:$0xff] }
0x13ba   : > { %8083 = vmatprep.subr.mxu0 %v9059_v38  ;;  %v9088_v38 = vld [vmem:[%s11211_s19 + $0x1f8] sm:$0xff] }
0x13bb   : > { %8084 = vmatpush1.msra.mxu0 %v9058_v56  ;;  %v9087_v56 = vld [vmem:[%s11211_s19 + $0x1f0] sm:$0xff] }
0x13bc   : > { %8085 = vmatprep.subr.mxu0 %v9057_v47  ;;  %v9083_v47 = vld [vmem:[%s11211_s19 + $0x1d0] sm:$0xff] }
0x13bd   : > { %8086 = vmatpush1.msra.mxu0 %v9056_v61  ;;  %v9082_v61 = vld [vmem:[%s11211_s19 + $0x1c8] sm:$0xff] }
0x13be   : > { %8362 = vmatprep.subr.mxu0 %v8342_v39  ;;  %v9081_v39 = vld [vmem:[%s11211_s19 + $0x1c0] sm:$0xff] }
0x146e   : > { %v7742_v49 = vpop.f32.mrf.mxu0 }
0x146f   : > { %v7743_v60 = vadd.f32 %v7742_v49, %v13950_v18  ;;  %v9079_v49 = vld [vmem:[%s11211_s19 + $0x1b0] sm:$0xff]  ;;  %v9076_v18 = vld [vmem:[%s11211_s19 + $0x198] sm:$0xff] }
0x1470   : > { %v7744_v58 = vpop.f32.mrf.mxu0 }
0x1471   : > { %v7751_v63 = vmax.f32 %v7743_v60, 0.0  ;;  %v9078_v58 = vld [vmem:[%s11211_s19 + $0x1a8] sm:$0xff]  ;;  %v9075_v60 = vld [vmem:[%s11211_s19 + $0x190] sm:$0xff] }
0x1472   : > { %v7747_v10 = vpop.f32.mrf.mxu0 }
0x1473   : > { %v7748_v57 = vadd.f32 %v7747_v10, %v13951_v25  ;;  %v9077_v10 = vld [vmem:[%s11211_s19 + $0x1a0] sm:$0xff]  ;;  %v9074_v25 = vld [vmem:[%s11211_s19 + $0x188] sm:$0xff] }
0x1474   : > { %v7749_v13 = vpop.f32.mrf.mxu0 }
0x1475   : > { %v7752_v59 = vmax.f32 %v7748_v57, 0.0  ;;  %v9073_v57 = vld [vmem:[%s11211_s19 + $0x180] sm:$0xff] }
0x1477   : > { %10816 = vmatprep.subr.mxu1 %v7752_v59 }
0x1478   : > { %10817 = vmatpush3.msra.mxu1 %v7752_v59 }
0x1479   : > { %10818 = vmatprep.subr.mxu1 %v7751_v63 }
0x147a   : > { %10819 = vmatpush3.msra.mxu1 %v7751_v63 }
0x147b   : > { %10821 = vmatmul.mubr.msk.f32.vlgmr.msra.gmra.mxu1 %vm3079_vm11, %v7754_v16  ;;  %7906 = vmatprep.subr.mxu1 %v9053_v14 }
0x147c   : > { %10823 = vmatprep.mubr.msk.f32.mxu1 %vm3079_vm11, %v7755_v23  ;;  %7907 = vmatpush1.msra.mxu1 %v9052_v45 }
0x147d   : > { %7908 = vmatprep.subr.mxu1 %v9051_v51 }
0x147e   : > { %7909 = vmatpush1.msra.mxu1 %v9050_v17 }
0x147f   : > { %10824 = vmatmul.mubr.msk.f32.gmra.mxu1 %vm3079_vm11, %v7756_v6  ;;  %7910 = vmatprep.subr.mxu1 %v9049_v43 }
0x1480   : > { %7911 = vmatpush1.msra.mxu1 %v9048_v4  ;;  %7954 = vmatprep.mubr.f32.mxu1 %v13944_v26 }
0x1481   : > { %7912 = vmatprep.subr.mxu1 %v9047_v12 }
0x1482   : > { %7913 = vmatpush1.msra.mxu1 %v9046_v27  ;;  %v13954_v27 = vld [vmem:[#allocation53_spill] sm:$0xff] }
0x1483   : > { %7914 = vmatprep.subr.mxu1 %v9045_v29 }
0x1484   : > { %7915 = vmatpush1.msra.mxu1 %v9044_v30 }
0x1485   : > { %7916 = vmatprep.subr.mxu1 %v9043_v33 }
0x1486   : > { %7917 = vmatpush1.msra.mxu1 %v9042_v41  ;;  %v13959_v41 = vld [vmem:[#allocation47_spill] sm:$0xff] }
0x1487   : > { %7918 = vmatprep.subr.mxu1 %v9041_v5  ;;  %v13960_v5 = vld [vmem:[#allocation48_spill] sm:$0xff] }
0x1488   : > { %7919 = vmatpush1.msra.mxu1 %v9040_v11  ;;  %v8352_v11 = vld [vmem:[%s13955_s4 + $0x8] sm:$0xff] }
0x1489   : > { %7920 = vmatprep.subr.mxu1 %v9039_v42  ;;  %v8353_v42 = vld [vmem:[%s13957_s8] sm:$0xff]  ;;  %s13977_s8 = sld [smem:[#allocation24_spill]] }
0x148a   : > { %7921 = vmatpush1.msra.mxu1 %v9038_v53  ;;  %v8328_v53 = vpop.permute.xlu1 %8327 }
0x148b   : > { %7980 = vmatprep.subr.mxu1 %v7869_v34  ;;  %v8330_v34 = vpop.permute.xlu0 %8329 }
0x148c   : > { %v8332_v36 = vsel %vm1320_vm2, %v8330_v34, %v8328_v53 }
0x153b   : > { %v10822_v21 = vpop.f32.mrf.mxu1 }
0x153c   : > { %9054 = vmatmul.mubr.msk.f32.vlgmr.msra.gmra.mxu1 %vm1733_vm10, %v10822_v21  ;;  %v8320_v21 = vpop.permute.xlu0 %8319 }
0x153d   : > { %7981 = vmatpush1.msra.mxu1 %v7868_v3  ;;  %v7835_v55 = vpop.f32.mrf.mxu1  ;;  %8028 = vmatprep.mubr.f32.mxu1 %v13944_v26  ;;  %v8318_v3 = vpop.permute.xlu1 %8317 }
0x153e   : > { %7982 = vmatprep.subr.mxu1 %v7867_v62 }
0x153f   : > { %7983 = vmatpush1.msra.mxu1 %v7866_v15  ;;  %v10825_v9 = vpop.f32.mrf.mxu1 }
0x1540   : > { %7984 = vmatprep.subr.mxu1 %v7865_v50  ;;  %v8312_v15 = vpop.permute.xlu0 %8311 }
0x1541   : > { %7985 = vmatpush1.msra.mxu1 %v7864_v52  ;;  %v7845_v1 = vpop.f32.mrf.mxu1  ;;  %v8310_v62 = vpop.permute.xlu1 %8309 }
0x1542   : > { %7986 = vmatprep.subr.mxu1 %v7863_v31  ;;  %9072 = vmatmul.mubr.msk.f32.vlgmr.msra.gmra.mxu0 %vm1733_vm10, %v7845_v1 }
0x1543   : > { %7987 = vmatpush1.msra.mxu1 %v7862_v32  ;;  %8363 = vmatpush1.msra.mxu0 %v8341_v40 }
0x1544   : > { %7988 = vmatprep.subr.mxu1 %v7861_v54  ;;  %9090 = vmatprep.mubr.msk.f32.mxu0 %vm3079_vm11, %v8352_v11  ;;  %v13395_v50 = vpop.permute.xlu0 %8303  ;;  %v8331_v54 = vsel %vm1320_vm2, %v8328_v53, %v8330_v34  ;;  %v13969_v11 = vld [vmem:[#allocation42_spill] sm:$0xff]  ;;  %v13970_v34 = vld [vmem:[#allocation41_spill] sm:$0xff] }
0x1545   : > { %7989 = vmatpush1.msra.mxu1 %v7860_v2 }
0x1546   : > { %7990 = vmatprep.subr.mxu1 %v7859_v19 }
0x1547   : > { %7991 = vmatpush1.msra.mxu1 %v7858_v22 }
0x1548   : > { %7992 = vmatprep.subr.mxu1 %v7857_v8  ;;  %v13961_v8 = vld [vmem:[#allocation34_spill] sm:$0xff] }
0x1549   : > { %7993 = vmatpush1.msra.mxu1 %v7856_v20  ;;  %v8334_v20 = vmul.f32 %v8332_v36, %v13961_v8 }
0x154a   : > { %7994 = vmatprep.subr.mxu1 %v7855_v28 }
0x154b   : > { %7995 = vmatpush1.msra.mxu1 %v7854_v24  ;;  %v13962_v24 = vld [vmem:[#allocation36_spill] sm:$0xff] }
0x154c   : > { %9055 = vmatmul.mubr.msk.f32.vlgmr.msra.gmra.mxu1 %vm1733_vm10, %v7835_v55  ;;  %8164 = vmatprep.subr.mxu1 %v9088_v38  ;;  %v13393_v55 = vpop.permute.xlu1 %8301  ;;  %v8333_v38 = vmul.f32 %v8331_v54, %v13962_v24 }
0x154d   : > { %8165 = vmatpush1.msra.mxu1 %v9087_v56  ;;  %8212 = vmatprep.mubr.f32.mxu1 %v13944_v26 }
0x154e   : > { %8166 = vmatprep.subr.mxu1 %v9086_v7 }
0x154f   : > { %8167 = vmatpush1.msra.mxu1 %v9085_v46 }
0x1550   : > { %8168 = vmatprep.subr.mxu1 %v9084_v37  ;;  %v13397_v52 = vpop.permute.xlu1 %8293 }
0x1551   : > { %8169 = vmatpush1.msra.mxu1 %v9083_v47 }
0x1552   : > { %8170 = vmatprep.subr.mxu1 %v9082_v61  ;;  %v13963_v61 = vld [vmem:[#allocation37_spill] sm:$0xff] }
0x1553   : > { %8171 = vmatpush1.msra.mxu1 %v9081_v39  ;;  %v13964_v39 = vld [vmem:[#allocation50_spill] sm:$0xff] }
0x1554   : > { %8172 = vmatprep.subr.mxu1 %v9080_v0  ;;  %v8326_v0 = vmul.f32 %v13964_v39, %v13963_v61 }
0x1555   : > { %8173 = vmatpush1.msra.mxu1 %v9079_v49 }
0x1556   : > { %8174 = vmatprep.subr.mxu1 %v9078_v58  ;;  %v13965_v58 = vld [vmem:[#allocation38_spill] sm:$0xff] }
0x1557   : > { %8175 = vmatpush1.msra.mxu1 %v9077_v10  ;;  %v13966_v10 = vld [vmem:[#allocation49_spill] sm:$0xff] }
0x1558   : > { %8176 = vmatprep.subr.mxu1 %v9076_v18  ;;  %v8325_v18 = vmul.f32 %v13966_v10, %v13965_v58 }
0x1559   : > { %8177 = vmatpush1.msra.mxu1 %v9075_v60 }
0x155a   : > { %8178 = vmatprep.subr.mxu1 %v9074_v25 }
0x155b   : > { %8179 = vmatpush1.msra.mxu1 %v9073_v57 }
0x155c   : > { %9089 = vmatmul.mubr.msk.f32.vlgmr.msra.gmra.mxu1 %vm1733_vm10, %v10825_v9  ;;  %v13399_v9 = vpop.permute.xlu0 %8295 }
0x155d   : > { %8573 = vmatprep.mubr.f32.mxu1 %v13944_v26 }
0x15fc   : > { %v7956_v13 = vpop.f32.mrf.mxu1 }
0x15fe   : > { %v7958_v59 = vpop.f32.mrf.mxu1 }
0x1602   : > { %v8121_v14 = vpop.f32.mrf.mxu0 }
0x1604   : > { %v8123_v51 = vpop.f32.mrf.mxu0 }
0x160c   : > { %v8030_v63 = vpop.f32.mrf.mxu1 }
0x160d   : > { %v8031_v23 = vadd.f32 %v8030_v63, %v7956_v13 }
0x160e   : > { %v8032_v16 = vpop.f32.mrf.mxu1 }
0x160f   : > { %v8033_v45 = vadd.f32 %v8032_v16, %v7958_v59  ;;  %v8126_v17 = vadd.f32 %v8121_v14, %v8031_v23  ;;  %v8321_v16 = vsel %vm1280_vm4, %v8318_v3, %v8320_v21  ;;  %v8322_v14 = vsel %vm1280_vm4, %v8320_v21, %v8318_v3 }
0x1611   : > { %v8127_v43 = vadd.f32 %v8123_v51, %v8033_v45  ;;  %v13967_v45 = vld [vmem:[#allocation39_spill] sm:$0xff] }
0x1612   : > { %v8324_v51 = vmul.f32 %v8321_v16, %v13967_v45  ;;  %v13976_v16 = vld [vmem:[#allocation32_spill] sm:$0xff] }
0x161c   : > { %v8214_v6 = vpop.f32.mrf.mxu1 }
0x161d   : > { %v8219_v4 = vadd.f32 %v8214_v6, %v8126_v17  ;;  %v13968_v6 = vld [vmem:[#allocation40_spill] sm:$0xff] }
0x161e   : > { %v8216_v12 = vpop.f32.mrf.mxu1 }
0x161f   : > { %v13349_v29 = vadd.f32 %v13954_v27, %v8219_v4  ;;  %v8220_v30 = vadd.f32 %v8216_v12, %v8127_v43  ;;  %v8323_v43 = vmul.f32 %v8322_v14, %v13968_v6  ;;  %v8313_v4 = vsel %vm1260_vm5, %v8310_v62, %v8312_v15 }
0x1621   : > { %v13352_v33 = vadd.f32 %v13954_v27, %v8220_v30  ;;  %8277 = vrot.lane.b32.xlu1 %v13349_v29, %s13855_s1  ;;  %v8314_v30 = vsel %vm1260_vm5, %v8312_v15, %v8310_v62  ;;  %v8306_v15 = vsel %vm1240_vm6, %v13395_v50, %v13393_v55 }
0x1622   : > { %v8315_v3 = vmul.f32 %v8314_v30, %v13970_v34 }
0x1623   : > { %8279 = vrot.lane.b32.xlu0 %v13352_v33, %s13855_s1 }
0x1625   : > { %8269 = vrot.lane.b32.xlu1 %v13349_v29, %s13858_s3 }
0x1627   : > { %8271 = vrot.lane.b32.xlu0 %v13352_v33, %s13858_s3 }
0x1629   : > { %8261 = vrot.lane.b32.xlu1 %v13349_v29, %s13956_s7 }
0x162b   : > { %8263 = vrot.lane.b32.xlu0 %v13352_v33, %s13956_s7 }
0x162d   : > { %8343 = vrot.lane.b32.xlu1 %v13959_v41, %s13958_s9 }
0x162f   : > { %8345 = vrot.lane.b32.xlu0 %v13960_v5, %s13958_s9 }
0x1631   : > { %8253 = vrot.lane.b32.xlu1 %v13349_v29, %s13859_s2 }
0x1633   : > { %8255 = vrot.lane.b32.xlu0 %v13352_v33, %s13859_s2 }
0x1635   : > { %8245 = vrot.lane.b32.xlu1 %v13349_v29, %s13860_s0 }
0x1637   : > { %8247 = vrot.lane.b32.xlu0 %v13352_v33, %s13860_s0 }
0x1639   : > { %8237 = vrot.lane.b32.xlu1 %v13349_v29, %s13861_s5 }
0x163b   : > { %8239 = vrot.lane.b32.xlu0 %v13352_v33, %s13861_s5 }
0x163d   : > { %8229 = vrot.lane.b32.xlu1 %v13349_v29, %s13862_s6 }
0x163f   : > { %8231 = vrot.lane.b32.xlu0 %v13352_v33, %s13862_s6 }
0x1641   : > { %8285 = vrot.lane.b32.xlu1 %v13349_v29, %s13958_s9 }
0x1643   : > { %8287 = vrot.lane.b32.xlu0 %v13352_v33, %s13958_s9 }
0x1645   : > { %8356 = vperm.xlu1 %10890, %v8353_v42   ;;  %v8316_v42 = vmul.f32 %v8313_v4, %v13969_v11 }
0x1693   : > { %v8278_v31 = vpop.permute.xlu1 %8277 }
0x1695   : > { %v8280_v32 = vpop.permute.xlu0 %8279 }
0x1696   : > { %v8281_v40 = vsel %vm1340_vm0, %v8278_v31, %v8280_v32  ;;  %v8282_v1 = vsel %vm1340_vm0, %v8280_v32, %v8278_v31 }
0x1697   : > { %v8283_v2 = vmul.f32 %v8281_v40, %v13952_v35  ;;  %v8284_v19 = vmul.f32 %v8282_v1, %v13949_v44  ;;  %v8270_v22 = vpop.permute.xlu1 %8269  ;;  %v13971_v40 = vld [vmem:[#allocation44_spill] sm:$0xff] }
0x1699   : > { %v8272_v28 = vpop.permute.xlu0 %8271  ;;  %8364 = vmatprep.subr.mxu0 %v8284_v19 }
0x169a   : > { %v8273_v56 = vsel %vm1320_vm2, %v8270_v22, %v8272_v28  ;;  %v8274_v7 = vsel %vm1320_vm2, %v8272_v28, %v8270_v22  ;;  %8365 = vmatpush1.msra.mxu0 %v8283_v2  ;;  %v13972_v2 = vld [vmem:[#allocation43_spill] sm:$0xff]  ;;  %v8297_v22 = vsel %vm1220_vm7, %v13397_v52, %v13399_v9 }
0x169b   : > { %v8275_v46 = vmul.f32 %v8273_v56, %v13962_v24  ;;  %v8276_v37 = vmul.f32 %v8274_v7, %v13961_v8  ;;  %8366 = vmatprep.subr.mxu0 %v8334_v20  ;;  %v8262_v47 = vpop.permute.xlu1 %8261  ;;  %v8307_v19 = vmul.f32 %v8306_v15, %v13972_v2  ;;  %v8298_v20 = vsel %vm1220_vm7, %v13399_v9, %v13397_v52  ;;  %v13973_v7 = vld [vmem:[#allocation46_spill] sm:$0xff] }
0x169c   : > { %8367 = vmatpush1.msra.mxu0 %v8333_v38 }
0x169d   : > { %v8264_v49 = vpop.permute.xlu0 %8263  ;;  %8368 = vmatprep.subr.mxu0 %v8276_v37 }
0x169e   : > { %v8265_v60 = vsel %vm1300_vm3, %v8262_v47, %v8264_v49  ;;  %v8266_v25 = vsel %vm1300_vm3, %v8264_v49, %v8262_v47  ;;  %8369 = vmatpush1.msra.mxu0 %v8275_v46  ;;  %v8300_v46 = vmul.f32 %v8297_v22, %v13973_v7  ;;  %v13974_v47 = vld [vmem:[#allocation45_spill] sm:$0xff] }
0x169f   : > { %v8267_v57 = vmul.f32 %v8265_v60, %v13965_v58  ;;  %v8268_v13 = vmul.f32 %v8266_v25, %v13963_v61  ;;  %8370 = vmatprep.subr.mxu0 %v8326_v0  ;;  %v8344_v59 = vpop.permute.xlu1 %8343  ;;  %v8299_v39 = vmul.f32 %v8298_v20, %v13974_v47  ;;  %v13975_v60 = vld [vmem:[#allocation31_spill] sm:$0xff] }
0x16a0   : > { %8371 = vmatpush1.msra.mxu0 %v8325_v18 }
0x16a1   : > { %v8346_v63 = vpop.permute.xlu0 %8345  ;;  %8372 = vmatprep.subr.mxu0 %v8268_v13 }
0x16a2   : > { %8373 = vmatpush1.msra.mxu0 %v8267_v57  ;;  %v8348_v0 = vsel %vm1360_vm1, %v8346_v63, %v8344_v59  ;;  %v8347_v9 = vsel %vm1360_vm1, %v8344_v59, %v8346_v63 }
0x16a3   : > { %8374 = vmatprep.subr.mxu0 %v13960_v5  ;;  %v8254_v23 = vpop.permute.xlu1 %8253  ;;  %v8350_v25 = vmul.f32 %v8348_v0, %v13975_v60  ;;  %v8349_v14 = vmul.f32 %v8347_v9, %v13976_v16 }
0x16a4   : > { %8375 = vmatpush1.msra.mxu0 %v13959_v41 }
0x16a5   : > { %v8256_v17 = vpop.permute.xlu0 %8255  ;;  %8376 = vmatprep.subr.mxu0 %v13352_v33 }
0x16a6   : > { %v8257_v12 = vsel %vm1280_vm4, %v8254_v23, %v8256_v17  ;;  %v8258_v27 = vsel %vm1280_vm4, %v8256_v17, %v8254_v23  ;;  %8377 = vmatpush1.msra.mxu0 %v13349_v29  ;;  %v8305_v29 = vsel %vm1240_vm6, %v13393_v55, %v13395_v50  ;;  %v8351_v17 = vld [vmem:[%s13955_s4] sm:$0xff] }
0x16a7   : > { %v8259_v41 = vmul.f32 %v8258_v27, %v13968_v6  ;;  %v8260_v33 = vmul.f32 %v8257_v12, %v13967_v45  ;;  %8378 = vmatprep.subr.mxu0 %v8324_v51  ;;  %v8246_v5 = vpop.permute.xlu1 %8245  ;;  %v8308_v1 = vmul.f32 %v8305_v29, %v13971_v40 }
0x16a8   : > { %8379 = vmatpush1.msra.mxu0 %v8323_v43 }
0x16a9   : > { %v8248_v53 = vpop.permute.xlu0 %8247  ;;  %8380 = vmatprep.subr.mxu0 %v8260_v33 }
0x16aa   : > { %v8249_v21 = vsel %vm1260_vm5, %v8246_v5, %v8248_v53  ;;  %v8250_v62 = vsel %vm1260_vm5, %v8248_v53, %v8246_v5  ;;  %8381 = vmatpush1.msra.mxu0 %v8259_v41  ;;  %v8500_v5 = vld [vmem:[%s13977_s8] sm:$0xff] }
0x16ab   : > { %v8251_v31 = vmul.f32 %v8250_v62, %v13970_v34  ;;  %v8252_v32 = vmul.f32 %v8249_v21, %v13969_v11  ;;  %8382 = vmatprep.subr.mxu0 %v8316_v42  ;;  %v8238_v36 = vpop.permute.xlu1 %8237  ;;  %v8583_v42 = vld [vmem:[%s13978_s10] sm:$0x3] }
0x16ac   : > { %8383 = vmatpush1.msra.mxu0 %v8315_v3 }
0x16ad   : > { %v8240_v54 = vpop.permute.xlu0 %8239  ;;  %8384 = vmatprep.subr.mxu0 %v8252_v32 }
0x16ae   : > { %v8241_v55 = vsel %vm1240_vm6, %v8238_v36, %v8240_v54  ;;  %v8242_v50 = vsel %vm1240_vm6, %v8240_v54, %v8238_v36  ;;  %8385 = vmatpush1.msra.mxu0 %v8251_v31 }
0x16af   : > { %v8243_v28 = vmul.f32 %v8242_v50, %v13972_v2  ;;  %v8244_v38 = vmul.f32 %v8241_v55, %v13971_v40  ;;  %8386 = vmatprep.subr.mxu0 %v8308_v1  ;;  %v8230_v56 = vpop.permute.xlu1 %8229 }
0x16b0   : > { %8387 = vmatpush1.msra.mxu0 %v8307_v19 }
0x16b1   : > { %v8232_v37 = vpop.permute.xlu0 %8231  ;;  %8388 = vmatprep.subr.mxu0 %v8244_v38 }
0x16b2   : > { %v8233_v49 = vsel %vm1220_vm7, %v8230_v56, %v8232_v37  ;;  %v8234_v52 = vsel %vm1220_vm7, %v8232_v37, %v8230_v56  ;;  %8389 = vmatpush1.msra.mxu0 %v8243_v28 }
0x16b3   : > { %v8235_v10 = vmul.f32 %v8234_v52, %v13974_v47  ;;  %v8236_v18 = vmul.f32 %v8233_v49, %v13973_v7  ;;  %8390 = vmatprep.subr.mxu0 %v8300_v46  ;;  %v8286_v57 = vpop.permute.xlu1 %8285 }
0x16b4   : > { %8391 = vmatpush1.msra.mxu0 %v8299_v39 }
0x16b5   : > { %v8288_v13 = vpop.permute.xlu0 %8287  ;;  %8392 = vmatprep.subr.mxu0 %v8236_v18 }
0x16b6   : > { %v8289_v23 = vsel %vm1360_vm1, %v8286_v57, %v8288_v13  ;;  %v8290_v59 = vsel %vm1360_vm1, %v8288_v13, %v8286_v57  ;;  %8393 = vmatpush1.msra.mxu0 %v8235_v10 }
0x16b7   : > { %v8291_v63 = vmul.f32 %v8289_v23, %v13976_v16  ;;  %v8292_v51 = vmul.f32 %v8290_v59, %v13975_v60  ;;  %8422 = vmatprep.subr.mxu0 %v8350_v25 }
0x16b8   : > { %8423 = vmatpush2.msra.mxu0 %v8349_v14 }
0x16b9   : > { %8424 = vmatprep.subr.mxu0 %v8292_v51 }
0x16ba   : > { %8425 = vmatpush2.msra.mxu0 %v8291_v63 }
0x16bb   : > { %8427 = vmatmul.mubr.f32.vlgmr.msra.gmra.mxu0 %v8351_v17 }
0x16c0   : > { %v8357_v43 = vpop.permute.xlu1 %8356 }
0x177b   : > { %v8428_v4 = vpop.f32.mrf.mxu0 }
0x177c   : > { %v8429_v12 = vadd.f32 %v8428_v4, %v8357_v43 }
0x177d   : > { %v8430_v27 = vpop.f32.mrf.mxu0 }
0x177e   : > { %v8433_v30 = vmax.f32 %v8429_v12, 0.0  ;;  %v8431_v41 = vadd.f32 %v8430_v27, %v8357_v43 }
0x1780   : > { %v8434_v33 = vmax.f32 %v8431_v41, 0.0  ;;  %8491 = vrot.lane.b32.xlu0 %v8433_v30, %s13958_s9 }
0x1782   : > { %8493 = vrot.lane.b32.xlu1 %v8434_v33, %s13958_s9  ;;  %s13980_s9 = sld [smem:[#allocation25_spill]] }
0x1784   : > { %8483 = vrot.lane.b32.xlu0 %v8433_v30, %s13855_s1 }
0x1786   : > { %8485 = vrot.lane.b32.xlu1 %v8434_v33, %s13855_s1 }
0x1788   : > { %8475 = vrot.lane.b32.xlu0 %v8433_v30, %s13858_s3 }
0x178a   : > { %8477 = vrot.lane.b32.xlu1 %v8434_v33, %s13858_s3  ;;  %s9097_s3 = sshll.u32 %s13982_s23, 2 }
0x178c   : > { %8467 = vrot.lane.b32.xlu0 %v8433_v30, %s13956_s7 }
0x178e   : > { %8469 = vrot.lane.b32.xlu1 %v8434_v33, %s13956_s7 }
0x1790   : > { %8459 = vrot.lane.b32.xlu0 %v8433_v30, %s13859_s2 }
0x1792   : > { %8461 = vrot.lane.b32.xlu1 %v8434_v33, %s13859_s2 }
0x1794   : > { %8451 = vrot.lane.b32.xlu0 %v8433_v30, %s13860_s0 }
0x1796   : > { %8453 = vrot.lane.b32.xlu1 %v8434_v33, %s13860_s0 }
0x1798   : > { %8443 = vrot.lane.b32.xlu0 %v8433_v30, %s13861_s5 }
0x179a   : > { %8445 = vrot.lane.b32.xlu1 %v8434_v33, %s13861_s5  ;;  %s13979_s5 = sld [smem:[#allocation23_spill]] }
0x179c   : > { %8435 = vrot.lane.b32.xlu0 %v8433_v30, %s13862_s6 }
0x179e   : > { %8437 = vrot.lane.b32.xlu1 %v8434_v33, %s13862_s6  ;;  %s1196_s6 = scalar_lea.vmem %s11216_s12, %s9097_s3 }
0x17a0   : > { %8503 = vperm.xlu0 %10884, %v8500_v5   ;;  %v8499_v17 = vld [vmem:[%s13979_s5] sm:$0xff] }
0x17a2   : > { %8586 = vperm.xlu1 %10890, %v8583_v42  }
0x17f2   : > { %v8492_v53 = vpop.permute.xlu0 %8491 }
0x17f4   : > { %v8494_v3 = vpop.permute.xlu1 %8493 }
0x17f5   : > { %v8495_v29 = vsel %vm1360_vm1, %v8492_v53, %v8494_v3  ;;  %v8496_v21 = vsel %vm1360_vm1, %v8494_v3, %v8492_v53 }
0x17f6   : > { %v8497_v62 = vmul.f32 %v8495_v29, %v13976_v16  ;;  %v8498_v15 = vmul.f32 %v8496_v21, %v13975_v60  ;;  %v8484_v31 = vpop.permute.xlu0 %8483 }
0x17f8   : > { %v8486_v32 = vpop.permute.xlu1 %8485  ;;  %8523 = vmatprep.subr.mxu1 %v8498_v15 }
0x17f9   : > { %v8487_v36 = vsel %vm1340_vm0, %v8484_v31, %v8486_v32  ;;  %v8488_v1 = vsel %vm1340_vm0, %v8486_v32, %v8484_v31  ;;  %8524 = vmatpush1.msra.mxu1 %v8497_v62 }
0x17fa   : > { %v8489_v54 = vmul.f32 %v8487_v36, %v13952_v35  ;;  %v8490_v19 = vmul.f32 %v8488_v1, %v13949_v44  ;;  %v8476_v22 = vpop.permute.xlu0 %8475 }
0x17fc   : > { %v8478_v55 = vpop.permute.xlu1 %8477  ;;  %8525 = vmatprep.subr.mxu1 %v8490_v19 }
0x17fd   : > { %v8479_v50 = vsel %vm1320_vm2, %v8476_v22, %v8478_v55  ;;  %v8480_v20 = vsel %vm1320_vm2, %v8478_v55, %v8476_v22  ;;  %8526 = vmatpush1.msra.mxu1 %v8489_v54 }
0x17fe   : > { %v8481_v28 = vmul.f32 %v8479_v50, %v13962_v24  ;;  %v8482_v38 = vmul.f32 %v8480_v20, %v13961_v8  ;;  %v8468_v56 = vpop.permute.xlu0 %8467 }
0x1800   : > { %v8470_v46 = vpop.permute.xlu1 %8469  ;;  %8527 = vmatprep.subr.mxu1 %v8482_v38 }
0x1801   : > { %v8471_v44 = vsel %vm1300_vm3, %v8468_v56, %v8470_v46  ;;  %v8472_v35 = vsel %vm1300_vm3, %v8470_v46, %v8468_v56  ;;  %8528 = vmatpush1.msra.mxu1 %v8481_v28 }
0x1802   : > { %v8473_v37 = vmul.f32 %v8471_v44, %v13965_v58  ;;  %v8474_v39 = vmul.f32 %v8472_v35, %v13963_v61  ;;  %v8460_v0 = vpop.permute.xlu0 %8459 }
0x1804   : > { %v8462_v49 = vpop.permute.xlu1 %8461  ;;  %8529 = vmatprep.subr.mxu1 %v8474_v39 }
0x1805   : > { %v8463_v8 = vsel %vm1280_vm4, %v8460_v0, %v8462_v49  ;;  %v8464_v24 = vsel %vm1280_vm4, %v8462_v49, %v8460_v0  ;;  %8530 = vmatpush1.msra.mxu1 %v8473_v37 }
0x1806   : > { %v8465_v52 = vmul.f32 %v8464_v24, %v13968_v6  ;;  %v8466_v9 = vmul.f32 %v8463_v8, %v13967_v45  ;;  %8531 = vmatprep.subr.mxu1 %v8434_v33  ;;  %v8452_v10 = vpop.permute.xlu0 %8451 }
0x1807   : > { %8532 = vmatpush1.msra.mxu1 %v8433_v30  ;;  %v8582_v30 = vld [vmem:[%s13980_s9] sm:$0x3] }
0x1808   : > { %v8454_v58 = vpop.permute.xlu1 %8453  ;;  %8533 = vmatprep.subr.mxu1 %v8466_v9 }
0x1809   : > { %v8455_v61 = vsel %vm1260_vm5, %v8452_v10, %v8454_v58  ;;  %v8456_v18 = vsel %vm1260_vm5, %v8454_v58, %v8452_v10  ;;  %8534 = vmatpush1.msra.mxu1 %v8465_v52 }
0x180a   : > { %v8457_v60 = vmul.f32 %v8456_v18, %v13970_v34  ;;  %v8458_v25 = vmul.f32 %v8455_v61, %v13969_v11  ;;  %v8444_v57 = vpop.permute.xlu0 %8443 }
0x180c   : > { %v8446_v6 = vpop.permute.xlu1 %8445  ;;  %8535 = vmatprep.subr.mxu1 %v8458_v25 }
0x180d   : > { %v8447_v45 = vsel %vm1240_vm6, %v8444_v57, %v8446_v6  ;;  %v8448_v13 = vsel %vm1240_vm6, %v8446_v6, %v8444_v57  ;;  %8536 = vmatpush1.msra.mxu1 %v8457_v60 }
0x180e   : > { %v8449_v16 = vmul.f32 %v8448_v13, %v13972_v2  ;;  %v8450_v14 = vmul.f32 %v8447_v45, %v13971_v40  ;;  %v8436_v23 = vpop.permute.xlu0 %8435 }
0x1810   : > { %v8438_v59 = vpop.permute.xlu1 %8437  ;;  %8537 = vmatprep.subr.mxu1 %v8450_v14 }
0x1811   : > { %v8439_v11 = vsel %vm1220_vm7, %v8436_v23, %v8438_v59  ;;  %v8440_v34 = vsel %vm1220_vm7, %v8438_v59, %v8436_v23  ;;  %8538 = vmatpush1.msra.mxu1 %v8449_v16 }
0x1812   : > { %v8441_v63 = vmul.f32 %v8440_v34, %v13974_v47  ;;  %v8442_v51 = vmul.f32 %v8439_v11, %v13973_v7 }
0x1814   : > { %8539 = vmatprep.subr.mxu1 %v8442_v51 }
0x1815   : > { %8540 = vmatpush1.msra.mxu1 %v8441_v63 }
0x1816   : > { %9091 = vmatmul.mubr.msk.f32.vlgmr.msra.gmra.mxu1 %vm1383_vm8, %v8499_v17 }
0x1817   : > { %8657 = vmatprep.mubr.f32.mxu1 %v13944_v26 }
0x181b   : > { %v8504_v2 = vpop.permute.xlu0 %8503 }
0x181d   : > { %v8587_v47 = vpop.permute.xlu1 %8586 }
0x18d6   : > { %v8575_v40 = vpop.f32.mrf.mxu1 }
0x18d7   : > { %v8576_v43 = vadd.f32 %v8575_v40, %v8504_v2 }
0x18d8   : > { %v8577_v48 = vpop.f32.mrf.mxu1 }
0x18d9   : > { %v8578_v4 = vadd.f32 %v8577_v48, %v8504_v2  ;;  %v8580_v27 = vmax.f32 %v8576_v43, 0.0 }
0x18db   : > { %v8581_v12 = vmax.f32 %v8578_v4, 0.0 }
0x18dd   : > { %8623 = vmatprep.subr.mxu1 %v8581_v12 }
0x18de   : > { %8624 = vmatpush1.msra.mxu1 %v8580_v27 }
0x18df   : > { %9092 = vmatmul.mubr.msk.f32.vlgmr.msra.gmra.mxu1 %vm8589_vm13, %v8582_v30 }
0x199f   : > { %v8659_v7 = vpop.f32.mrf.mxu1 }
0x19a0   : > { %v8660_v33 = vadd.f32 %v8659_v7, %v8587_v47 }
0x19a1   : > { %v8661_v41 = vpop.f32.mrf.mxu1 }
0x19a2   : > { %v8662_v5 = vadd.f32 %v8661_v41, %v8587_v47 }
0x19a4   : > { %v8666_v26 = vcombine.low %v8660_v33, %v8662_v5 }
0x19a6   : > { %9093 = vst.sshfl [vmem:[%s1196_s6] sm:$0x33 pattern:$0x76325410] %v8666_v26 }
0x19a7 PF: > { %s89_s22 = sadd.s32 1, %s10961_s22  }
0x19a8   : > { %p86_p4 = scmp.ge.s32.totalorder %s89_s22, 4  }
0x19aa   :  { %88 = sbr.rel (!%p86_p4) target bundleno = 69 (0x45), region = 275 }

</bundles_post_ra>
